<compile_context>
chip_gen: v7x
topology: tpu7x:2x2x1
jax: 0.10.0
libtpu: 0.0.40
codegen_flags: <defaults>
</compile_context>

<pallas_src>
import numpy as np
import jax
import jax.numpy as jnp
from jax import lax
from jax.experimental import pallas as pl
from jax.experimental.pallas import tpu as pltpu

_MASK_BIAS = -1e30  # python float; used only in the wrapper (never captured by the kernel)


# ---------------- kernel factory (static shapes / flags closed over as Python values) ----------------
def _make_kernel(n_heads, head_dim, seq_k, has_q_bias, has_kv_bias):
    hd = n_heads * head_dim
    temp = 1.0 / (head_dim ** 0.5)          # softmax_temp = 1/sqrt(D); Python literal

    def kernel(*refs):
        if has_kv_bias and has_q_bias:
            q_ref, k_ref, v_ref, bq_ref, bk_ref, o_ref = refs
        elif has_kv_bias:
            q_ref, k_ref, v_ref, bk_ref, o_ref = refs
            bq_ref = None
        else:
            q_ref, k_ref, v_ref, o_ref = refs
            bq_ref = bk_ref = None

        q = q_ref[0].astype(jnp.float32)                # (Lb, H*D)  lane-dense
        k = k_ref[0].astype(jnp.float32)                # (S,  H*D)
        v = v_ref[0].astype(jnp.float32)                # (S,  H*D)
        bq = bq_ref[0] if bq_ref is not None else None  # (Lb, 1) additive bias (0 / -1e30)
        bk = bk_ref[0] if bk_ref is not None else None  # (1,  S) additive bias (0 / -1e30)

        # Column index of every fused feature column (2D iota, built in-kernel).
        col = lax.broadcasted_iota(jnp.int32, (seq_k, hd), 1)   # (S, H*D)

        out = None
        for h in range(n_heads):
            lo = h * head_dim
            hi = (h + 1) * head_dim
            sel = (col >= lo) & (col < hi)
            k_h = jnp.where(sel, k, 0.0)   # zero other heads' columns -> kills cross-head terms
            v_h = jnp.where(sel, v, 0.0)   # zero other heads' output columns

            # scores_h = q . k_h^T  (full 128-wide contraction; zeroed columns contribute 0)
            sc = lax.dot_general(q, k_h, (((1,), (1,)), ((), ())),
                                 preferred_element_type=jnp.float32) * temp    # (Lb, S)
            if bk is not None:
                sc = sc + bk
            if bq is not None:
                sc = sc + bq

            m = jnp.max(sc, axis=-1, keepdims=True)
            e = jnp.exp(sc - m)
            denom = jnp.sum(e, axis=-1, keepdims=True)
            a = e * pl.reciprocal(denom, approx=True)            # EUP reciprocal

            # out_h = A . v_h : only head h's output columns are nonzero
            o_h = lax.dot_general(a, v_h, (((1,), (0,)), ((), ())),
                                  preferred_element_type=jnp.float32)          # (Lb, H*D)
            out = o_h if out is None else out + o_h

        o_ref[0] = out.astype(o_ref.dtype)

    return kernel


# ---------------- wrapper ----------------
def full_attention(queries, keys, values, q_mask=None, kv_mask=None):
    """queries: (N, L, H, D); keys/values: (N, S, H, D); q_mask: (N, L); kv_mask: (N, S)."""
    n, l, h, d = queries.shape
    s = keys.shape[1]
    hd = h * d

    # Lane-dense fused-head views; contiguous reshapes are free (no HBM copy / transpose).
    q2 = queries.reshape(n, l, hd)
    k2 = keys.reshape(n, s, hd)
    v2 = values.reshape(n, s, hd)

    has_kv = kv_mask is not None
    has_q = has_kv and (q_mask is not None)   # torch applies masks only when kv_mask is given

    # Split L when N == 1 so v7x's second TensorCore still gets a parallel block;
    # otherwise keep one big block per batch element (fewer steps for single-TC v5e/v6e).
    l_blocks = 2 if (n == 1 and l >= 16 and l % 16 == 0) else 1
    lb = l // l_blocks

    in_specs = [
        pl.BlockSpec((1, lb, hd), lambda i, j: (i, j, 0)),   # q
        pl.BlockSpec((1, s, hd), lambda i, j: (i, 0, 0)),    # k
        pl.BlockSpec((1, s, hd), lambda i, j: (i, 0, 0)),    # v
    ]
    args = [q2, k2, v2]

    if has_q:
        bq = jnp.where(q_mask, 0.0, _MASK_BIAS).astype(jnp.float32).reshape(n, l, 1)
        in_specs.append(pl.BlockSpec((1, lb, 1), lambda i, j: (i, j, 0)))
        args.append(bq)
    if has_kv:
        bk = jnp.where(kv_mask, 0.0, _MASK_BIAS).astype(jnp.float32).reshape(n, 1, s)
        in_specs.append(pl.BlockSpec((1, 1, s), lambda i, j: (i, 0, 0)))
        args.append(bk)

    out = pl.pallas_call(
        _make_kernel(h, d, s, has_q, has_kv),
        out_shape=jax.ShapeDtypeStruct((n, l, hd), queries.dtype),
        grid=(n, l_blocks),
        in_specs=in_specs,
        out_specs=pl.BlockSpec((1, lb, hd), lambda i, j: (i, j, 0)),
        compiler_params=pltpu.CompilerParams(
            dimension_semantics=("parallel", "parallel")),
    )(*args)

    return out.reshape(n, l, h, d)        # free reshape back to (N, L, H, D)


# ---------------- pure-JAX reference (mirrors the torch module) ----------------
def full_attention_ref(q, k, v, q_mask=None, kv_mask=None):
    qk = jnp.einsum('nlhd,nshd->nlsh', q, k)
    if kv_mask is not None:
        mask = q_mask[:, :, None, None] & kv_mask[:, None, :, None]
        qk = jnp.where(mask, qk, -jnp.inf)
    temp = 1.0 / (q.shape[3] ** 0.5)
    a = jax.nn.softmax(temp * qk, axis=2)
    return jnp.einsum('nlsh,nshd->nlhd', a, v)


if __name__ == "__main__":
    key = jax.random.PRNGKey(0)
    kq, kk, kvv = jax.random.split(key, 3)

    # small shapes consistent with the module: batch=2, L=128 queries, S=256 keys,
    # heads=4, head_dim=32
    N_, L_, S_, H_, D_ = 2, 128, 256, 4, 32
    q = jax.random.normal(kq, (N_, L_, H_, D_), jnp.float32)
    k = jax.random.normal(kk, (N_, S_, H_, D_), jnp.float32)
    v = jax.random.normal(kvv, (N_, S_, H_, D_), jnp.float32)

    q_mask = jnp.ones((N_, L_), bool)                         # all queries valid
    valid_lens = jnp.array([200, 173])
    kv_mask = jnp.arange(S_)[None, :] < valid_lens[:, None]   # key padding mask

    # masked path
    out = jax.block_until_ready(jax.jit(full_attention)(q, k, v, q_mask, kv_mask))
    ref = full_attention_ref(q, k, v, q_mask, kv_mask)
    assert out.shape == (N_, L_, H_, D_) and out.dtype == jnp.float32
    np.testing.assert_allclose(np.asarray(out), np.asarray(ref), rtol=2e-3, atol=2e-3)

    # no-mask path
    out2 = jax.block_until_ready(jax.jit(full_attention)(q, k, v))
    ref2 = full_attention_ref(q, k, v)
    np.testing.assert_allclose(np.asarray(out2), np.asarray(ref2), rtol=2e-3, atol=2e-3)

    print("KERNEL_OK")
</pallas_src>

<mosaic_0001>
module attributes {stable_mosaic.version = 11 : i64} {
  func.func @kernel(%arg0: i32, %arg1: i32, %arg2: memref<1x128x128xf32, #tpu.memory_space<vmem>>, %arg3: memref<1x256x128xf32, #tpu.memory_space<vmem>>, %arg4: memref<1x256x128xf32, #tpu.memory_space<vmem>>, %arg5: memref<1x128x1xf32, #tpu.memory_space<vmem>>, %arg6: memref<1x1x256xf32, #tpu.memory_space<vmem>>, %arg7: memref<1x128x128xf32, #tpu.memory_space<vmem>>) attributes {dimension_semantics = [#tpu.dimension_semantics<parallel>, #tpu.dimension_semantics<parallel>], iteration_bounds = array<i64: 2, 1>, scalar_prefetch = 0 : i64, scratch_operands = 0 : i64, tpu.core_type = #tpu.core_type<tc>, window_params = [{transform_indices = @transform_0, window_bounds = array<i64: 1, 128, 128>}, {transform_indices = @transform_1, window_bounds = array<i64: 1, 256, 128>}, {transform_indices = @transform_2, window_bounds = array<i64: 1, 256, 128>}, {transform_indices = @transform_3, window_bounds = array<i64: 1, 128, 1>}, {transform_indices = @transform_4, window_bounds = array<i64: 1, 1, 256>}, {transform_indices = @transform_5, window_bounds = array<i64: 1, 128, 128>}]} {
    %c0 = arith.constant 0 : index
    %c0_0 = arith.constant 0 : index
    %c0_1 = arith.constant 0 : index
    %0 = vector.load %arg2[%c0, %c0_0, %c0_1] : memref<1x128x128xf32, #tpu.memory_space<vmem>>, vector<1x128x128xf32>
    %1 = vector.shape_cast %0 : vector<1x128x128xf32> to vector<128x128xf32>
    %c0_2 = arith.constant 0 : index
    %c0_3 = arith.constant 0 : index
    %c0_4 = arith.constant 0 : index
    %2 = vector.load %arg3[%c0_2, %c0_3, %c0_4] : memref<1x256x128xf32, #tpu.memory_space<vmem>>, vector<1x256x128xf32>
    %3 = vector.shape_cast %2 : vector<1x256x128xf32> to vector<256x128xf32>
    %c0_5 = arith.constant 0 : index
    %c0_6 = arith.constant 0 : index
    %c0_7 = arith.constant 0 : index
    %4 = vector.load %arg4[%c0_5, %c0_6, %c0_7] : memref<1x256x128xf32, #tpu.memory_space<vmem>>, vector<1x256x128xf32>
    %5 = vector.shape_cast %4 : vector<1x256x128xf32> to vector<256x128xf32>
    %c0_8 = arith.constant 0 : index
    %c0_9 = arith.constant 0 : index
    %c0_10 = arith.constant 0 : index
    %6 = vector.load %arg5[%c0_8, %c0_9, %c0_10] : memref<1x128x1xf32, #tpu.memory_space<vmem>>, vector<1x128x1xf32>
    %7 = vector.shape_cast %6 : vector<1x128x1xf32> to vector<128x1xf32>
    %c0_11 = arith.constant 0 : index
    %c0_12 = arith.constant 0 : index
    %c0_13 = arith.constant 0 : index
    %8 = vector.load %arg6[%c0_11, %c0_12, %c0_13] : memref<1x1x256xf32, #tpu.memory_space<vmem>>, vector<1x1x256xf32>
    %9 = vector.shape_cast %8 : vector<1x1x256xf32> to vector<1x256xf32>
    %10 = tpu.iota {dimensions = array<i32: 1>} : vector<256x128xi32>
    %c0_i32 = arith.constant 0 : i32
    %11 = vector.broadcast %c0_i32 : i32 to vector<256x128xi32>
    %12 = arith.cmpi sge, %10, %11 : vector<256x128xi32>
    %c32_i32 = arith.constant 32 : i32
    %13 = vector.broadcast %c32_i32 : i32 to vector<256x128xi32>
    %14 = arith.cmpi slt, %10, %13 : vector<256x128xi32>
    %15 = arith.andi %12, %14 : vector<256x128xi1>
    %cst = arith.constant 0.000000e+00 : f32
    %16 = vector.broadcast %cst : f32 to vector<256x128xf32>
    %17 = arith.select %15, %3, %16 : vector<256x128xi1>, vector<256x128xf32>
    %cst_14 = arith.constant 0.000000e+00 : f32
    %18 = vector.broadcast %cst_14 : f32 to vector<256x128xf32>
    %19 = arith.select %15, %5, %18 : vector<256x128xi1>, vector<256x128xf32>
    %cst_15 = arith.constant dense<0.000000e+00> : vector<128x256xf32>
    %20 = tpu.matmul %1, %17, %cst_15 {dimension_numbers = #tpu.dot_dimension_numbers<[1], [1], [0], [0], [0, 0, 1, 0], [], []>} : vector<128x128xf32>, vector<256x128xf32>, vector<128x256xf32> -> vector<128x256xf32>
    %cst_16 = arith.constant 0.176776692 : f32
    %21 = vector.broadcast %cst_16 : f32 to vector<128x256xf32>
    %22 = arith.mulf %20, %21 : vector<128x256xf32>
    %23 = vector.broadcast %9 : vector<1x256xf32> to vector<128x256xf32>
    %24 = arith.addf %22, %23 : vector<128x256xf32>
    %25 = vector.broadcast %7 : vector<128x1xf32> to vector<128x256xf32>
    %26 = arith.addf %24, %25 : vector<128x256xf32>
    %cst_17 = arith.constant dense<0xFF800000> : vector<128xf32>
    %27 = vector.multi_reduction <maximumf>, %26, %cst_17 [1] : vector<128x256xf32> to vector<128xf32>
    %28 = vector.shape_cast %27 : vector<128xf32> to vector<128x1xf32>
    %29 = vector.broadcast %28 : vector<128x1xf32> to vector<128x256xf32>
    %30 = arith.subf %26, %29 : vector<128x256xf32>
    %31 = math.exp %30 : vector<128x256xf32>
    %cst_18 = arith.constant dense<0.000000e+00> : vector<128xf32>
    %32 = vector.multi_reduction <add>, %31, %cst_18 [1] : vector<128x256xf32> to vector<128xf32>
    %33 = vector.shape_cast %32 : vector<128xf32> to vector<128x1xf32>
    %34 = tpu.reciprocal %33 {approx = true} : vector<128x1xf32> -> vector<128x1xf32>
    %35 = vector.broadcast %34 : vector<128x1xf32> to vector<128x256xf32>
    %36 = arith.mulf %31, %35 : vector<128x256xf32>
    %cst_19 = arith.constant dense<0.000000e+00> : vector<128x128xf32>
    %37 = tpu.matmul %36, %19, %cst_19 {dimension_numbers = #tpu.dot_dimension_numbers<[1], [0], [0], [1], [0, 0, 1, 1], [], []>} : vector<128x256xf32>, vector<256x128xf32>, vector<128x128xf32> -> vector<128x128xf32>
    %c32_i32_20 = arith.constant 32 : i32
    %38 = vector.broadcast %c32_i32_20 : i32 to vector<256x128xi32>
    %39 = arith.cmpi sge, %10, %38 : vector<256x128xi32>
    %c64_i32 = arith.constant 64 : i32
    %40 = vector.broadcast %c64_i32 : i32 to vector<256x128xi32>
    %41 = arith.cmpi slt, %10, %40 : vector<256x128xi32>
    %42 = arith.andi %39, %41 : vector<256x128xi1>
    %cst_21 = arith.constant 0.000000e+00 : f32
    %43 = vector.broadcast %cst_21 : f32 to vector<256x128xf32>
    %44 = arith.select %42, %3, %43 : vector<256x128xi1>, vector<256x128xf32>
    %cst_22 = arith.constant 0.000000e+00 : f32
    %45 = vector.broadcast %cst_22 : f32 to vector<256x128xf32>
    %46 = arith.select %42, %5, %45 : vector<256x128xi1>, vector<256x128xf32>
    %cst_23 = arith.constant dense<0.000000e+00> : vector<128x256xf32>
    %47 = tpu.matmul %1, %44, %cst_23 {dimension_numbers = #tpu.dot_dimension_numbers<[1], [1], [0], [0], [0, 0, 1, 0], [], []>} : vector<128x128xf32>, vector<256x128xf32>, vector<128x256xf32> -> vector<128x256xf32>
    %cst_24 = arith.constant 0.176776692 : f32
    %48 = vector.broadcast %cst_24 : f32 to vector<128x256xf32>
    %49 = arith.mulf %47, %48 : vector<128x256xf32>
    %50 = vector.broadcast %9 : vector<1x256xf32> to vector<128x256xf32>
    %51 = arith.addf %49, %50 : vector<128x256xf32>
    %52 = vector.broadcast %7 : vector<128x1xf32> to vector<128x256xf32>
    %53 = arith.addf %51, %52 : vector<128x256xf32>
    %cst_25 = arith.constant dense<0xFF800000> : vector<128xf32>
    %54 = vector.multi_reduction <maximumf>, %53, %cst_25 [1] : vector<128x256xf32> to vector<128xf32>
    %55 = vector.shape_cast %54 : vector<128xf32> to vector<128x1xf32>
    %56 = vector.broadcast %55 : vector<128x1xf32> to vector<128x256xf32>
    %57 = arith.subf %53, %56 : vector<128x256xf32>
    %58 = math.exp %57 : vector<128x256xf32>
    %cst_26 = arith.constant dense<0.000000e+00> : vector<128xf32>
    %59 = vector.multi_reduction <add>, %58, %cst_26 [1] : vector<128x256xf32> to vector<128xf32>
    %60 = vector.shape_cast %59 : vector<128xf32> to vector<128x1xf32>
    %61 = tpu.reciprocal %60 {approx = true} : vector<128x1xf32> -> vector<128x1xf32>
    %62 = vector.broadcast %61 : vector<128x1xf32> to vector<128x256xf32>
    %63 = arith.mulf %58, %62 : vector<128x256xf32>
    %cst_27 = arith.constant dense<0.000000e+00> : vector<128x128xf32>
    %64 = tpu.matmul %63, %46, %cst_27 {dimension_numbers = #tpu.dot_dimension_numbers<[1], [0], [0], [1], [0, 0, 1, 1], [], []>} : vector<128x256xf32>, vector<256x128xf32>, vector<128x128xf32> -> vector<128x128xf32>
    %65 = arith.addf %37, %64 : vector<128x128xf32>
    %c64_i32_28 = arith.constant 64 : i32
    %66 = vector.broadcast %c64_i32_28 : i32 to vector<256x128xi32>
    %67 = arith.cmpi sge, %10, %66 : vector<256x128xi32>
    %c96_i32 = arith.constant 96 : i32
    %68 = vector.broadcast %c96_i32 : i32 to vector<256x128xi32>
    %69 = arith.cmpi slt, %10, %68 : vector<256x128xi32>
    %70 = arith.andi %67, %69 : vector<256x128xi1>
    %cst_29 = arith.constant 0.000000e+00 : f32
    %71 = vector.broadcast %cst_29 : f32 to vector<256x128xf32>
    %72 = arith.select %70, %3, %71 : vector<256x128xi1>, vector<256x128xf32>
    %cst_30 = arith.constant 0.000000e+00 : f32
    %73 = vector.broadcast %cst_30 : f32 to vector<256x128xf32>
    %74 = arith.select %70, %5, %73 : vector<256x128xi1>, vector<256x128xf32>
    %cst_31 = arith.constant dense<0.000000e+00> : vector<128x256xf32>
    %75 = tpu.matmul %1, %72, %cst_31 {dimension_numbers = #tpu.dot_dimension_numbers<[1], [1], [0], [0], [0, 0, 1, 0], [], []>} : vector<128x128xf32>, vector<256x128xf32>, vector<128x256xf32> -> vector<128x256xf32>
    %cst_32 = arith.constant 0.176776692 : f32
    %76 = vector.broadcast %cst_32 : f32 to vector<128x256xf32>
    %77 = arith.mulf %75, %76 : vector<128x256xf32>
    %78 = vector.broadcast %9 : vector<1x256xf32> to vector<128x256xf32>
    %79 = arith.addf %77, %78 : vector<128x256xf32>
    %80 = vector.broadcast %7 : vector<128x1xf32> to vector<128x256xf32>
    %81 = arith.addf %79, %80 : vector<128x256xf32>
    %cst_33 = arith.constant dense<0xFF800000> : vector<128xf32>
    %82 = vector.multi_reduction <maximumf>, %81, %cst_33 [1] : vector<128x256xf32> to vector<128xf32>
    %83 = vector.shape_cast %82 : vector<128xf32> to vector<128x1xf32>
    %84 = vector.broadcast %83 : vector<128x1xf32> to vector<128x256xf32>
    %85 = arith.subf %81, %84 : vector<128x256xf32>
    %86 = math.exp %85 : vector<128x256xf32>
    %cst_34 = arith.constant dense<0.000000e+00> : vector<128xf32>
    %87 = vector.multi_reduction <add>, %86, %cst_34 [1] : vector<128x256xf32> to vector<128xf32>
    %88 = vector.shape_cast %87 : vector<128xf32> to vector<128x1xf32>
    %89 = tpu.reciprocal %88 {approx = true} : vector<128x1xf32> -> vector<128x1xf32>
    %90 = vector.broadcast %89 : vector<128x1xf32> to vector<128x256xf32>
    %91 = arith.mulf %86, %90 : vector<128x256xf32>
    %cst_35 = arith.constant dense<0.000000e+00> : vector<128x128xf32>
    %92 = tpu.matmul %91, %74, %cst_35 {dimension_numbers = #tpu.dot_dimension_numbers<[1], [0], [0], [1], [0, 0, 1, 1], [], []>} : vector<128x256xf32>, vector<256x128xf32>, vector<128x128xf32> -> vector<128x128xf32>
    %93 = arith.addf %65, %92 : vector<128x128xf32>
    %c96_i32_36 = arith.constant 96 : i32
    %94 = vector.broadcast %c96_i32_36 : i32 to vector<256x128xi32>
    %95 = arith.cmpi sge, %10, %94 : vector<256x128xi32>
    %c128_i32 = arith.constant 128 : i32
    %96 = vector.broadcast %c128_i32 : i32 to vector<256x128xi32>
    %97 = arith.cmpi slt, %10, %96 : vector<256x128xi32>
    %98 = arith.andi %95, %97 : vector<256x128xi1>
    %cst_37 = arith.constant 0.000000e+00 : f32
    %99 = vector.broadcast %cst_37 : f32 to vector<256x128xf32>
    %100 = arith.select %98, %3, %99 : vector<256x128xi1>, vector<256x128xf32>
    %cst_38 = arith.constant 0.000000e+00 : f32
    %101 = vector.broadcast %cst_38 : f32 to vector<256x128xf32>
    %102 = arith.select %98, %5, %101 : vector<256x128xi1>, vector<256x128xf32>
    %cst_39 = arith.constant dense<0.000000e+00> : vector<128x256xf32>
    %103 = tpu.matmul %1, %100, %cst_39 {dimension_numbers = #tpu.dot_dimension_numbers<[1], [1], [0], [0], [0, 0, 1, 0], [], []>} : vector<128x128xf32>, vector<256x128xf32>, vector<128x256xf32> -> vector<128x256xf32>
    %cst_40 = arith.constant 0.176776692 : f32
    %104 = vector.broadcast %cst_40 : f32 to vector<128x256xf32>
    %105 = arith.mulf %103, %104 : vector<128x256xf32>
    %106 = vector.broadcast %9 : vector<1x256xf32> to vector<128x256xf32>
    %107 = arith.addf %105, %106 : vector<128x256xf32>
    %108 = vector.broadcast %7 : vector<128x1xf32> to vector<128x256xf32>
    %109 = arith.addf %107, %108 : vector<128x256xf32>
    %cst_41 = arith.constant dense<0xFF800000> : vector<128xf32>
    %110 = vector.multi_reduction <maximumf>, %109, %cst_41 [1] : vector<128x256xf32> to vector<128xf32>
    %111 = vector.shape_cast %110 : vector<128xf32> to vector<128x1xf32>
    %112 = vector.broadcast %111 : vector<128x1xf32> to vector<128x256xf32>
    %113 = arith.subf %109, %112 : vector<128x256xf32>
    %114 = math.exp %113 : vector<128x256xf32>
    %cst_42 = arith.constant dense<0.000000e+00> : vector<128xf32>
    %115 = vector.multi_reduction <add>, %114, %cst_42 [1] : vector<128x256xf32> to vector<128xf32>
    %116 = vector.shape_cast %115 : vector<128xf32> to vector<128x1xf32>
    %117 = tpu.reciprocal %116 {approx = true} : vector<128x1xf32> -> vector<128x1xf32>
    %118 = vector.broadcast %117 : vector<128x1xf32> to vector<128x256xf32>
    %119 = arith.mulf %114, %118 : vector<128x256xf32>
    %cst_43 = arith.constant dense<0.000000e+00> : vector<128x128xf32>
    %120 = tpu.matmul %119, %102, %cst_43 {dimension_numbers = #tpu.dot_dimension_numbers<[1], [0], [0], [1], [0, 0, 1, 1], [], []>} : vector<128x256xf32>, vector<256x128xf32>, vector<128x128xf32> -> vector<128x128xf32>
    %121 = arith.addf %93, %120 : vector<128x128xf32>
    %c0_44 = arith.constant 0 : index
    %c0_45 = arith.constant 0 : index
    %c0_46 = arith.constant 0 : index
    %122 = vector.load %arg7[%c0_44, %c0_45, %c0_46] : memref<1x128x128xf32, #tpu.memory_space<vmem>>, vector<1x128x128xf32>
    %123 = vector.shape_cast %122 : vector<1x128x128xf32> to vector<128x128xf32>
    %124 = vector.shape_cast %121 : vector<128x128xf32> to vector<1x128x128xf32>
    tpu.vector_store %arg7[%c0_44, %c0_45, %c0_46], %124 {strides = array<i32>} : memref<1x128x128xf32, #tpu.memory_space<vmem>>, vector<1x128x128xf32>,
    return
  }
  func.func @transform_0(%arg0: i32, %arg1: i32) -> (i32, i32, i32) {
    %c0_i32 = arith.constant 0 : i32
    %c0_i32_0 = arith.constant 0 : i32
    return %arg0, %arg1, %c0_i32 : i32, i32, i32
  }
  func.func @transform_1(%arg0: i32, %arg1: i32) -> (i32, i32, i32) {
    %c0_i32 = arith.constant 0 : i32
    %c0_i32_0 = arith.constant 0 : i32
    %c0_i32_1 = arith.constant 0 : i32
    return %arg0, %c0_i32, %c0_i32_0 : i32, i32, i32
  }
  func.func @transform_2(%arg0: i32, %arg1: i32) -> (i32, i32, i32) {
    %c0_i32 = arith.constant 0 : i32
    %c0_i32_0 = arith.constant 0 : i32
    %c0_i32_1 = arith.constant 0 : i32
    return %arg0, %c0_i32, %c0_i32_0 : i32, i32, i32
  }
  func.func @transform_3(%arg0: i32, %arg1: i32) -> (i32, i32, i32) {
    %c0_i32 = arith.constant 0 : i32
    %c0_i32_0 = arith.constant 0 : i32
    return %arg0, %arg1, %c0_i32 : i32, i32, i32
  }
  func.func @transform_4(%arg0: i32, %arg1: i32) -> (i32, i32, i32) {
    %c0_i32 = arith.constant 0 : i32
    %c0_i32_0 = arith.constant 0 : i32
    %c0_i32_1 = arith.constant 0 : i32
    return %arg0, %c0_i32, %c0_i32_0 : i32, i32, i32
  }
  func.func @transform_5(%arg0: i32, %arg1: i32) -> (i32, i32, i32) {
    %c0_i32 = arith.constant 0 : i32
    %c0_i32_0 = arith.constant 0 : i32
    return %arg0, %arg1, %c0_i32 : i32, i32, i32
  }
}

</mosaic_0001>

<bundles_post_ra>
// kernel: full_attention.1
= control target key start
LH: loop header
LB: loop body
LE: loop exit
PB: predicated region body
PF: predicated region fallthrough
CT: control target
= control target key end

     0   :  { %s5293_s18 = smov 0   ;;  %s5295_s19 = smov 0   ;;  %s7530_s0 = inlined_call_operand.vmem [shape: f32[2,128,128], index: 0, kind: input, shape index: {}]   ;;  %s7531_s1 = inlined_call_operand.vmem [shape: f32[2,256,128], index: 1, kind: input, shape index: {}]   ;;  %s7532_s2 = inlined_call_operand.vmem [shape: f32[2,256,128], index: 2, kind: input, shape index: {}]   ;;  %s7533_s3 = inlined_call_operand.vmem [shape: f32[2,128,1], index: 3, kind: input, shape index: {}]   ;;  %s7534_s4 = inlined_call_operand.vmem [shape: f32[2,1,256], index: 4, kind: input, shape index: {}]   ;;  %s7535_s5 = inlined_call_operand.vmem [shape: f32[2,128,128], index: 5, kind: output, shape index: {}]  }
   0x1   :  { %s5297_s20 = smov 0  }
   0x2 LB: > { %s27_s21 = sadd.s32 1, %s5256_s19  ;;  %p3576_p0 = scmp.ge.s32.totalorder %s5260_s20, 1  ;;  %s5260_s20 = sphi %s5297_s20, %s15_s20   ;;  %s5256_s19 = sphi %s5295_s19, %s8109_s19   ;;  %s5252_s18 = sphi %s5293_s18, %s8108_s18  }
   0x3   : > { %p29_p1 = scmp.ge.s32.totalorder %s27_s21, 2  ;;  %p254_p2 = scmp.lt.s32.totalorder %s5260_s20, 3 }
   0x5   : > { %s8111_s21 = smov (%p29_p1, %s27_s21), 0  ;;  %p255_p3 = pnand %p3576_p0, %p254_p2 }
   0x7   : > { %258 = sbr.rel (%p255_p3) target bundleno = 1567 (0x61f), region = 40 }
   0xe   : > { %p314_p4 = scmp.lt.s32.totalorder %s5252_s18, 1  ;;  %v454_v0 = vlaneseq  ;;  %v5262_v3 = vmov 0  }
   0xf   : > { %4836 = vset.pattern.permute.xlu0 %v5262_v3  ;;  %4837 = vset.pattern.permute.xlu1 %v5262_v3 }
  0x10   : > { %s8113_s18 = smov (!%p314_p4, %s5252_s18), 1  ;;  %v5313_v1 = vand.u32 127, %v454_v0  ;;  %v718_v2 = vshrl.u32 %v454_v0, 7 }
  0x11   : > { %s3847_s22 = sshll.u32 %s8113_s18, 8  ;;  %s3585_s23 = sshll.u32 %s8113_s18, 1 }
  0x12   : > { %vm457_vm0 = vcmp.lt.s32.totalorder %v5313_v1, 32  ;;  %v719_v4 = vsub.s32 0, %v718_v2  ;;  %v723_v5 = vsub.s32 1, %v718_v2  ;;  %vm1111_vm1 = vcmp.ge.s32.totalorder %v5313_v1, 32  ;;  %s5324_s26 = scalar_lea.vmem %s7531_s1, %s3847_s22  ;;  %s346_s29 = scalar_lea.vmem %s7534_s4, %s3585_s23 }
  0x13   : > { %vm5329_vm2 = vmpackc.low %vm457_vm0, %vm457_vm0  ;;  %vm1112_vm3 = vcmp.lt.s32.totalorder %v5313_v1, 64  ;;  %v389_v7 = vld [vmem:[%s5324_s26 + $0x80] sm:$0xff]  ;;  %v390_v8 = vld [vmem:[%s5324_s26 + $0x88] sm:$0xff]  ;;  %s5375_s30 = sshll.u32 %s8113_s18, 7  ;;  %s5816_s14 = scalar_lea.vmem %s7532_s2, %s3847_s22  ;;  %vm1965_vm6 = vcmp.ge.s32.totalorder %v5313_v1, 64  ;;  %vm1966_vm7 = vcmp.lt.s32.totalorder %v5313_v1, 96 }
  0x14   : > { %v453_v9 = vld [vmem:[%s346_s29] sm:$0x3]  ;;  %v5336_v10 = vpack.c.bf16 %v390_v8, %v389_v7  ;;  %vm1113_vm4 = vmand %vm1111_vm1, %vm1112_vm3  ;;  %v374_v14 = vld [vmem:[%s5324_s26 + $0x8] sm:$0xff]  ;;  %s5385_s8 = scalar_lea.vmem %s7530_s0, %s5375_s30  ;;  %s5414_s11 = scalar_lea.vmem %s7533_s3, %s5375_s30  ;;  %vm2690_vm10 = vcmp.ge.s32.totalorder %v5313_v1, 96 }
  0x15   : > { %v5338_v11 = vrot.slane %v453_v9, %v719_v4  ;;  %v5340_v12 = vrot.slane %v453_v9, %v723_v5  ;;  %v373_v13 = vld [vmem:[%s5324_s26] sm:$0xff]  ;;  %vm5344_vm5 = vmpackc.low %vm1113_vm4, %vm1113_vm4  ;;  %v391_v17 = vld [vmem:[%s5324_s26 + $0x90] sm:$0xff]  ;;  %s7487_s17 = scalar_lea.vmem %s7535_s5, %s5375_s30 }
  0x16   : > { %7735 = vst [vmem:[#allocation2_spill] sm:$0xff] %v5336_v10  ;;  %v5348_v16 = vpack.c.bf16 %v374_v14, %v373_v13  ;;  %v392_v18 = vld [vmem:[%s5324_s26 + $0x98] sm:$0xff]  ;;  %4429 = vmatprep.subr.msk.bf16.mxu0 %vm5329_vm2, %v5336_v10  ;;  %4477 = vmatprep.subr.msk.bf16.mxu1 %vm5344_vm5, %v5336_v10  ;;  %v375_v20 = vld [vmem:[%s5324_s26 + $0x10] sm:$0xff]  ;;  %v393_v22 = vld [vmem:[%s5324_s26 + $0xa0] sm:$0xff] }
  0x17   : > { %v5358_v19 = vpack.c.bf16 %v392_v18, %v391_v17  ;;  %v376_v21 = vld [vmem:[%s5324_s26 + $0x18] sm:$0xff]  ;;  %v394_v23 = vld [vmem:[%s5324_s26 + $0xa8] sm:$0xff]  ;;  %v5390_v26 = vld [vmem:[%s5385_s8] sm:$0xff] }
  0x18   : > { %7738 = vst [vmem:[#allocation3_spill] sm:$0xff] %v5348_v16  ;;  %4432 = vmatpush3.bf16.xpose.msk.msra.mxu0 %vm5329_vm2, %v5348_v16  ;;  %4480 = vmatpush3.bf16.xpose.msk.msra.mxu1 %vm5344_vm5, %v5348_v16  ;;  %v5379_v24 = vpack.c.bf16 %v376_v21, %v375_v20  ;;  %v5387_v25 = vpack.c.bf16 %v394_v23, %v393_v22  ;;  %v377_v27 = vld [vmem:[%s5324_s26 + $0x20] sm:$0xff]  ;;  %v378_v28 = vld [vmem:[%s5324_s26 + $0x28] sm:$0xff]  ;;  %v395_v29 = vld [vmem:[%s5324_s26 + $0xb0] sm:$0xff] }
  0x19   : > { %7739 = vst [vmem:[#allocation4_spill] sm:$0xff] %v5358_v19  ;;  %4435 = vmatprep.subr.msk.bf16.mxu0 %vm5329_vm2, %v5358_v19  ;;  %4483 = vmatprep.subr.msk.bf16.mxu1 %vm5344_vm5, %v5358_v19  ;;  %v396_v30 = vld [vmem:[%s5324_s26 + $0xb8] sm:$0xff]  ;;  %v5416_v31 = vpack.c.bf16 %v378_v28, %v377_v27  ;;  %v437_v33 = vld [vmem:[%s5414_s11] sm:$0xff]  ;;  %v439_v34 = vld [vmem:[%s5414_s11 + $0x10] sm:$0xff] }
  0x1a   : > { %7740 = vst [vmem:[#allocation5_spill] sm:$0xff] %v5379_v24  ;;  %7741 = vst [vmem:[#allocation6_spill] sm:$0xff] %v5387_v25  ;;  %3883 = vmatprep.mubr.f32.mxu0 %v5390_v26  ;;  %3947 = vmatprep.mubr.f32.mxu1 %v5390_v26  ;;  %v5418_v32 = vpack.c.bf16 %v396_v30, %v395_v29  ;;  %v438_v35 = vld [vmem:[%s5414_s11 + $0x8] sm:$0xff]  ;;  %v440_v36 = vld [vmem:[%s5414_s11 + $0x18] sm:$0xff] }
  0x1b   : > { %7742 = vst [vmem:[#allocation7_spill] sm:$0xff] %v5416_v31  ;;  %761 = vperm.xlu0 %4836, %v437_v33   ;;  %771 = vperm.xlu1 %4837, %v439_v34   ;;  %v379_v37 = vld [vmem:[%s5324_s26 + $0x30] sm:$0xff]  ;;  %v380_v38 = vld [vmem:[%s5324_s26 + $0x38] sm:$0xff]  ;;  %v397_v39 = vld [vmem:[%s5324_s26 + $0xc0] sm:$0xff] }
  0x1c   : > { %7743 = vst [vmem:[#allocation8_spill] sm:$0xff] %v5418_v32  ;;  %v398_v40 = vld [vmem:[%s5324_s26 + $0xc8] sm:$0xff]  ;;  %v441_v41 = vld [vmem:[%s5414_s11 + $0x20] sm:$0xff]  ;;  %v5442_v43 = vpack.c.bf16 %v380_v38, %v379_v37  ;;  %v443_v45 = vld [vmem:[%s5414_s11 + $0x30] sm:$0xff] }
  0x1d   : > { %v442_v42 = vld [vmem:[%s5414_s11 + $0x28] sm:$0xff]  ;;  %v5444_v44 = vpack.c.bf16 %v398_v40, %v397_v39  ;;  %v444_v46 = vld [vmem:[%s5414_s11 + $0x38] sm:$0xff]  ;;  %v381_v47 = vld [vmem:[%s5324_s26 + $0x40] sm:$0xff] }
  0x1e   : > { %7744 = vst [vmem:[#allocation9_spill] sm:$0xff] %v5442_v43  ;;  %v382_v48 = vld [vmem:[%s5324_s26 + $0x48] sm:$0xff]  ;;  %v399_v49 = vld [vmem:[%s5324_s26 + $0xd0] sm:$0xff]  ;;  %v400_v50 = vld [vmem:[%s5324_s26 + $0xd8] sm:$0xff] }
  0x1f   : > { %766 = vperm.xlu0 %4836, %v438_v35   ;;  %776 = vperm.xlu1 %4837, %v440_v36   ;;  %7745 = vst [vmem:[#allocation10_spill] sm:$0xff] %v5444_v44  ;;  %v445_v51 = vld [vmem:[%s5414_s11 + $0x40] sm:$0xff]  ;;  %v446_v52 = vld [vmem:[%s5414_s11 + $0x48] sm:$0xff]  ;;  %v5466_v53 = vpack.c.bf16 %v382_v48, %v381_v47  ;;  %v5468_v54 = vpack.c.bf16 %v400_v50, %v399_v49  ;;  %v447_v55 = vld [vmem:[%s5414_s11 + $0x50] sm:$0xff] }
  0x20   : > { %4438 = vmatpush3.bf16.xpose.msk.msra.mxu0 %vm5329_vm2, %v5379_v24  ;;  %4486 = vmatpush3.bf16.xpose.msk.msra.mxu1 %vm5344_vm5, %v5379_v24  ;;  %v448_v56 = vld [vmem:[%s5414_s11 + $0x58] sm:$0xff]  ;;  %v383_v57 = vld [vmem:[%s5324_s26 + $0x50] sm:$0xff]  ;;  %v401_v59 = vld [vmem:[%s5324_s26 + $0xe0] sm:$0xff] }
  0x21   : > { %4441 = vmatprep.subr.msk.bf16.mxu0 %vm5329_vm2, %v5387_v25  ;;  %4489 = vmatprep.subr.msk.bf16.mxu1 %vm5344_vm5, %v5387_v25  ;;  %7746 = vst [vmem:[#allocation11_spill] sm:$0xff] %v5466_v53  ;;  %7747 = vst [vmem:[#allocation12_spill] sm:$0xff] %v5468_v54  ;;  %v384_v58 = vld [vmem:[%s5324_s26 + $0x58] sm:$0xff]  ;;  %v402_v60 = vld [vmem:[%s5324_s26 + $0xe8] sm:$0xff] }
  0x22   : > { %v449_v61 = vld [vmem:[%s5414_s11 + $0x60] sm:$0xff]  ;;  %v450_v62 = vld [vmem:[%s5414_s11 + $0x68] sm:$0xff]  ;;  %v5490_v63 = vpack.c.bf16 %v384_v58, %v383_v57  ;;  %v5492_v0 = vpack.c.bf16 %v402_v60, %v401_v59  ;;  %v451_v2 = vld [vmem:[%s5414_s11 + $0x70] sm:$0xff] }
  0x23   : > { %781 = vperm.xlu0 %4836, %v441_v41   ;;  %786 = vperm.xlu1 %4837, %v442_v42   ;;  %v452_v3 = vld [vmem:[%s5414_s11 + $0x78] sm:$0xff]  ;;  %v385_v4 = vld [vmem:[%s5324_s26 + $0x60] sm:$0xff]  ;;  %v386_v5 = vld [vmem:[%s5324_s26 + $0x68] sm:$0xff] }
  0x24   : > { %7748 = vst [vmem:[#allocation13_spill] sm:$0xff] %v5490_v63  ;;  %7749 = vst [vmem:[#allocation14_spill] sm:$0xff] %v5492_v0  ;;  %v403_v7 = vld [vmem:[%s5324_s26 + $0xf0] sm:$0xff]  ;;  %v404_v8 = vld [vmem:[%s5324_s26 + $0xf8] sm:$0xff]  ;;  %v5512_v9 = vpack.c.bf16 %v386_v5, %v385_v4 }
  0x25   : > { %v5514_v13 = vpack.c.bf16 %v404_v8, %v403_v7  ;;  %v387_v14 = vld [vmem:[%s5324_s26 + $0x70] sm:$0xff]  ;;  %v388_v17 = vld [vmem:[%s5324_s26 + $0x78] sm:$0xff]  ;;  %v358_v20 = vld [vmem:[%s5385_s8 + $0x8] sm:$0xff] }
  0x26   : > { %7750 = vst [vmem:[#allocation15_spill] sm:$0xff] %v5512_v9  ;;  %v5530_v18 = vpack.c.bf16 %v388_v17, %v387_v14  ;;  %v359_v21 = vld [vmem:[%s5385_s8 + $0x10] sm:$0xff]  ;;  %v360_v22 = vld [vmem:[%s5385_s8 + $0x18] sm:$0xff]  ;;  %v361_v23 = vld [vmem:[%s5385_s8 + $0x20] sm:$0xff] }
  0x27   : > { %791 = vperm.xlu0 %4836, %v443_v45   ;;  %796 = vperm.xlu1 %4837, %v444_v46   ;;  %7751 = vst [vmem:[#allocation16_spill] sm:$0xff] %v5514_v13  ;;  %v363_v27 = vld [vmem:[%s5385_s8 + $0x30] sm:$0xff]  ;;  %v364_v28 = vld [vmem:[%s5385_s8 + $0x38] sm:$0xff]  ;;  %v365_v29 = vld [vmem:[%s5385_s8 + $0x40] sm:$0xff] }
  0x28   : > { %4444 = vmatpush3.bf16.xpose.msk.msra.mxu0 %vm5329_vm2, %v5416_v31  ;;  %4492 = vmatpush3.bf16.xpose.msk.msra.mxu1 %vm5344_vm5, %v5416_v31  ;;  %7752 = vst [vmem:[#allocation17_spill] sm:$0xff] %v5530_v18  ;;  %v366_v30 = vld [vmem:[%s5385_s8 + $0x48] sm:$0xff]  ;;  %v367_v33 = vld [vmem:[%s5385_s8 + $0x50] sm:$0xff]  ;;  %v368_v34 = vld [vmem:[%s5385_s8 + $0x58] sm:$0xff] }
  0x29   : > { %4447 = vmatprep.subr.msk.bf16.mxu0 %vm5329_vm2, %v5418_v32  ;;  %4495 = vmatprep.subr.msk.bf16.mxu1 %vm5344_vm5, %v5418_v32  ;;  %v369_v35 = vld [vmem:[%s5385_s8 + $0x60] sm:$0xff]  ;;  %v370_v36 = vld [vmem:[%s5385_s8 + $0x68] sm:$0xff]  ;;  %v371_v37 = vld [vmem:[%s5385_s8 + $0x70] sm:$0xff] }
  0x2a   : > { %v372_v38 = vld [vmem:[%s5385_s8 + $0x78] sm:$0xff]  ;;  %vm1967_vm8 = vmand %vm1965_vm6, %vm1966_vm7 }
  0x2b   : > { %801 = vperm.xlu0 %4836, %v445_v51   ;;  %806 = vperm.xlu1 %4837, %v446_v52   ;;  %vm6052_vm9 = vmpackc.low %vm1967_vm8, %vm1967_vm8 }
  0x2c   : > { %vm6383_vm11 = vmpackc.low %vm2690_vm10, %vm2690_vm10 }
  0x2f   : > { %811 = vperm.xlu0 %4836, %v447_v55   ;;  %816 = vperm.xlu1 %4837, %v448_v56  }
  0x30   : > { %4450 = vmatpush3.bf16.xpose.msk.msra.mxu0 %vm5329_vm2, %v5442_v43  ;;  %4498 = vmatpush3.bf16.xpose.msk.msra.mxu1 %vm5344_vm5, %v5442_v43 }
  0x31   : > { %4453 = vmatprep.subr.msk.bf16.mxu0 %vm5329_vm2, %v5444_v44  ;;  %4501 = vmatprep.subr.msk.bf16.mxu1 %vm5344_vm5, %v5444_v44 }
  0x33   : > { %821 = vperm.xlu0 %4836, %v449_v61   ;;  %826 = vperm.xlu1 %4837, %v450_v62  }
  0x37   : > { %831 = vperm.xlu0 %4836, %v451_v2   ;;  %836 = vperm.xlu1 %4837, %v452_v3  }
  0x38   : > { %4456 = vmatpush3.bf16.xpose.msk.msra.mxu0 %vm5329_vm2, %v5466_v53  ;;  %4504 = vmatpush3.bf16.xpose.msk.msra.mxu1 %vm5344_vm5, %v5466_v53 }
  0x39   : > { %4459 = vmatprep.subr.msk.bf16.mxu0 %vm5329_vm2, %v5468_v54  ;;  %4507 = vmatprep.subr.msk.bf16.mxu1 %vm5344_vm5, %v5468_v54 }
  0x40   : > { %4462 = vmatpush3.bf16.xpose.msk.msra.mxu0 %vm5329_vm2, %v5490_v63  ;;  %4510 = vmatpush3.bf16.xpose.msk.msra.mxu1 %vm5344_vm5, %v5490_v63 }
  0x41   : > { %4465 = vmatprep.subr.msk.bf16.mxu0 %vm5329_vm2, %v5492_v0  ;;  %4513 = vmatprep.subr.msk.bf16.mxu1 %vm5344_vm5, %v5492_v0 }
  0x48   : > { %4468 = vmatpush3.bf16.xpose.msk.msra.mxu0 %vm5329_vm2, %v5512_v9  ;;  %4516 = vmatpush3.bf16.xpose.msk.msra.mxu1 %vm5344_vm5, %v5512_v9 }
  0x49   : > { %4471 = vmatprep.subr.msk.bf16.mxu0 %vm5329_vm2, %v5514_v13  ;;  %4519 = vmatprep.subr.msk.bf16.mxu1 %vm5344_vm5, %v5514_v13 }
  0x50   : > { %4474 = vmatpush3.bf16.xpose.msk.msra.mxu0 %vm5329_vm2, %v5530_v18  ;;  %4522 = vmatpush3.bf16.xpose.msk.msra.mxu1 %vm5344_vm5, %v5530_v18 }
  0x57   : > { %3884 = vmatmul.mubr.f32.vlgmr.msra.gmra.mrb[0].mxu0 %v5390_v26  ;;  %3948 = vmatmul.mubr.f32.vlgmr.msra.gmra.mrb[0].mxu1 %v5390_v26  ;;  %v362_v26 = vld [vmem:[%s5385_s8 + $0x28] sm:$0xff] }
  0x58   : > { %3885 = vmatprep.mubr.f32.mxu0 %v358_v20  ;;  %3949 = vmatprep.mubr.f32.mxu1 %v358_v20 }
  0x5b   : > { %3886 = vmatmul.mubr.f32.gmra.mrb[2].mxu0 %v358_v20  ;;  %3950 = vmatmul.mubr.f32.gmra.mrb[2].mxu1 %v358_v20 }
  0x5c   : > { %3887 = vmatprep.mubr.f32.mxu0 %v359_v21  ;;  %3951 = vmatprep.mubr.f32.mxu1 %v359_v21 }
  0x5f   : > { %3888 = vmatmul.mubr.f32.gmra.mrb[4].mxu0 %v359_v21  ;;  %3952 = vmatmul.mubr.f32.gmra.mrb[4].mxu1 %v359_v21 }
  0x60   : > { %3889 = vmatprep.mubr.f32.mxu0 %v360_v22  ;;  %3953 = vmatprep.mubr.f32.mxu1 %v360_v22 }
  0x63   : > { %3890 = vmatmul.mubr.f32.gmra.mrb[6].mxu0 %v360_v22  ;;  %3954 = vmatmul.mubr.f32.gmra.mrb[6].mxu1 %v360_v22 }
  0x64   : > { %3891 = vmatprep.mubr.f32.mxu0 %v361_v23  ;;  %3955 = vmatprep.mubr.f32.mxu1 %v361_v23 }
  0x67   : > { %3892 = vmatmul.mubr.f32.gmra.mrb[8].mxu0 %v361_v23  ;;  %3956 = vmatmul.mubr.f32.gmra.mrb[8].mxu1 %v361_v23 }
  0x68   : > { %3893 = vmatprep.mubr.f32.mxu0 %v362_v26  ;;  %3957 = vmatprep.mubr.f32.mxu1 %v362_v26 }
  0x6b   : > { %3894 = vmatmul.mubr.f32.gmra.mrb[10].mxu0 %v362_v26  ;;  %3958 = vmatmul.mubr.f32.gmra.mrb[10].mxu1 %v362_v26 }
  0x6c   : > { %3895 = vmatprep.mubr.f32.mxu0 %v363_v27  ;;  %3959 = vmatprep.mubr.f32.mxu1 %v363_v27 }
  0x6f   : > { %3896 = vmatmul.mubr.f32.gmra.mrb[12].mxu0 %v363_v27  ;;  %3960 = vmatmul.mubr.f32.gmra.mrb[12].mxu1 %v363_v27 }
  0x70   : > { %3897 = vmatprep.mubr.f32.mxu0 %v364_v28  ;;  %3961 = vmatprep.mubr.f32.mxu1 %v364_v28 }
  0x73   : > { %3898 = vmatmul.mubr.f32.gmra.mrb[14].mxu0 %v364_v28  ;;  %3962 = vmatmul.mubr.f32.gmra.mrb[14].mxu1 %v364_v28 }
  0x74   : > { %3899 = vmatprep.mubr.f32.mxu0 %v365_v29  ;;  %3963 = vmatprep.mubr.f32.mxu1 %v365_v29 }
  0x77   : > { %3900 = vmatmul.mubr.f32.gmra.mrb[16].mxu0 %v365_v29  ;;  %3964 = vmatmul.mubr.f32.gmra.mrb[16].mxu1 %v365_v29 }
  0x78   : > { %3901 = vmatprep.mubr.f32.mxu0 %v366_v30  ;;  %3965 = vmatprep.mubr.f32.mxu1 %v366_v30 }
  0x7b   : > { %3902 = vmatmul.mubr.f32.gmra.mrb[18].mxu0 %v366_v30  ;;  %3966 = vmatmul.mubr.f32.gmra.mrb[18].mxu1 %v366_v30 }
  0x7c   : > { %3903 = vmatprep.mubr.f32.mxu0 %v367_v33  ;;  %3967 = vmatprep.mubr.f32.mxu1 %v367_v33 }
  0x7f   : > { %3904 = vmatmul.mubr.f32.gmra.mrb[20].mxu0 %v367_v33  ;;  %3968 = vmatmul.mubr.f32.gmra.mrb[20].mxu1 %v367_v33 }
  0x80   : > { %3905 = vmatprep.mubr.f32.mxu0 %v368_v34  ;;  %3969 = vmatprep.mubr.f32.mxu1 %v368_v34 }
  0x83   : > { %3906 = vmatmul.mubr.f32.gmra.mrb[22].mxu0 %v368_v34  ;;  %3970 = vmatmul.mubr.f32.gmra.mrb[22].mxu1 %v368_v34 }
  0x84   : > { %3907 = vmatprep.mubr.f32.mxu0 %v369_v35  ;;  %3971 = vmatprep.mubr.f32.mxu1 %v369_v35 }
  0x87   : > { %3908 = vmatmul.mubr.f32.gmra.mrb[24].mxu0 %v369_v35  ;;  %3972 = vmatmul.mubr.f32.gmra.mrb[24].mxu1 %v369_v35 }
  0x88   : > { %3909 = vmatprep.mubr.f32.mxu0 %v370_v36  ;;  %3973 = vmatprep.mubr.f32.mxu1 %v370_v36 }
  0x8b   : > { %3910 = vmatmul.mubr.f32.gmra.mrb[26].mxu0 %v370_v36  ;;  %3974 = vmatmul.mubr.f32.gmra.mrb[26].mxu1 %v370_v36 }
  0x8c   : > { %3911 = vmatprep.mubr.f32.mxu0 %v371_v37  ;;  %3975 = vmatprep.mubr.f32.mxu1 %v371_v37 }
  0x8f   : > { %3912 = vmatmul.mubr.f32.gmra.mrb[28].mxu0 %v371_v37  ;;  %3976 = vmatmul.mubr.f32.gmra.mrb[28].mxu1 %v371_v37 }
  0x90   : > { %3913 = vmatprep.mubr.f32.mxu0 %v372_v38  ;;  %3977 = vmatprep.mubr.f32.mxu1 %v372_v38 }
  0x93   : > { %3914 = vmatmul.mubr.f32.gmra.mrb[30].mxu0 %v372_v38  ;;  %3978 = vmatmul.mubr.f32.gmra.mrb[30].mxu1 %v372_v38 }
  0x9a   : > { %v5555_v39 = vpop.permute.xlu0 %761  ;;  %v5575_v61 = vpop.permute.xlu1 %771 }
  0x9b   : > { %7753 = vst [vmem:[#allocation18_spill] sm:$0xff] %v5555_v39  ;;  %7755 = vst [vmem:[#allocation20_spill] sm:$0xff] %v5575_v61 }
  0x9e   : > { %v5573_v60 = vpop.permute.xlu0 %766  ;;  %v5605_v37 = vpop.permute.xlu1 %776 }
  0x9f   : > { %7754 = vst [vmem:[#allocation19_spill] sm:$0xff] %v5573_v60  ;;  %7756 = vst [vmem:[#allocation21_spill] sm:$0xff] %v5605_v37 }
 0x12a   : > { %v5557_v40 = vpop.f32.mrb[0].mxu0  ;;  %v1244_v41 = vpop.f32.mrb[0].mxu1 }
 0x12b   : > { %v1339_v42 = vmul.f32 0.17677669, %v1244_v41  ;;  %v5559_v45 = vpop.f32.mrb[1].mxu0  ;;  %v1246_v46 = vpop.f32.mrb[1].mxu1 }
 0x12c   : > { %v1340_v47 = vmul.f32 0.17677669, %v1246_v46 }
 0x12d   : > { %v1371_v48 = vadd.f32 %v1339_v42, %v5338_v11 }
 0x12e   : > { %v1372_v49 = vadd.f32 %v1340_v47, %v5340_v12  ;;  %v5563_v50 = vpop.f32.mrb[2].mxu0  ;;  %v1250_v51 = vpop.f32.mrb[2].mxu1 }
 0x12f   : > { %v1341_v52 = vmul.f32 0.17677669, %v1250_v51  ;;  %v5565_v55 = vpop.f32.mrb[3].mxu0  ;;  %v1252_v56 = vpop.f32.mrb[3].mxu1  ;;  %v5568_v57 = vadd.f32 %v1371_v48, %v5555_v39 }
 0x130   : > { %v1342_v58 = vmul.f32 0.17677669, %v1252_v56  ;;  %v5571_v59 = vadd.f32 %v1372_v49, %v5555_v39 }
 0x131   : > { %v1373_v62 = vadd.f32 %v1341_v52, %v5338_v11 }
 0x132   : > { %v1374_v2 = vadd.f32 %v1342_v58, %v5340_v12  ;;  %v5579_v3 = vpop.f32.mrb[4].mxu0  ;;  %v1256_v4 = vpop.f32.mrb[4].mxu1  ;;  %v1435_v5 = vmax.f32 %v5568_v57, %v5571_v59 }
 0x133   : > { %v1343_v7 = vmul.f32 0.17677669, %v1256_v4  ;;  %v5583_v8 = vpop.f32.mrb[5].mxu0  ;;  %v1258_v14 = vpop.f32.mrb[5].mxu1  ;;  %v5586_v17 = vadd.f32 %v1373_v62, %v5573_v60 }
 0x134   : > { %v1344_v20 = vmul.f32 0.17677669, %v1258_v14  ;;  %1436 = vmax.xlane.f32.xlu0 %v1435_v5  ;;  %v5589_v21 = vadd.f32 %v1374_v2, %v5573_v60  ;;  %v5621_v62 = vpop.permute.xlu0 %781 }
 0x135   : > { %v1375_v22 = vadd.f32 %v1343_v7, %v5338_v11  ;;  %7757 = vst [vmem:[#allocation22_spill] sm:$0xff] %v5621_v62 }
 0x136   : > { %v1376_v23 = vadd.f32 %v1344_v20, %v5340_v12  ;;  %v5593_v26 = vpop.f32.mrb[6].mxu0  ;;  %v1262_v27 = vpop.f32.mrb[6].mxu1  ;;  %v1438_v28 = vmax.f32 %v5586_v17, %v5589_v21 }
 0x137   : > { %v1345_v29 = vmul.f32 0.17677669, %v1262_v27  ;;  %v5597_v30 = vpop.f32.mrb[7].mxu0  ;;  %v1264_v33 = vpop.f32.mrb[7].mxu1  ;;  %v5600_v34 = vadd.f32 %v1375_v22, %v5575_v61 }
 0x138   : > { %v1346_v35 = vmul.f32 0.17677669, %v1264_v33  ;;  %1439 = vmax.xlane.f32.xlu1 %v1438_v28  ;;  %v5603_v36 = vadd.f32 %v1376_v23, %v5575_v61  ;;  %v5637_v33 = vpop.permute.xlu1 %786 }
 0x139   : > { %v1377_v38 = vadd.f32 %v1345_v29, %v5338_v11  ;;  %7760 = vst [vmem:[#allocation25_spill] sm:$0xff] %v5637_v33 }
 0x13a   : > { %v1378_v41 = vadd.f32 %v1346_v35, %v5340_v12  ;;  %v5609_v42 = vpop.f32.mrb[8].mxu0  ;;  %v1268_v46 = vpop.f32.mrb[8].mxu1  ;;  %v1441_v47 = vmax.f32 %v5600_v34, %v5603_v36 }
 0x13b   : > { %v1347_v48 = vmul.f32 0.17677669, %v1268_v46  ;;  %v5613_v49 = vpop.f32.mrb[9].mxu0  ;;  %v1270_v51 = vpop.f32.mrb[9].mxu1  ;;  %v5616_v52 = vadd.f32 %v1377_v38, %v5605_v37 }
 0x13c   : > { %v1348_v56 = vmul.f32 0.17677669, %v1270_v51  ;;  %1442 = vmax.xlane.f32.xlu0 %v1441_v47  ;;  %v5619_v58 = vadd.f32 %v1378_v41, %v5605_v37 }
 0x13d   : > { %v1379_v2 = vadd.f32 %v1347_v48, %v5338_v11 }
 0x13e   : > { %v1380_v4 = vadd.f32 %v1348_v56, %v5340_v12  ;;  %v5625_v5 = vpop.f32.mrb[10].mxu0  ;;  %v1274_v7 = vpop.f32.mrb[10].mxu1  ;;  %v1444_v14 = vmax.f32 %v5616_v52, %v5619_v58 }
 0x13f   : > { %7758 = vst [vmem:[#allocation23_spill] sm:$0xff] %v5625_v5  ;;  %v1349_v20 = vmul.f32 0.17677669, %v1274_v7  ;;  %v5629_v22 = vpop.f32.mrb[11].mxu0  ;;  %v1276_v23 = vpop.f32.mrb[11].mxu1  ;;  %v5632_v27 = vadd.f32 %v1379_v2, %v5621_v62  ;;  %v418_v5 = vld [vmem:[%s5816_s14 + $0x68] sm:$0xff] }
 0x140   : > { %7759 = vst [vmem:[#allocation24_spill] sm:$0xff] %v5629_v22  ;;  %v1350_v28 = vmul.f32 0.17677669, %v1276_v23  ;;  %1445 = vmax.xlane.f32.xlu0 %v1444_v14  ;;  %v5635_v29 = vadd.f32 %v1380_v4, %v5621_v62  ;;  %v5653_v14 = vpop.permute.xlu0 %791  ;;  %v410_v22 = vld [vmem:[%s5816_s14 + $0x28] sm:$0xff] }
 0x141   : > { %v1381_v35 = vadd.f32 %v1349_v20, %v5338_v11  ;;  %7763 = vst [vmem:[#allocation28_spill] sm:$0xff] %v5653_v14 }
 0x142   : > { %v1382_v38 = vadd.f32 %v1350_v28, %v5340_v12  ;;  %v5641_v41 = vpop.f32.mrb[12].mxu0  ;;  %v1280_v46 = vpop.f32.mrb[12].mxu1  ;;  %v1447_v47 = vmax.f32 %v5632_v27, %v5635_v29 }
 0x143   : > { %7761 = vst [vmem:[#allocation26_spill] sm:$0xff] %v5641_v41  ;;  %v1351_v48 = vmul.f32 0.17677669, %v1280_v46  ;;  %v5645_v51 = vpop.f32.mrb[13].mxu0  ;;  %v1282_v56 = vpop.f32.mrb[13].mxu1  ;;  %v5648_v2 = vadd.f32 %v1381_v35, %v5637_v33  ;;  %v409_v41 = vld [vmem:[%s5816_s14 + $0x20] sm:$0xff] }
 0x144   : > { %7762 = vst [vmem:[#allocation27_spill] sm:$0xff] %v5645_v51  ;;  %v1352_v4 = vmul.f32 0.17677669, %v1282_v56  ;;  %1448 = vmax.xlane.f32.xlu1 %v1447_v47  ;;  %v5651_v7 = vadd.f32 %v1382_v38, %v5637_v33 }
 0x145   : > { %v1383_v20 = vadd.f32 %v1351_v48, %v5338_v11  ;;  %v5669_v48 = vpop.permute.xlu1 %796 }
 0x146   : > { %v1384_v23 = vadd.f32 %v1352_v4, %v5340_v12  ;;  %v5657_v28 = vpop.f32.mrb[14].mxu0  ;;  %v1286_v46 = vpop.f32.mrb[14].mxu1  ;;  %v1450_v18 = vmax.f32 %v5648_v2, %v5651_v7  ;;  %7766 = vst [vmem:[#allocation31_spill] sm:$0xff] %v5669_v48 }
 0x147   : > { %7764 = vst [vmem:[#allocation29_spill] sm:$0xff] %v5657_v28  ;;  %v1353_v13 = vmul.f32 0.17677669, %v1286_v46  ;;  %v5661_v35 = vpop.f32.mrb[15].mxu0  ;;  %v1288_v56 = vpop.f32.mrb[15].mxu1  ;;  %v5664_v47 = vadd.f32 %v1383_v20, %v5653_v14 }
 0x148   : > { %7765 = vst [vmem:[#allocation30_spill] sm:$0xff] %v5661_v35  ;;  %v1354_v38 = vmul.f32 0.17677669, %v1288_v56  ;;  %1451 = vmax.xlane.f32.xlu0 %v1450_v18  ;;  %v5667_v9 = vadd.f32 %v1384_v23, %v5653_v14 }
 0x149   : > { %v1385_v4 = vadd.f32 %v1353_v13, %v5338_v11  ;;  %v5685_v13 = vpop.permute.xlu0 %801 }
 0x14a   : > { %v1386_v0 = vadd.f32 %v1354_v38, %v5340_v12  ;;  %v5673_v63 = vpop.f32.mrb[16].mxu0  ;;  %v1292_v46 = vpop.f32.mrb[16].mxu1  ;;  %v1453_v54 = vmax.f32 %v5664_v47, %v5667_v9  ;;  %7769 = vst [vmem:[#allocation34_spill] sm:$0xff] %v5685_v13 }
 0x14b   : > { %7767 = vst [vmem:[#allocation32_spill] sm:$0xff] %v5673_v63  ;;  %v1355_v53 = vmul.f32 0.17677669, %v1292_v46  ;;  %v5677_v20 = vpop.f32.mrb[17].mxu0  ;;  %v1294_v56 = vpop.f32.mrb[17].mxu1  ;;  %v5680_v18 = vadd.f32 %v1385_v4, %v5669_v48 }
 0x14c   : > { %7768 = vst [vmem:[#allocation33_spill] sm:$0xff] %v5677_v20  ;;  %v1356_v23 = vmul.f32 0.17677669, %v1294_v56  ;;  %1454 = vmax.xlane.f32.xlu1 %v1453_v54  ;;  %v5683_v44 = vadd.f32 %v1386_v0, %v5669_v48 }
 0x14d   : > { %v1387_v38 = vadd.f32 %v1355_v53, %v5338_v11  ;;  %v5701_v53 = vpop.permute.xlu1 %806 }
 0x14e   : > { %v1388_v43 = vadd.f32 %v1356_v23, %v5340_v12  ;;  %v5689_v32 = vpop.f32.mrb[18].mxu0  ;;  %v1298_v46 = vpop.f32.mrb[18].mxu1  ;;  %v1456_v31 = vmax.f32 %v5680_v18, %v5683_v44  ;;  %7772 = vst [vmem:[#allocation37_spill] sm:$0xff] %v5701_v53 }
 0x14f   : > { %7770 = vst [vmem:[#allocation35_spill] sm:$0xff] %v5689_v32  ;;  %v1357_v25 = vmul.f32 0.17677669, %v1298_v46  ;;  %v5693_v4 = vpop.f32.mrb[19].mxu0  ;;  %v1300_v56 = vpop.f32.mrb[19].mxu1  ;;  %v5696_v54 = vadd.f32 %v1387_v38, %v5685_v13 }
 0x150   : > { %7771 = vst [vmem:[#allocation36_spill] sm:$0xff] %v5693_v4  ;;  %v1358_v0 = vmul.f32 0.17677669, %v1300_v56  ;;  %1457 = vmax.xlane.f32.xlu0 %v1456_v31  ;;  %v5699_v24 = vadd.f32 %v1388_v43, %v5685_v13 }
 0x151   : > { %v1389_v23 = vadd.f32 %v1357_v25, %v5338_v11  ;;  %v5717_v25 = vpop.permute.xlu0 %811 }
 0x152   : > { %v1390_v19 = vadd.f32 %v1358_v0, %v5340_v12  ;;  %v5705_v16 = vpop.f32.mrb[20].mxu0  ;;  %v1304_v46 = vpop.f32.mrb[20].mxu1  ;;  %v1459_v48 = vmax.f32 %v5696_v54, %v5699_v24  ;;  %7775 = vst [vmem:[#allocation40_spill] sm:$0xff] %v5717_v25 }
 0x153   : > { %7773 = vst [vmem:[#allocation38_spill] sm:$0xff] %v5705_v16  ;;  %v1359_v14 = vmul.f32 0.17677669, %v1304_v46  ;;  %v5709_v38 = vpop.f32.mrb[21].mxu0  ;;  %v1306_v56 = vpop.f32.mrb[21].mxu1  ;;  %v5712_v31 = vadd.f32 %v1389_v23, %v5701_v53 }
 0x154   : > { %7774 = vst [vmem:[#allocation39_spill] sm:$0xff] %v5709_v38  ;;  %v1360_v43 = vmul.f32 0.17677669, %v1306_v56  ;;  %1460 = vmax.xlane.f32.xlu1 %v1459_v48  ;;  %v5715_v13 = vadd.f32 %v1390_v19, %v5701_v53 }
 0x155   : > { %v1391_v0 = vadd.f32 %v1359_v14, %v5338_v11  ;;  %v5733_v14 = vpop.permute.xlu1 %816 }
 0x156   : > { %v1392_v33 = vadd.f32 %v1360_v43, %v5340_v12  ;;  %v5721_v16 = vpop.f32.mrb[22].mxu0  ;;  %v1310_v46 = vpop.f32.mrb[22].mxu1  ;;  %v1462_v38 = vmax.f32 %v5712_v31, %v5715_v13  ;;  %7778 = vst [vmem:[#allocation43_spill] sm:$0xff] %v5733_v14 }
 0x157   : > { %7776 = vst [vmem:[#allocation41_spill] sm:$0xff] %v5721_v16  ;;  %v1361_v4 = vmul.f32 0.17677669, %v1310_v46  ;;  %v5725_v23 = vpop.f32.mrb[23].mxu0  ;;  %v1312_v56 = vpop.f32.mrb[23].mxu1  ;;  %v5728_v48 = vadd.f32 %v1391_v0, %v5717_v25 }
 0x158   : > { %7777 = vst [vmem:[#allocation42_spill] sm:$0xff] %v5725_v23  ;;  %v1362_v19 = vmul.f32 0.17677669, %v1312_v56  ;;  %1463 = vmax.xlane.f32.xlu0 %v1462_v38  ;;  %v5731_v53 = vadd.f32 %v1392_v33, %v5717_v25 }
 0x159   : > { %v1393_v43 = vadd.f32 %v1361_v4, %v5338_v11  ;;  %v5749_v4 = vpop.permute.xlu0 %821 }
 0x15a   : > { %v1394_v16 = vadd.f32 %v1362_v19, %v5340_v12  ;;  %v5737_v32 = vpop.f32.mrb[24].mxu0  ;;  %v1316_v46 = vpop.f32.mrb[24].mxu1  ;;  %v1465_v23 = vmax.f32 %v5728_v48, %v5731_v53  ;;  %7781 = vst [vmem:[#allocation46_spill] sm:$0xff] %v5749_v4 }
 0x15b   : > { %7779 = vst [vmem:[#allocation44_spill] sm:$0xff] %v5737_v32  ;;  %v1363_v20 = vmul.f32 0.17677669, %v1316_v46  ;;  %v5741_v0 = vpop.f32.mrb[25].mxu0  ;;  %v1318_v56 = vpop.f32.mrb[25].mxu1  ;;  %v5744_v38 = vadd.f32 %v1393_v43, %v5733_v14 }
 0x15c   : > { %7780 = vst [vmem:[#allocation45_spill] sm:$0xff] %v5741_v0  ;;  %v1364_v33 = vmul.f32 0.17677669, %v1318_v56  ;;  %1466 = vmax.xlane.f32.xlu1 %v1465_v23  ;;  %v5747_v25 = vadd.f32 %v1394_v16, %v5733_v14 }
 0x15d   : > { %v1395_v19 = vadd.f32 %v1363_v20, %v5338_v11  ;;  %v5765_v20 = vpop.permute.xlu1 %826 }
 0x15e   : > { %v1396_v32 = vadd.f32 %v1364_v33, %v5340_v12  ;;  %v5753_v63 = vpop.f32.mrb[26].mxu0  ;;  %v1322_v46 = vpop.f32.mrb[26].mxu1  ;;  %v1468_v0 = vmax.f32 %v5744_v38, %v5747_v25  ;;  %7784 = vst [vmem:[#allocation49_spill] sm:$0xff] %v5765_v20 }
 0x15f   : > { %7782 = vst [vmem:[#allocation47_spill] sm:$0xff] %v5753_v63  ;;  %v1365_v35 = vmul.f32 0.17677669, %v1322_v46  ;;  %v5757_v43 = vpop.f32.mrb[27].mxu0  ;;  %v1324_v56 = vpop.f32.mrb[27].mxu1  ;;  %v5760_v23 = vadd.f32 %v1395_v19, %v5749_v4 }
 0x160   : > { %7783 = vst [vmem:[#allocation48_spill] sm:$0xff] %v5757_v43  ;;  %v1366_v16 = vmul.f32 0.17677669, %v1324_v56  ;;  %1469 = vmax.xlane.f32.xlu0 %v1468_v0  ;;  %v5763_v14 = vadd.f32 %v1396_v32, %v5749_v4 }
 0x161   : > { %v1397_v33 = vadd.f32 %v1365_v35, %v5338_v11  ;;  %v5781_v35 = vpop.permute.xlu0 %831 }
 0x162   : > { %v1398_v63 = vadd.f32 %v1366_v16, %v5340_v12  ;;  %v5769_v28 = vpop.f32.mrb[28].mxu0  ;;  %v1328_v46 = vpop.f32.mrb[28].mxu1  ;;  %v1471_v43 = vmax.f32 %v5760_v23, %v5763_v14  ;;  %7787 = vst [vmem:[#allocation52_spill] sm:$0xff] %v5781_v35 }
 0x163   : > { %7785 = vst [vmem:[#allocation50_spill] sm:$0xff] %v5769_v28  ;;  %v1367_v62 = vmul.f32 0.17677669, %v1328_v46  ;;  %v5773_v19 = vpop.f32.mrb[29].mxu0  ;;  %v1330_v56 = vpop.f32.mrb[29].mxu1  ;;  %v5776_v0 = vadd.f32 %v1397_v33, %v5765_v20 }
 0x164   : > { %7786 = vst [vmem:[#allocation51_spill] sm:$0xff] %v5773_v19  ;;  %v1368_v32 = vmul.f32 0.17677669, %v1330_v56  ;;  %1472 = vmax.xlane.f32.xlu1 %v1471_v43  ;;  %v5779_v4 = vadd.f32 %v1398_v63, %v5765_v20  ;;  %v5798_v20 = vpop.permute.xlu1 %836 }
 0x165   : > { %v1399_v16 = vadd.f32 %v1367_v62, %v5338_v11  ;;  %7790 = vst [vmem:[#allocation55_spill] sm:$0xff] %v5798_v20 }
 0x166   : > { %v1400_v28 = vadd.f32 %v1368_v32, %v5340_v12  ;;  %v5785_v37 = vpop.f32.mrb[30].mxu0  ;;  %v1334_v46 = vpop.f32.mrb[30].mxu1  ;;  %v1474_v19 = vmax.f32 %v5776_v0, %v5779_v4 }
 0x167   : > { %7788 = vst [vmem:[#allocation53_spill] sm:$0xff] %v5785_v37  ;;  %v1369_v61 = vmul.f32 0.17677669, %v1334_v46  ;;  %v5789_v33 = vpop.f32.mrb[31].mxu0  ;;  %v1336_v43 = vpop.f32.mrb[31].mxu1  ;;  %v5792_v63 = vadd.f32 %v1399_v16, %v5781_v35 }
 0x168   : > { %7789 = vst [vmem:[#allocation54_spill] sm:$0xff] %v5789_v33  ;;  %v1370_v56 = vmul.f32 0.17677669, %v1336_v43  ;;  %1475 = vmax.xlane.f32.xlu0 %v1474_v19  ;;  %v5795_v62 = vadd.f32 %v1400_v28, %v5781_v35  ;;  %v405_v19 = vld [vmem:[%s5816_s14] sm:$0xff] }
 0x169   : > { %v1401_v32 = vadd.f32 %v1369_v61, %v5338_v11  ;;  %v421_v61 = vld [vmem:[%s5816_s14 + $0x80] sm:$0xff] }
 0x16a   : > { %v1402_v37 = vadd.f32 %v1370_v56, %v5340_v12  ;;  %v1477_v46 = vmax.f32 %v5792_v63, %v5795_v62  ;;  %v406_v56 = vld [vmem:[%s5816_s14 + $0x8] sm:$0xff] }
 0x16b   : > { %v5804_v33 = vadd.f32 %v1401_v32, %v5798_v20  ;;  %v5824_v32 = vpack.c.bf16 %v406_v56, %v405_v19  ;;  %v425_v19 = vld [vmem:[%s5816_s14 + $0xa0] sm:$0xff]  ;;  %v426_v56 = vld [vmem:[%s5816_s14 + $0xa8] sm:$0xff] }
 0x16c   : > { %1478 = vmax.xlane.f32.xlu1 %v1477_v46  ;;  %v5807_v16 = vadd.f32 %v1402_v37, %v5798_v20  ;;  %v422_v37 = vld [vmem:[%s5816_s14 + $0x88] sm:$0xff]  ;;  %v423_v46 = vld [vmem:[%s5816_s14 + $0x90] sm:$0xff]  ;;  %v5848_v51 = vpack.c.bf16 %v426_v56, %v425_v19  ;;  %v412_v56 = vld [vmem:[%s5816_s14 + $0x38] sm:$0xff] }
 0x16d   : > { %v5821_v43 = vpack.c.bf16 %v422_v37, %v421_v61  ;;  %7792 = vst [vmem:[#allocation57_spill] sm:$0xff] %v5824_v32  ;;  %v407_v20 = vld [vmem:[%s5816_s14 + $0x10] sm:$0xff]  ;;  %v408_v37 = vld [vmem:[%s5816_s14 + $0x18] sm:$0xff] }
 0x16e   : > { %v1480_v28 = vmax.f32 %v5804_v33, %v5807_v16  ;;  %v5846_v35 = vpack.c.bf16 %v408_v37, %v407_v20  ;;  %7795 = vst [vmem:[#allocation60_spill] sm:$0xff] %v5848_v51  ;;  %v5863_v20 = vpack.c.bf16 %v410_v22, %v409_v41  ;;  %v411_v19 = vld [vmem:[%s5816_s14 + $0x30] sm:$0xff]  ;;  %v429_v22 = vld [vmem:[%s5816_s14 + $0xc0] sm:$0xff]  ;;  %v430_v41 = vld [vmem:[%s5816_s14 + $0xc8] sm:$0xff] }
 0x16f   : > { %7791 = vst [vmem:[#allocation56_spill] sm:$0xff] %v5821_v43  ;;  %4525 = vmatprep.subr.msk.bf16.mxu0 %vm5344_vm5, %v5821_v43  ;;  %4573 = vmatprep.subr.msk.bf16.mxu1 %vm5329_vm2, %v5821_v43 }
 0x170   : > { %1481 = vmax.xlane.f32.xlu0 %v1480_v28  ;;  %v424_v28 = vld [vmem:[%s5816_s14 + $0x98] sm:$0xff]  ;;  %4528 = vmatpush3.bf16.msk.msra.mxu0 %vm5344_vm5, %v5824_v32  ;;  %7794 = vst [vmem:[#allocation59_spill] sm:$0xff] %v5846_v35  ;;  %7796 = vst [vmem:[#allocation61_spill] sm:$0xff] %v5863_v20 }
 0x171   : > { %v5838_v61 = vpack.c.bf16 %v424_v28, %v423_v46  ;;  %4576 = vmatpush3.bf16.msk.msra.mxu1 %vm5329_vm2, %v5824_v32  ;;  %v427_v46 = vld [vmem:[%s5816_s14 + $0xb0] sm:$0xff]  ;;  %v428_v28 = vld [vmem:[%s5816_s14 + $0xb8] sm:$0xff]  ;;  %v417_v32 = vld [vmem:[%s5816_s14 + $0x60] sm:$0xff] }
 0x172   : > { %v5871_v37 = vpack.c.bf16 %v428_v28, %v427_v46  ;;  %v5891_v46 = vpack.c.bf16 %v430_v41, %v429_v22  ;;  %v413_v28 = vld [vmem:[%s5816_s14 + $0x40] sm:$0xff]  ;;  %v415_v41 = vld [vmem:[%s5816_s14 + $0x50] sm:$0xff] }
 0x173   : > { %7793 = vst [vmem:[#allocation58_spill] sm:$0xff] %v5838_v61  ;;  %4531 = vmatprep.subr.msk.bf16.mxu0 %vm5344_vm5, %v5838_v61  ;;  %4579 = vmatprep.subr.msk.bf16.mxu1 %vm5329_vm2, %v5838_v61 }
 0x174   : > { %4534 = vmatpush3.bf16.msk.msra.mxu0 %vm5344_vm5, %v5846_v35  ;;  %7797 = vst [vmem:[#allocation62_spill] sm:$0xff] %v5871_v37  ;;  %7799 = vst [vmem:[#allocation64_spill] sm:$0xff] %v5891_v46 }
 0x175   : > { %4582 = vmatpush3.bf16.msk.msra.mxu1 %vm5329_vm2, %v5846_v35  ;;  %4537 = vmatprep.subr.msk.bf16.mxu0 %vm5344_vm5, %v5848_v51  ;;  %v5883_v35 = vpack.c.bf16 %v412_v56, %v411_v19  ;;  %v431_v19 = vld [vmem:[%s5816_s14 + $0xd0] sm:$0xff]  ;;  %v432_v56 = vld [vmem:[%s5816_s14 + $0xd8] sm:$0xff] }
 0x176   : > { %4585 = vmatprep.subr.msk.bf16.mxu1 %vm5329_vm2, %v5848_v51  ;;  %v414_v51 = vld [vmem:[%s5816_s14 + $0x48] sm:$0xff]  ;;  %v5911_v22 = vpack.c.bf16 %v432_v56, %v431_v19 }
 0x177   : > { %7798 = vst [vmem:[#allocation63_spill] sm:$0xff] %v5883_v35 }
 0x178   : > { %4540 = vmatpush3.bf16.msk.msra.mxu0 %vm5344_vm5, %v5863_v20  ;;  %7801 = vst [vmem:[#allocation66_spill] sm:$0xff] %v5911_v22 }
 0x179   : > { %4588 = vmatpush3.bf16.msk.msra.mxu1 %vm5329_vm2, %v5863_v20  ;;  %4543 = vmatprep.subr.msk.bf16.mxu0 %vm5344_vm5, %v5871_v37  ;;  %v5903_v20 = vpack.c.bf16 %v414_v51, %v413_v28  ;;  %v433_v51 = vld [vmem:[%s5816_s14 + $0xe0] sm:$0xff]  ;;  %v434_v28 = vld [vmem:[%s5816_s14 + $0xe8] sm:$0xff] }
 0x17a   : > { %4591 = vmatprep.subr.msk.bf16.mxu1 %vm5329_vm2, %v5871_v37  ;;  %v416_v37 = vld [vmem:[%s5816_s14 + $0x58] sm:$0xff] }
 0x17b   : > { %7800 = vst [vmem:[#allocation65_spill] sm:$0xff] %v5903_v20 }
 0x17c   : > { %4546 = vmatpush3.bf16.msk.msra.mxu0 %vm5344_vm5, %v5883_v35 }
 0x17d   : > { %4594 = vmatpush3.bf16.msk.msra.mxu1 %vm5329_vm2, %v5883_v35  ;;  %4549 = vmatprep.subr.msk.bf16.mxu0 %vm5344_vm5, %v5891_v46  ;;  %v5923_v35 = vpack.c.bf16 %v416_v37, %v415_v41 }
 0x17e   : > { %4597 = vmatprep.subr.msk.bf16.mxu1 %vm5329_vm2, %v5891_v46  ;;  %v5933_v46 = vpack.c.bf16 %v434_v28, %v433_v51 }
 0x17f   : > { %7802 = vst [vmem:[#allocation67_spill] sm:$0xff] %v5923_v35 }
 0x180   : > { %4552 = vmatpush3.bf16.msk.msra.mxu0 %vm5344_vm5, %v5903_v20  ;;  %7803 = vst [vmem:[#allocation68_spill] sm:$0xff] %v5933_v46 }
 0x181   : > { %4600 = vmatpush3.bf16.msk.msra.mxu1 %vm5329_vm2, %v5903_v20  ;;  %4555 = vmatprep.subr.msk.bf16.mxu0 %vm5344_vm5, %v5911_v22  ;;  %v7825_v20 = vld [vmem:[#allocation22_spill] sm:$0xff] }
 0x182   : > { %4603 = vmatprep.subr.msk.bf16.mxu1 %vm5329_vm2, %v5911_v22 }
 0x184   : > { %4558 = vmatpush3.bf16.msk.msra.mxu0 %vm5344_vm5, %v5923_v35 }
 0x185   : > { %4606 = vmatpush3.bf16.msk.msra.mxu1 %vm5329_vm2, %v5923_v35  ;;  %4561 = vmatprep.subr.msk.bf16.mxu0 %vm5344_vm5, %v5933_v46 }
 0x186   : > { %4609 = vmatprep.subr.msk.bf16.mxu1 %vm5329_vm2, %v5933_v46 }
 0x1c1   : > { %v1437_v61 = vpop.xlane.xlu0 %1436 }
 0x1c2   : > { %v1483_v19 = vsub.f32 %v5568_v57, %v1437_v61  ;;  %v1484_v56 = vsub.f32 %v5571_v59, %v1437_v61  ;;  %v5943_v57 = vpack.c.bf16 %v418_v5, %v417_v32 }
 0x1c4   : > { %v1515_v37 = vmul.f32 1.442695, %v1483_v19  ;;  %v1517_v41 = vmul.f32 1.442695, %v1484_v56  ;;  %7804 = vst [vmem:[#allocation69_spill] sm:$0xff] %v5943_v57  ;;  %4564 = vmatpush3.bf16.msk.msra.mxu0 %vm5344_vm5, %v5943_v57  ;;  %4612 = vmatpush3.bf16.msk.msra.mxu1 %vm5329_vm2, %v5943_v57 }
 0x1c5   : > { %v1440_v60 = vpop.xlane.xlu1 %1439 }
 0x1c6   : > { %4838 = vpow2.f32 %v1515_v37  ;;  %v1485_v59 = vsub.f32 %v5586_v17, %v1440_v60  ;;  %v1486_v61 = vsub.f32 %v5589_v21, %v1440_v60 }
 0x1c7   : > { %4840 = vpow2.f32 %v1517_v41 }
 0x1c8   : > { %v1519_v5 = vmul.f32 1.442695, %v1485_v59  ;;  %v1521_v32 = vmul.f32 1.442695, %v1486_v61 }
 0x1c9   : > { %v1443_v51 = vpop.xlane.xlu0 %1442 }
 0x1ca   : > { %4842 = vpow2.f32 %v1519_v5  ;;  %v1487_v60 = vsub.f32 %v5600_v34, %v1443_v51  ;;  %v1488_v17 = vsub.f32 %v5603_v36, %v1443_v51 }
 0x1cb   : > { %4844 = vpow2.f32 %v1521_v32 }
 0x1cc   : > { %v1523_v21 = vmul.f32 1.442695, %v1487_v60  ;;  %v1525_v28 = vmul.f32 1.442695, %v1488_v17 }
 0x1cd   : > { %v1446_v19 = vpop.xlane.xlu0 %1445 }
 0x1ce   : > { %4846 = vpow2.f32 %v1523_v21  ;;  %v1489_v56 = vsub.f32 %v5616_v52, %v1446_v19  ;;  %v1490_v37 = vsub.f32 %v5619_v58, %v1446_v19 }
 0x1cf   : > { %4848 = vpow2.f32 %v1525_v28 }
 0x1d0   : > { %v5966_v41 = vpop.eup %4838  ;;  %v1527_v59 = vmul.f32 1.442695, %v1489_v56  ;;  %v1529_v61 = vmul.f32 1.442695, %v1490_v37 }
 0x1d1   : > { %v5968_v57 = vpop.eup %4840  ;;  %v1449_v5 = vpop.xlane.xlu1 %1448 }
 0x1d2   : > { %4850 = vpow2.f32 %v1527_v59  ;;  %v1491_v34 = vsub.f32 %v5632_v27, %v1449_v5  ;;  %v1492_v36 = vsub.f32 %v5635_v29, %v1449_v5  ;;  %v1579_v32 = vadd.f32 %v5968_v57, %v5966_v41 }
 0x1d3   : > { %4852 = vpow2.f32 %v1529_v61 }
 0x1d4   : > { %v5974_v52 = vpop.eup %4842  ;;  %v1531_v58 = vmul.f32 1.442695, %v1491_v34  ;;  %v1533_v51 = vmul.f32 1.442695, %v1492_v36  ;;  %1580 = vadd.xlane.f32.xlu1 %v1579_v32 }
 0x1d5   : > { %v5976_v60 = vpop.eup %4844  ;;  %v1452_v17 = vpop.xlane.xlu0 %1451 }
 0x1d6   : > { %4854 = vpow2.f32 %v1531_v58  ;;  %v1493_v21 = vsub.f32 %v5648_v2, %v1452_v17  ;;  %v1494_v28 = vsub.f32 %v5651_v7, %v1452_v17  ;;  %v1582_v27 = vadd.f32 %v5976_v60, %v5974_v52 }
 0x1d7   : > { %4856 = vpow2.f32 %v1533_v51 }
 0x1d8   : > { %v5982_v29 = vpop.eup %4846  ;;  %v1535_v19 = vmul.f32 1.442695, %v1493_v21  ;;  %v1537_v56 = vmul.f32 1.442695, %v1494_v28  ;;  %1583 = vadd.xlane.f32.xlu0 %v1582_v27 }
 0x1d9   : > { %v5984_v37 = vpop.eup %4848  ;;  %v1455_v59 = vpop.xlane.xlu1 %1454 }
 0x1da   : > { %4858 = vpow2.f32 %v1535_v19  ;;  %v1495_v61 = vsub.f32 %v5664_v47, %v1455_v59  ;;  %v1496_v5 = vsub.f32 %v5667_v9, %v1455_v59  ;;  %v1585_v2 = vadd.f32 %v5984_v37, %v5982_v29 }
 0x1db   : > { %4860 = vpow2.f32 %v1537_v56 }
 0x1dc   : > { %v5990_v7 = vpop.eup %4850  ;;  %v1539_v34 = vmul.f32 1.442695, %v1495_v61  ;;  %v1541_v36 = vmul.f32 1.442695, %v1496_v5  ;;  %1586 = vadd.xlane.f32.xlu1 %v1585_v2  ;;  %v435_v2 = vld [vmem:[%s5816_s14 + $0xf0] sm:$0xff] }
 0x1dd   : > { %v5992_v32 = vpop.eup %4852  ;;  %v1458_v58 = vpop.xlane.xlu0 %1457 }
 0x1de   : > { %4862 = vpow2.f32 %v1539_v34  ;;  %v1497_v51 = vsub.f32 %v5680_v18, %v1458_v58  ;;  %v1498_v17 = vsub.f32 %v5683_v44, %v1458_v58  ;;  %v1588_v9 = vadd.f32 %v5992_v32, %v5990_v7  ;;  %v436_v34 = vld [vmem:[%s5816_s14 + $0xf8] sm:$0xff] }
 0x1df   : > { %4864 = vpow2.f32 %v1541_v36 }
 0x1e0   : > { %v5998_v47 = vpop.eup %4854  ;;  %v1543_v21 = vmul.f32 1.442695, %v1497_v51  ;;  %v1545_v28 = vmul.f32 1.442695, %v1498_v17  ;;  %1589 = vadd.xlane.f32.xlu0 %v1588_v9  ;;  %v6012_v51 = vpack.c.bf16 %v436_v34, %v435_v2  ;;  %v419_v17 = vld [vmem:[%s5816_s14 + $0x70] sm:$0xff] }
 0x1e1   : > { %v6000_v27 = vpop.eup %4856  ;;  %v1461_v19 = vpop.xlane.xlu1 %1460 }
 0x1e2   : > { %4866 = vpow2.f32 %v1543_v21  ;;  %v1499_v18 = vsub.f32 %v5696_v54, %v1461_v19  ;;  %v1500_v44 = vsub.f32 %v5699_v24, %v1461_v19  ;;  %v1591_v56 = vadd.f32 %v6000_v27, %v5998_v47  ;;  %7805 = vst [vmem:[#allocation70_spill] sm:$0xff] %v6012_v51  ;;  %v420_v54 = vld [vmem:[%s5816_s14 + $0x78] sm:$0xff]  ;;  %4567 = vmatprep.subr.msk.bf16.mxu0 %vm5344_vm5, %v6012_v51 }
 0x1e3   : > { %4868 = vpow2.f32 %v1545_v28  ;;  %v6023_v28 = vpack.c.bf16 %v420_v54, %v419_v17  ;;  %4615 = vmatprep.subr.msk.bf16.mxu1 %vm5329_vm2, %v6012_v51  ;;  %v7807_v54 = vmov 0 }
 0x1e4   : > { %v6006_v59 = vpop.eup %4858  ;;  %v1547_v61 = vmul.f32 1.442695, %v1499_v18  ;;  %v1549_v5 = vmul.f32 1.442695, %v1500_v44  ;;  %1592 = vadd.xlane.f32.xlu1 %v1591_v56  ;;  %v7808_v54 = vsel %vm6052_vm9, 4294967295, %v7807_v54 }
 0x1e5   : > { %v6010_v36 = vpop.eup %4860  ;;  %v1464_v58 = vpop.xlane.xlu0 %1463  ;;  %7806 = vst [vmem:[#allocation71_spill] sm:$0xff] %v6023_v28  ;;  %4570 = vmatpush3.bf16.msk.msra.mxu0 %vm5344_vm5, %v6023_v28  ;;  %4618 = vmatpush3.bf16.msk.msra.mxu1 %vm5329_vm2, %v6023_v28  ;;  %7809 = vst [vmem:[#allocation72_spill] sm:$0xff] %v7808_v54 }
 0x1e6   : > { %4870 = vpow2.f32 %v1547_v61  ;;  %v1501_v24 = vsub.f32 %v5712_v31, %v1464_v58  ;;  %v1502_v9 = vsub.f32 %v5715_v13, %v1464_v58  ;;  %v1594_v21 = vadd.f32 %v6010_v36, %v6006_v59  ;;  %4621 = vmatprep.subr.msk.bf16.mxu0 %vm6052_vm9, %v5336_v10  ;;  %4669 = vmatprep.subr.msk.bf16.mxu1 %vm6052_vm9, %v5821_v43 }
 0x1e7   : > { %4872 = vpow2.f32 %v1549_v5 }
 0x1e8   : > { %v6028_v19 = vpop.eup %4862  ;;  %v1551_v18 = vmul.f32 1.442695, %v1501_v24  ;;  %v1553_v31 = vmul.f32 1.442695, %v1502_v9  ;;  %1595 = vadd.xlane.f32.xlu0 %v1594_v21 }
 0x1e9   : > { %v6030_v13 = vpop.eup %4864  ;;  %v1467_v44 = vpop.xlane.xlu1 %1466 }
 0x1ea   : > { %4874 = vpow2.f32 %v1551_v18  ;;  %v1503_v56 = vsub.f32 %v5728_v48, %v1467_v44  ;;  %v1504_v61 = vsub.f32 %v5731_v53, %v1467_v44  ;;  %v1597_v5 = vadd.f32 %v6030_v13, %v6028_v19 }
 0x1eb   : > { %4876 = vpow2.f32 %v1553_v31 }
 0x1ec   : > { %v6042_v2 = vpop.eup %4866  ;;  %v1555_v34 = vmul.f32 1.442695, %v1503_v56  ;;  %v1557_v58 = vmul.f32 1.442695, %v1504_v61  ;;  %1598 = vadd.xlane.f32.xlu1 %v1597_v5 }
 0x1ed   : > { %v6044_v15 = vpop.eup %4868  ;;  %v1470_v17 = vpop.xlane.xlu0 %1469 }
 0x1ee   : > { %4878 = vpow2.f32 %v1555_v34  ;;  %v1505_v6 = vsub.f32 %v5744_v38, %v1470_v17  ;;  %v1506_v53 = vsub.f32 %v5747_v25, %v1470_v17  ;;  %v1600_v48 = vadd.f32 %v6044_v15, %v6042_v2 }
 0x1ef   : > { %4880 = vpow2.f32 %v1557_v58 }
 0x1f0   : > { %v6056_v24 = vpop.eup %4870  ;;  %v1559_v9 = vmul.f32 1.442695, %v1505_v6  ;;  %v1561_v21 = vmul.f32 1.442695, %v1506_v53  ;;  %1601 = vadd.xlane.f32.xlu0 %v1600_v48 }
 0x1f1   : > { %v6061_v38 = vpop.eup %4872  ;;  %v1473_v25 = vpop.xlane.xlu1 %1472 }
 0x1f2   : > { %4882 = vpow2.f32 %v1559_v9  ;;  %v1507_v18 = vsub.f32 %v5760_v23, %v1473_v25  ;;  %v1508_v31 = vsub.f32 %v5763_v14, %v1473_v25  ;;  %v1603_v44 = vadd.f32 %v6061_v38, %v6056_v24 }
 0x1f3   : > { %4884 = vpow2.f32 %v1561_v21 }
 0x1f4   : > { %v6070_v56 = vpop.eup %4874  ;;  %v1563_v61 = vmul.f32 1.442695, %v1507_v18  ;;  %v1565_v5 = vmul.f32 1.442695, %v1508_v31  ;;  %1604 = vadd.xlane.f32.xlu1 %v1603_v44 }
 0x1f5   : > { %v6072_v34 = vpop.eup %4876  ;;  %v1476_v58 = vpop.xlane.xlu0 %1475 }
 0x1f6   : > { %4886 = vpow2.f32 %v1563_v61  ;;  %v1509_v17 = vsub.f32 %v5776_v0, %v1476_v58  ;;  %v1510_v6 = vsub.f32 %v5779_v4, %v1476_v58  ;;  %v1606_v14 = vadd.f32 %v6072_v34, %v6070_v56 }
 0x1f7   : > { %4888 = vpow2.f32 %v1565_v5 }
 0x1f8   : > { %v6078_v23 = vpop.eup %4878  ;;  %v1567_v53 = vmul.f32 1.442695, %v1509_v17  ;;  %v1569_v48 = vmul.f32 1.442695, %v1510_v6  ;;  %1607 = vadd.xlane.f32.xlu0 %v1606_v14 }
 0x1f9   : > { %v6080_v9 = vpop.eup %4880  ;;  %v1479_v21 = vpop.xlane.xlu1 %1478 }
 0x1fa   : > { %4890 = vpow2.f32 %v1567_v53  ;;  %v1511_v25 = vsub.f32 %v5792_v63, %v1479_v21  ;;  %v1512_v18 = vsub.f32 %v5795_v62, %v1479_v21  ;;  %v1609_v4 = vadd.f32 %v6080_v9, %v6078_v23 }
 0x1fb   : > { %4892 = vpow2.f32 %v1569_v48  ;;  %v684_v48 = vmul.f32 0.17677669, %v5557_v40  ;;  %v685_v21 = vmul.f32 0.17677669, %v5559_v45  ;;  %v688_v45 = vmul.f32 0.17677669, %v5579_v3 }
 0x1fc   : > { %v6086_v0 = vpop.eup %4882  ;;  %v1571_v31 = vmul.f32 1.442695, %v1511_v25  ;;  %v1573_v44 = vmul.f32 1.442695, %v1512_v18  ;;  %1610 = vadd.xlane.f32.xlu1 %v1609_v4  ;;  %v687_v25 = vmul.f32 0.17677669, %v5565_v55 }
 0x1fd   : > { %v6088_v61 = vpop.eup %4884  ;;  %v1482_v5 = vpop.xlane.xlu0 %1481  ;;  %v728_v40 = vadd.f32 %v5340_v12, %v685_v21 }
 0x1fe   : > { %4894 = vpow2.f32 %v1571_v31  ;;  %v1513_v58 = vsub.f32 %v5804_v33, %v1482_v5  ;;  %v1514_v17 = vsub.f32 %v5807_v16, %v1482_v5  ;;  %v1612_v63 = vadd.f32 %v6088_v61, %v6086_v0 }
 0x1ff   : > { %4896 = vpow2.f32 %v1573_v44  ;;  %v686_v16 = vmul.f32 0.17677669, %v5563_v50  ;;  %v727_v31 = vadd.f32 %v5338_v11, %v684_v48  ;;  %v689_v44 = vmul.f32 0.17677669, %v5583_v8 }
 0x200   : > { %v6094_v62 = vpop.eup %4886  ;;  %v1575_v6 = vmul.f32 1.442695, %v1513_v58  ;;  %v1577_v14 = vmul.f32 1.442695, %v1514_v17  ;;  %1613 = vadd.xlane.f32.xlu0 %v1612_v63  ;;  %v730_v55 = vadd.f32 %v5340_v12, %v687_v25  ;;  %v690_v58 = vmul.f32 0.17677669, %v5593_v26 }
 0x201   : > { %v6096_v53 = vpop.eup %4888  ;;  %v729_v50 = vadd.f32 %v5338_v11, %v686_v16  ;;  %v691_v17 = vmul.f32 0.17677669, %v5597_v30  ;;  %v6125_v8 = vadd.f32 %v5555_v39, %v727_v31  ;;  %v731_v48 = vadd.f32 %v5338_v11, %v688_v45 }
 0x202   : > { %4898 = vpow2.f32 %v1575_v6  ;;  %v1615_v33 = vadd.f32 %v6096_v53, %v6094_v62  ;;  %v692_v6 = vmul.f32 0.17677669, %v5609_v42  ;;  %v732_v21 = vadd.f32 %v5340_v12, %v689_v44 }
 0x203   : > { %4900 = vpow2.f32 %v1577_v14  ;;  %v693_v14 = vmul.f32 0.17677669, %v5613_v49  ;;  %7810 = vst [vmem:[#allocation73_spill] sm:$0xff] %v6125_v8  ;;  %v6132_v30 = vadd.f32 %v5555_v39, %v728_v40  ;;  %v733_v42 = vadd.f32 %v5338_v11, %v690_v58  ;;  %v7817_v58 = vld [vmem:[#allocation24_spill] sm:$0xff] }
 0x204   : > { %v6104_v18 = vpop.eup %4890  ;;  %1616 = vadd.xlane.f32.xlu1 %v1615_v33  ;;  %v734_v49 = vadd.f32 %v5340_v12, %v691_v17  ;;  %v7812_v33 = vld [vmem:[#allocation19_spill] sm:$0xff]  ;;  %v735_v45 = vadd.f32 %v5338_v11, %v692_v6  ;;  %v695_v28 = vmul.f32 0.17677669, %v7817_v58  ;;  %v7818_v17 = vld [vmem:[#allocation26_spill] sm:$0xff]  ;;  %v7820_v6 = vld [vmem:[#allocation20_spill] sm:$0xff] }
 0x205   : > { %v6106_v4 = vpop.eup %4892  ;;  %7811 = vst [vmem:[#allocation74_spill] sm:$0xff] %v6132_v30  ;;  %v6137_v16 = vadd.f32 %v7812_v33, %v729_v50  ;;  %v6140_v25 = vadd.f32 %v7812_v33, %v730_v55  ;;  %v736_v44 = vadd.f32 %v5340_v12, %v693_v14  ;;  %v696_v51 = vmul.f32 0.17677669, %v7818_v17  ;;  %v7819_v50 = vld [vmem:[#allocation27_spill] sm:$0xff] }
 0x206   : > { %v1618_v5 = vadd.f32 %v6106_v4, %v6104_v18  ;;  %v697_v46 = vmul.f32 0.17677669, %v7819_v50  ;;  %v871_v35 = vmax.f32 %v6125_v8, %v6132_v30  ;;  %v6157_v22 = vadd.f32 %v7820_v6, %v731_v48  ;;  %v7830_v8 = vld [vmem:[#allocation32_spill] sm:$0xff]  ;;  %v7832_v33 = vld [vmem:[#allocation35_spill] sm:$0xff] }
 0x207   : > { %7813 = vst [vmem:[#allocation75_spill] sm:$0xff] %v6137_v16  ;;  %7814 = vst [vmem:[#allocation76_spill] sm:$0xff] %v6140_v25  ;;  %v6160_v14 = vadd.f32 %v7820_v6, %v732_v21  ;;  %v6172_v30 = vadd.f32 %v7825_v20, %v735_v45  ;;  %v6175_v48 = vadd.f32 %v7825_v20, %v736_v44  ;;  %v702_v44 = vmul.f32 0.17677669, %v7832_v33  ;;  %v7833_v20 = vld [vmem:[#allocation36_spill] sm:$0xff] }
 0x208   : > { %v6118_v63 = vpop.eup %4894  ;;  %1619 = vadd.xlane.f32.xlu0 %v1618_v5  ;;  %v7816_v5 = vld [vmem:[#allocation23_spill] sm:$0xff]  ;;  %v738_v21 = vadd.f32 %v5340_v12, %v695_v28  ;;  %v703_v39 = vmul.f32 0.17677669, %v7833_v20  ;;  %v7834_v28 = vld [vmem:[#allocation38_spill] sm:$0xff]  ;;  %v7839_v33 = vld [vmem:[#allocation28_spill] sm:$0xff] }
 0x209   : > { %v6122_v3 = vpop.eup %4896  ;;  %v694_v43 = vmul.f32 0.17677669, %v7816_v5  ;;  %7821 = vst [vmem:[#allocation23_spill] sm:$0xff] %v6160_v14  ;;  %v7822_v5 = vld [vmem:[#allocation21_spill] sm:$0xff]  ;;  %7826 = vst [vmem:[#allocation27_spill] sm:$0xff] %v6172_v30  ;;  %v877_v45 = vmax.f32 %v6157_v22, %v6160_v14 }
 0x20a   : > { %v1621_v26 = vadd.f32 %v6122_v3, %v6118_v63  ;;  %v6165_v58 = vadd.f32 %v7822_v5, %v733_v42  ;;  %v6168_v17 = vadd.f32 %v7822_v5, %v734_v49  ;;  %7827 = vst [vmem:[#allocation78_spill] sm:$0xff] %v6175_v48  ;;  %v740_v42 = vadd.f32 %v5340_v12, %v697_v46  ;;  %v7829_v49 = vld [vmem:[#allocation30_spill] sm:$0xff] }
 0x20b   : > { %v737_v50 = vadd.f32 %v5338_v11, %v694_v43  ;;  %v699_v5 = vmul.f32 0.17677669, %v7829_v49  ;;  %v700_v43 = vmul.f32 0.17677669, %v7830_v8  ;;  %v704_v10 = vmul.f32 0.17677669, %v7834_v28 }
 0x20c   : > { %v6142_v31 = vpop.eup %4898  ;;  %1622 = vadd.xlane.f32.xlu1 %v1621_v26  ;;  %v874_v26 = vmax.f32 %v6137_v16, %v6140_v25  ;;  %7823 = vst [vmem:[#allocation24_spill] sm:$0xff] %v6165_v58  ;;  %7824 = vst [vmem:[#allocation26_spill] sm:$0xff] %v6168_v17  ;;  %v739_v25 = vadd.f32 %v5338_v11, %v696_v51  ;;  %v7828_v16 = vld [vmem:[#allocation29_spill] sm:$0xff]  ;;  %v7835_v51 = vld [vmem:[#allocation39_spill] sm:$0xff]  ;;  %v880_v46 = vmax.f32 %v6165_v58, %v6168_v17 }
 0x20d   : > { %7815 = vst [vmem:[#allocation77_spill] sm:$0xff] %v6142_v31  ;;  %v6147_v40 = vpop.eup %4900  ;;  %v698_v6 = vmul.f32 0.17677669, %v7828_v16  ;;  %v883_v8 = vmax.f32 %v6172_v30, %v6175_v48  ;;  %v7836_v16 = vld [vmem:[#allocation25_spill] sm:$0xff]  ;;  %v6204_v28 = vadd.f32 %v7839_v33, %v740_v42  ;;  %v746_v30 = vadd.f32 %v5340_v12, %v703_v39  ;;  %v7843_v42 = vld [vmem:[#allocation42_spill] sm:$0xff] }
 0x20e   : > { %v1624_v55 = vadd.f32 %v6147_v40, %v6142_v31  ;;  %v705_v31 = vmul.f32 0.17677669, %v7835_v51  ;;  %v6195_v49 = vadd.f32 %v7836_v16, %v737_v50  ;;  %v6201_v20 = vadd.f32 %v7839_v33, %v739_v25  ;;  %v7845_v58 = vld [vmem:[#allocation45_spill] sm:$0xff] }
 0x20f   : > { %v743_v51 = vadd.f32 %v5338_v11, %v700_v43  ;;  %v745_v50 = vadd.f32 %v5338_v11, %v702_v44  ;;  %v707_v33 = vmul.f32 0.17677669, %v7843_v42  ;;  %v709_v43 = vmul.f32 0.17677669, %v7845_v58  ;;  %v7846_v44 = vld [vmem:[#allocation31_spill] sm:$0xff] }
 0x210   : > { %1625 = vadd.xlane.f32.xlu0 %v1624_v55  ;;  %872 = vmax.xlane.f32.xlu1 %v871_v35  ;;  %v7831_v55 = vld [vmem:[#allocation33_spill] sm:$0xff]  ;;  %7837 = vst [vmem:[#allocation29_spill] sm:$0xff] %v6195_v49  ;;  %7840 = vst [vmem:[#allocation32_spill] sm:$0xff] %v6201_v20  ;;  %v748_v25 = vadd.f32 %v5340_v12, %v705_v31  ;;  %v889_v39 = vmax.f32 %v6201_v20, %v6204_v28  ;;  %v7856_v20 = vld [vmem:[#allocation50_spill] sm:$0xff] }
 0x211   : > { %v701_v35 = vmul.f32 0.17677669, %v7831_v55  ;;  %v6198_v55 = vadd.f32 %v7836_v16, %v738_v21  ;;  %7841 = vst [vmem:[#allocation33_spill] sm:$0xff] %v6204_v28  ;;  %v747_v21 = vadd.f32 %v5338_v11, %v704_v10  ;;  %v7842_v16 = vld [vmem:[#allocation41_spill] sm:$0xff] }
 0x212   : > { %v706_v17 = vmul.f32 0.17677669, %v7842_v16  ;;  %v7847_v16 = vld [vmem:[#allocation34_spill] sm:$0xff] }
 0x213   : > { %7838 = vst [vmem:[#allocation30_spill] sm:$0xff] %v6198_v55  ;;  %v744_v48 = vadd.f32 %v5340_v12, %v701_v35  ;;  %v886_v35 = vmax.f32 %v6195_v49, %v6198_v55  ;;  %v6229_v42 = vadd.f32 %v7847_v16, %v743_v51  ;;  %v7851_v55 = vld [vmem:[#allocation40_spill] sm:$0xff]  ;;  %v7857_v49 = vld [vmem:[#allocation51_spill] sm:$0xff] }
 0x214   : > { %875 = vmax.xlane.f32.xlu0 %v874_v26  ;;  %878 = vmax.xlane.f32.xlu1 %v877_v45  ;;  %v741_v26 = vadd.f32 %v5338_v11, %v698_v6  ;;  %v742_v45 = vadd.f32 %v5340_v12, %v699_v5  ;;  %v7844_v6 = vld [vmem:[#allocation44_spill] sm:$0xff]  ;;  %v6241_v28 = vadd.f32 %v7851_v55, %v747_v21  ;;  %v712_v21 = vmul.f32 0.17677669, %v7856_v20  ;;  %v7886_v1 = vld [vmem:[#allocation77_spill] sm:$0xff] }
 0x215   : > { %v708_v5 = vmul.f32 0.17677669, %v7844_v6  ;;  %v6246_v51 = vadd.f32 %v7851_v55, %v748_v25  ;;  %v713_v14 = vmul.f32 0.17677669, %v7857_v49 }
 0x216   : > { %v6223_v10 = vadd.f32 %v7846_v44, %v741_v26  ;;  %v6226_v31 = vadd.f32 %v7846_v44, %v742_v45  ;;  %7852 = vst [vmem:[#allocation38_spill] sm:$0xff] %v6241_v28  ;;  %v749_v26 = vadd.f32 %v5338_v11, %v706_v17  ;;  %v750_v45 = vadd.f32 %v5340_v12, %v707_v33 }
 0x217   : > { %7853 = vst [vmem:[#allocation39_spill] sm:$0xff] %v6246_v51 }
 0x218   : > { %881 = vmax.xlane.f32.xlu0 %v880_v46  ;;  %884 = vmax.xlane.f32.xlu1 %v883_v8  ;;  %v6232_v46 = vadd.f32 %v7847_v16, %v744_v48  ;;  %v7848_v8 = vld [vmem:[#allocation37_spill] sm:$0xff]  ;;  %v751_v48 = vadd.f32 %v5338_v11, %v708_v5  ;;  %v7854_v16 = vld [vmem:[#allocation47_spill] sm:$0xff]  ;;  %v892_v17 = vmax.f32 %v6223_v10, %v6226_v31 }
 0x219   : > { %v6235_v58 = vadd.f32 %v7848_v8, %v745_v50  ;;  %v6238_v6 = vadd.f32 %v7848_v8, %v746_v30  ;;  %v752_v50 = vadd.f32 %v5340_v12, %v709_v43  ;;  %v710_v44 = vmul.f32 0.17677669, %v7854_v16  ;;  %v7855_v30 = vld [vmem:[#allocation48_spill] sm:$0xff]  ;;  %v7858_v43 = vld [vmem:[#allocation43_spill] sm:$0xff]  ;;  %v7859_v16 = vld [vmem:[#allocation46_spill] sm:$0xff] }
 0x21a   : > { %v711_v8 = vmul.f32 0.17677669, %v7855_v30  ;;  %v895_v33 = vmax.f32 %v6229_v42, %v6232_v46  ;;  %v901_v5 = vmax.f32 %v6241_v28, %v6246_v51  ;;  %v6266_v20 = vadd.f32 %v7858_v43, %v750_v45  ;;  %v7861_v51 = vld [vmem:[#allocation53_spill] sm:$0xff]  ;;  %v7862_v28 = vld [vmem:[#allocation54_spill] sm:$0xff] }
 0x21b   : > { %7849 = vst [vmem:[#allocation35_spill] sm:$0xff] %v6235_v58  ;;  %7850 = vst [vmem:[#allocation36_spill] sm:$0xff] %v6238_v6  ;;  %v898_v25 = vmax.f32 %v6235_v58, %v6238_v6  ;;  %v753_v49 = vadd.f32 %v5338_v11, %v710_v44  ;;  %v6271_v30 = vadd.f32 %v7859_v16, %v751_v48  ;;  %v715_v58 = vmul.f32 0.17677669, %v7862_v28  ;;  %v7863_v45 = vld [vmem:[#allocation49_spill] sm:$0xff] }
 0x21c   : > { %887 = vmax.xlane.f32.xlu0 %v886_v35  ;;  %890 = vmax.xlane.f32.xlu1 %v889_v39  ;;  %v6263_v35 = vadd.f32 %v7858_v43, %v749_v26  ;;  %v754_v39 = vadd.f32 %v5340_v12, %v711_v8  ;;  %v6274_v6 = vadd.f32 %v7859_v16, %v752_v50  ;;  %v714_v26 = vmul.f32 0.17677669, %v7861_v51 }
 0x21d   : > { %v6285_v48 = vadd.f32 %v7863_v45, %v753_v49  ;;  %v758_v51 = vadd.f32 %v5340_v12, %v715_v58 }
 0x21e   : > { %7860 = vst [vmem:[#allocation41_spill] sm:$0xff] %v6274_v6  ;;  %v904_v44 = vmax.f32 %v6263_v35, %v6266_v20  ;;  %v907_v8 = vmax.f32 %v6271_v30, %v6274_v6  ;;  %v6288_v50 = vadd.f32 %v7863_v45, %v754_v39  ;;  %v7867_v39 = vld [vmem:[#allocation55_spill] sm:$0xff] }
 0x220   : > { %893 = vmax.xlane.f32.xlu0 %v892_v17  ;;  %896 = vmax.xlane.f32.xlu1 %v895_v33  ;;  %v755_v17 = vadd.f32 %v5338_v11, %v712_v21  ;;  %v756_v33 = vadd.f32 %v5340_v12, %v713_v14  ;;  %v757_v14 = vadd.f32 %v5338_v11, %v714_v26  ;;  %v7864_v21 = vld [vmem:[#allocation52_spill] sm:$0xff] }
 0x221   : > { %v6306_v26 = vadd.f32 %v7867_v39, %v758_v51 }
 0x222   : > { %v6293_v28 = vadd.f32 %v7864_v21, %v755_v17  ;;  %v6303_v6 = vadd.f32 %v7867_v39, %v757_v14 }
 0x224   : > { %899 = vmax.xlane.f32.xlu0 %v898_v25  ;;  %902 = vmax.xlane.f32.xlu1 %v901_v5  ;;  %7865 = vst [vmem:[#allocation42_spill] sm:$0xff] %v6293_v28  ;;  %v6296_v25 = vadd.f32 %v7864_v21, %v756_v33  ;;  %v910_v5 = vmax.f32 %v6285_v48, %v6288_v50 }
 0x225   : > { %v916_v58 = vmax.f32 %v6303_v6, %v6306_v26 }
 0x226   : > { %7866 = vst [vmem:[#allocation44_spill] sm:$0xff] %v6296_v25  ;;  %v913_v49 = vmax.f32 %v6293_v28, %v6296_v25 }
 0x228   : > { %905 = vmax.xlane.f32.xlu0 %v904_v44  ;;  %908 = vmax.xlane.f32.xlu1 %v907_v8 }
 0x22c   : > { %911 = vmax.xlane.f32.xlu0 %v910_v5  ;;  %914 = vmax.xlane.f32.xlu1 %v913_v49  ;;  %v7868_v5 = vld [vmem:[#allocation3_spill] sm:$0xff] }
 0x230   : > { %917 = vmax.xlane.f32.xlu0 %v916_v58 }
 0x261   : > { %v1581_v17 = vpop.xlane.xlu1 %1580 }
 0x262   : > { %4902 = vrcp.f32 %v1581_v17 }
 0x265   : > { %v1584_v33 = vpop.xlane.xlu0 %1583 }
 0x266   : > { %4904 = vrcp.f32 %v1584_v33  ;;  %v7869_v33 = vld [vmem:[#allocation4_spill] sm:$0xff] }
 0x269   : > { %v1587_v44 = vpop.xlane.xlu1 %1586 }
 0x26a   : > { %4906 = vrcp.f32 %v1587_v44 }
 0x26c   : > { %v4903_v8 = vpop.eup %4902 }
 0x26d   : > { %v1590_v25 = vpop.xlane.xlu0 %1589  ;;  %v1644_v14 = vmul.f32 %v4903_v8, %v5968_v57  ;;  %v1643_v28 = vmul.f32 %v4903_v8, %v5966_v41 }
 0x26e   : > { %4908 = vrcp.f32 %v1590_v25 }
 0x26f   : > { %1739 = vmatprep.mubr.f32.mxu0 %v1644_v14 }
 0x270   : > { %v4905_v51 = vpop.eup %4904  ;;  %1740 = vmatmul.mubr.f32.vlgmr.msra.gmra.mrb[32].mxu0 %v1643_v28 }
 0x271   : > { %4624 = vmatpush3.bf16.xpose.msk.msra.mxu0 %vm6052_vm9, %v7868_v5  ;;  %v1593_v49 = vpop.xlane.xlu1 %1592  ;;  %v1646_v58 = vmul.f32 %v4905_v51, %v5976_v60  ;;  %v1645_v17 = vmul.f32 %v4905_v51, %v5974_v52  ;;  %v7870_v60 = vld [vmem:[#allocation5_spill] sm:$0xff]  ;;  %v7871_v51 = vld [vmem:[#allocation6_spill] sm:$0xff] }
 0x272   : > { %4910 = vrcp.f32 %v1593_v49  ;;  %4627 = vmatprep.subr.msk.bf16.mxu0 %vm6052_vm9, %v7869_v33 }
 0x273   : > { %1744 = vmatprep.mubr.f32.mxu0 %v1646_v58 }
 0x274   : > { %v4907_v57 = vpop.eup %4906  ;;  %1745 = vmatmul.mubr.f32.gmra.mrb[34].mxu0 %v1645_v17 }
 0x275   : > { %v1596_v41 = vpop.xlane.xlu0 %1595  ;;  %v1648_v28 = vmul.f32 %v4907_v57, %v5984_v37  ;;  %v1647_v25 = vmul.f32 %v4907_v57, %v5982_v29 }
 0x276   : > { %4912 = vrcp.f32 %v1596_v41 }
 0x277   : > { %1749 = vmatprep.mubr.f32.mxu0 %v1648_v28  ;;  %v7873_v28 = vld [vmem:[#allocation8_spill] sm:$0xff] }
 0x278   : > { %v4909_v44 = vpop.eup %4908  ;;  %1750 = vmatmul.mubr.f32.gmra.mrb[36].mxu0 %v1647_v25 }
 0x279   : > { %4630 = vmatpush3.bf16.xpose.msk.msra.mxu0 %vm6052_vm9, %v7870_v60  ;;  %v1599_v52 = vpop.xlane.xlu1 %1598  ;;  %v1650_v8 = vmul.f32 %v4909_v44, %v5992_v32  ;;  %v1649_v14 = vmul.f32 %v4909_v44, %v5990_v7  ;;  %v7872_v32 = vld [vmem:[#allocation7_spill] sm:$0xff] }
 0x27a   : > { %4914 = vrcp.f32 %v1599_v52  ;;  %4633 = vmatprep.subr.msk.bf16.mxu0 %vm6052_vm9, %v7871_v51 }
 0x27b   : > { %1754 = vmatprep.mubr.f32.mxu0 %v1650_v8 }
 0x27c   : > { %v4911_v29 = vpop.eup %4910  ;;  %1755 = vmatmul.mubr.f32.gmra.mrb[38].mxu0 %v1649_v14 }
 0x27d   : > { %v1602_v37 = vpop.xlane.xlu0 %1601  ;;  %v1652_v49 = vmul.f32 %v4911_v29, %v6000_v27  ;;  %v1651_v58 = vmul.f32 %v4911_v29, %v5998_v47  ;;  %v7875_v29 = vld [vmem:[#allocation10_spill] sm:$0xff] }
 0x27e   : > { %4916 = vrcp.f32 %v1602_v37 }
 0x27f   : > { %1759 = vmatprep.mubr.f32.mxu0 %v1652_v49 }
 0x280   : > { %v4913_v17 = vpop.eup %4912  ;;  %1760 = vmatmul.mubr.f32.gmra.mrb[40].mxu0 %v1651_v58 }
 0x281   : > { %4636 = vmatpush3.bf16.xpose.msk.msra.mxu0 %vm6052_vm9, %v7872_v32  ;;  %v1605_v7 = vpop.xlane.xlu1 %1604  ;;  %v1654_v57 = vmul.f32 %v4913_v17, %v6010_v36  ;;  %v1653_v41 = vmul.f32 %v4913_v17, %v6006_v59  ;;  %v7874_v36 = vld [vmem:[#allocation9_spill] sm:$0xff] }
 0x282   : > { %4918 = vrcp.f32 %v1605_v7  ;;  %4639 = vmatprep.subr.msk.bf16.mxu0 %vm6052_vm9, %v7873_v28 }
 0x283   : > { %1764 = vmatprep.mubr.f32.mxu0 %v1654_v57  ;;  %v7877_v57 = vld [vmem:[#allocation12_spill] sm:$0xff] }
 0x284   : > { %v4915_v47 = vpop.eup %4914  ;;  %1765 = vmatmul.mubr.f32.gmra.mrb[42].mxu0 %v1653_v41 }
 0x285   : > { %v1608_v27 = vpop.xlane.xlu0 %1607  ;;  %v1656_v25 = vmul.f32 %v4915_v47, %v6030_v13  ;;  %v1655_v44 = vmul.f32 %v4915_v47, %v6028_v19 }
 0x286   : > { %4920 = vrcp.f32 %v1608_v27 }
 0x287   : > { %1769 = vmatprep.mubr.f32.mxu0 %v1656_v25 }
 0x288   : > { %v4917_v52 = vpop.eup %4916  ;;  %1770 = vmatmul.mubr.f32.gmra.mrb[44].mxu0 %v1655_v44 }
 0x289   : > { %4642 = vmatpush3.bf16.xpose.msk.msra.mxu0 %vm6052_vm9, %v7874_v36  ;;  %v1611_v59 = vpop.xlane.xlu1 %1610  ;;  %v1658_v8 = vmul.f32 %v4917_v52, %v6044_v15  ;;  %v1657_v14 = vmul.f32 %v4917_v52, %v6042_v2  ;;  %v7876_v15 = vld [vmem:[#allocation11_spill] sm:$0xff]  ;;  %v7879_v52 = vld [vmem:[#allocation14_spill] sm:$0xff] }
 0x28a   : > { %4922 = vrcp.f32 %v1611_v59  ;;  %4645 = vmatprep.subr.msk.bf16.mxu0 %vm6052_vm9, %v7875_v29 }
 0x28b   : > { %1774 = vmatprep.mubr.f32.mxu0 %v1658_v8 }
 0x28c   : > { %v4919_v19 = vpop.eup %4918  ;;  %1775 = vmatmul.mubr.f32.gmra.mrb[46].mxu0 %v1657_v14 }
 0x28d   : > { %v1614_v13 = vpop.xlane.xlu0 %1613  ;;  %v1660_v37 = vmul.f32 %v4919_v19, %v6061_v38  ;;  %v1659_v49 = vmul.f32 %v4919_v19, %v6056_v24 }
 0x28e   : > { %4924 = vrcp.f32 %v1614_v13  ;;  %v7881_v13 = vld [vmem:[#allocation16_spill] sm:$0xff] }
 0x28f   : > { %1779 = vmatprep.mubr.f32.mxu0 %v1660_v37 }
 0x290   : > { %v4921_v58 = vpop.eup %4920  ;;  %1780 = vmatmul.mubr.f32.gmra.mrb[48].mxu0 %v1659_v49  ;;  %v7885_v49 = vld [vmem:[#allocation17_spill] sm:$0xff] }
 0x291   : > { %4648 = vmatpush3.bf16.xpose.msk.msra.mxu0 %vm6052_vm9, %v7876_v15  ;;  %v1617_v2 = vpop.xlane.xlu1 %1616  ;;  %v1662_v17 = vmul.f32 %v4921_v58, %v6072_v34  ;;  %v1661_v7 = vmul.f32 %v4921_v58, %v6070_v56  ;;  %v7878_v34 = vld [vmem:[#allocation13_spill] sm:$0xff] }
 0x292   : > { %4926 = vrcp.f32 %v1617_v2  ;;  %4651 = vmatprep.subr.msk.bf16.mxu0 %vm6052_vm9, %v7877_v57 }
 0x293   : > { %1784 = vmatprep.mubr.f32.mxu0 %v1662_v17  ;;  %v5224_v17 = vld [vmem:[%s5385_s8 + $0x10] sm:$0xff] }
 0x294   : > { %v4923_v24 = vpop.eup %4922  ;;  %1785 = vmatmul.mubr.f32.gmra.mrb[50].mxu0 %v1661_v7  ;;  %v5225_v7 = vld [vmem:[%s5385_s8 + $0x18] sm:$0xff] }
 0x295   : > { %v1620_v38 = vpop.xlane.xlu0 %1619  ;;  %v1664_v41 = vmul.f32 %v4923_v24, %v6080_v9  ;;  %v1663_v47 = vmul.f32 %v4923_v24, %v6078_v23  ;;  %v5236_v24 = vld [vmem:[%s5385_s8 + $0x70] sm:$0xff] }
 0x296   : > { %4928 = vrcp.f32 %v1620_v38  ;;  %v5237_v38 = vld [vmem:[%s5385_s8 + $0x78] sm:$0xff] }
 0x297   : > { %1789 = vmatprep.mubr.f32.mxu0 %v1664_v41 }
 0x298   : > { %v4925_v27 = vpop.eup %4924  ;;  %1790 = vmatmul.mubr.f32.gmra.mrb[52].mxu0 %v1663_v47 }
 0x299   : > { %4654 = vmatpush3.bf16.xpose.msk.msra.mxu0 %vm6052_vm9, %v7878_v34  ;;  %v1623_v56 = vpop.xlane.xlu1 %1622  ;;  %v1666_v25 = vmul.f32 %v4925_v27, %v6088_v61  ;;  %v1665_v44 = vmul.f32 %v4925_v27, %v6086_v0  ;;  %v7880_v61 = vld [vmem:[#allocation15_spill] sm:$0xff] }
 0x29a   : > { %4930 = vrcp.f32 %v1623_v56  ;;  %4657 = vmatprep.subr.msk.bf16.mxu0 %vm6052_vm9, %v7879_v52 }
 0x29b   : > { %1794 = vmatprep.mubr.f32.mxu0 %v1666_v25 }
 0x29c   : > { %v4927_v23 = vpop.eup %4926  ;;  %1795 = vmatmul.mubr.f32.gmra.mrb[54].mxu0 %v1665_v44 }
 0x29d   : > { %v1626_v9 = vpop.xlane.xlu0 %1625  ;;  %v1668_v59 = vmul.f32 %v4927_v23, %v6096_v53  ;;  %v1667_v8 = vmul.f32 %v4927_v23, %v6094_v62 }
 0x29e   : > { %4932 = vrcp.f32 %v1626_v9 }
 0x29f   : > { %1799 = vmatprep.mubr.f32.mxu0 %v1668_v59 }
 0x2a0   : > { %v4929_v14 = vpop.eup %4928  ;;  %1800 = vmatmul.mubr.f32.gmra.mrb[56].mxu0 %v1667_v8 }
 0x2a1   : > { %4660 = vmatpush3.bf16.xpose.msk.msra.mxu0 %vm6052_vm9, %v7880_v61  ;;  %v1670_v0 = vmul.f32 %v4929_v14, %v6106_v4  ;;  %v1669_v19 = vmul.f32 %v4929_v14, %v6104_v18  ;;  %v7882_v4 = vmov 0 }
 0x2a2   : > { %4663 = vmatprep.subr.msk.bf16.mxu0 %vm6052_vm9, %v7881_v13  ;;  %v7883_v4 = vsel %vm6383_vm11, 4294967295, %v7882_v4 }
 0x2a3   : > { %1804 = vmatprep.mubr.f32.mxu0 %v1670_v0  ;;  %7884 = vst [vmem:[#allocation45_spill] sm:$0xff] %v7883_v4 }
 0x2a4   : > { %v4931_v53 = vpop.eup %4930  ;;  %1805 = vmatmul.mubr.f32.gmra.mrb[58].mxu0 %v1669_v19 }
 0x2a5   : > { %v1672_v62 = vmul.f32 %v4931_v53, %v6122_v3  ;;  %v1671_v37 = vmul.f32 %v4931_v53, %v6118_v63  ;;  %v7887_v3 = vld [vmem:[#allocation2_spill] sm:$0xff] }
 0x2a6   : > { %v6396_v63 = vld [vmem:[%s5385_s8] sm:$0xff] }
 0x2a7   : > { %1809 = vmatprep.mubr.f32.mxu0 %v1672_v62 }
 0x2a8   : > { %v4933_v18 = vpop.eup %4932  ;;  %1810 = vmatmul.mubr.f32.gmra.mrb[60].mxu0 %v1671_v37 }
 0x2a9   : > { %4666 = vmatpush3.bf16.xpose.msk.msra.mxu0 %vm6052_vm9, %v7885_v49  ;;  %v1674_v58 = vmul.f32 %v4933_v18, %v6147_v40  ;;  %v1673_v2 = vmul.f32 %v4933_v18, %v7886_v1  ;;  %v5223_v40 = vld [vmem:[%s5385_s8 + $0x8] sm:$0xff] }
 0x2aa   : > { %4717 = vmatprep.subr.msk.bf16.mxu0 %vm6383_vm11, %v7887_v3 }
 0x2ab   : > { %1814 = vmatprep.mubr.f32.mxu0 %v1674_v58 }
 0x2ac   : > { %1815 = vmatmul.mubr.f32.gmra.mrb[62].mxu0 %v1673_v2 }
 0x2ad   : > { %4171 = vmatprep.mubr.f32.mxu0 %v6396_v63 }
 0x2b0   : > { %4172 = vmatmul.mubr.f32.vlgmr.msra.gmra.mrb[64].mxu0 %v6396_v63 }
 0x2b1   : > { %4720 = vmatpush3.bf16.xpose.msk.msra.mxu0 %vm6383_vm11, %v7868_v5  ;;  %4173 = vmatprep.mubr.f32.mxu0 %v5223_v40  ;;  %v5226_v5 = vld [vmem:[%s5385_s8 + $0x20] sm:$0xff] }
 0x2b2   : > { %4723 = vmatprep.subr.msk.bf16.mxu0 %vm6383_vm11, %v7869_v33  ;;  %v5227_v33 = vld [vmem:[%s5385_s8 + $0x28] sm:$0xff] }
 0x2b4   : > { %4174 = vmatmul.mubr.f32.gmra.mrb[66].mxu0 %v5223_v40 }
 0x2b5   : > { %4175 = vmatprep.mubr.f32.mxu0 %v5224_v17 }
 0x2b8   : > { %4176 = vmatmul.mubr.f32.gmra.mrb[68].mxu0 %v5224_v17 }
 0x2b9   : > { %4726 = vmatpush3.bf16.xpose.msk.msra.mxu0 %vm6383_vm11, %v7870_v60  ;;  %4177 = vmatprep.mubr.f32.mxu0 %v5225_v7  ;;  %v5228_v60 = vld [vmem:[%s5385_s8 + $0x30] sm:$0xff] }
 0x2ba   : > { %4729 = vmatprep.subr.msk.bf16.mxu0 %vm6383_vm11, %v7871_v51  ;;  %v5229_v51 = vld [vmem:[%s5385_s8 + $0x38] sm:$0xff] }
 0x2bc   : > { %4178 = vmatmul.mubr.f32.gmra.mrb[70].mxu0 %v5225_v7 }
 0x2bd   : > { %4179 = vmatprep.mubr.f32.mxu0 %v5226_v5 }
 0x2c0   : > { %4180 = vmatmul.mubr.f32.gmra.mrb[72].mxu0 %v5226_v5 }
 0x2c1   : > { %4732 = vmatpush3.bf16.xpose.msk.msra.mxu0 %vm6383_vm11, %v7872_v32  ;;  %4181 = vmatprep.mubr.f32.mxu0 %v5227_v33  ;;  %v5230_v32 = vld [vmem:[%s5385_s8 + $0x40] sm:$0xff] }
 0x2c2   : > { %4735 = vmatprep.subr.msk.bf16.mxu0 %vm6383_vm11, %v7873_v28  ;;  %v5231_v28 = vld [vmem:[%s5385_s8 + $0x48] sm:$0xff] }
 0x2c4   : > { %4182 = vmatmul.mubr.f32.gmra.mrb[74].mxu0 %v5227_v33 }
 0x2c5   : > { %4183 = vmatprep.mubr.f32.mxu0 %v5228_v60 }
 0x2c8   : > { %4184 = vmatmul.mubr.f32.gmra.mrb[76].mxu0 %v5228_v60 }
 0x2c9   : > { %4738 = vmatpush3.bf16.xpose.msk.msra.mxu0 %vm6383_vm11, %v7874_v36  ;;  %4185 = vmatprep.mubr.f32.mxu0 %v5229_v51  ;;  %v5232_v36 = vld [vmem:[%s5385_s8 + $0x50] sm:$0xff] }
 0x2ca   : > { %4741 = vmatprep.subr.msk.bf16.mxu0 %vm6383_vm11, %v7875_v29  ;;  %v5233_v29 = vld [vmem:[%s5385_s8 + $0x58] sm:$0xff] }
 0x2cc   : > { %4186 = vmatmul.mubr.f32.gmra.mrb[78].mxu0 %v5229_v51 }
 0x2cd   : > { %4187 = vmatprep.mubr.f32.mxu0 %v5230_v32 }
 0x2d0   : > { %4188 = vmatmul.mubr.f32.gmra.mrb[80].mxu0 %v5230_v32 }
 0x2d1   : > { %4744 = vmatpush3.bf16.xpose.msk.msra.mxu0 %vm6383_vm11, %v7876_v15  ;;  %4189 = vmatprep.mubr.f32.mxu0 %v5231_v28  ;;  %v5234_v15 = vld [vmem:[%s5385_s8 + $0x60] sm:$0xff] }
 0x2d2   : > { %4747 = vmatprep.subr.msk.bf16.mxu0 %vm6383_vm11, %v7877_v57  ;;  %v5235_v57 = vld [vmem:[%s5385_s8 + $0x68] sm:$0xff] }
 0x2d4   : > { %4190 = vmatmul.mubr.f32.gmra.mrb[82].mxu0 %v5231_v28 }
 0x2d5   : > { %4191 = vmatprep.mubr.f32.mxu0 %v5232_v36 }
 0x2d8   : > { %4192 = vmatmul.mubr.f32.gmra.mrb[84].mxu0 %v5232_v36 }
 0x2d9   : > { %4750 = vmatpush3.bf16.xpose.msk.msra.mxu0 %vm6383_vm11, %v7878_v34  ;;  %4193 = vmatprep.mubr.f32.mxu0 %v5233_v29 }
 0x2da   : > { %4753 = vmatprep.subr.msk.bf16.mxu0 %vm6383_vm11, %v7879_v52 }
 0x2dc   : > { %4194 = vmatmul.mubr.f32.gmra.mrb[86].mxu0 %v5233_v29 }
 0x2dd   : > { %4195 = vmatprep.mubr.f32.mxu0 %v5234_v15 }
 0x2e0   : > { %4196 = vmatmul.mubr.f32.gmra.mrb[88].mxu0 %v5234_v15 }
 0x2e1   : > { %4756 = vmatpush3.bf16.xpose.msk.msra.mxu0 %vm6383_vm11, %v7880_v61  ;;  %4197 = vmatprep.mubr.f32.mxu0 %v5235_v57 }
 0x2e2   : > { %4759 = vmatprep.subr.msk.bf16.mxu0 %vm6383_vm11, %v7881_v13 }
 0x2e4   : > { %4198 = vmatmul.mubr.f32.gmra.mrb[90].mxu0 %v5235_v57 }
 0x2e5   : > { %4199 = vmatprep.mubr.f32.mxu0 %v5236_v24 }
 0x2e8   : > { %4200 = vmatmul.mubr.f32.gmra.mrb[92].mxu0 %v5236_v24 }
 0x2e9   : > { %4762 = vmatpush3.bf16.xpose.msk.msra.mxu0 %vm6383_vm11, %v7885_v49  ;;  %4201 = vmatprep.mubr.f32.mxu0 %v5237_v38 }
 0x2ec   : > { %4202 = vmatmul.mubr.f32.gmra.mrb[94].mxu0 %v5237_v38 }
 0x2ed   : > { %4315 = vmatprep.mubr.f32.mxu0 %v6396_v63 }
 0x2f0   : > { %4316 = vmatmul.mubr.f32.vlgmr.msra.gmra.mrb[96].mxu0 %v6396_v63 }
 0x2f1   : > { %4317 = vmatprep.mubr.f32.mxu0 %v5223_v40 }
 0x2f4   : > { %4318 = vmatmul.mubr.f32.gmra.mrb[98].mxu0 %v5223_v40 }
 0x2f5   : > { %4319 = vmatprep.mubr.f32.mxu0 %v5224_v17 }
 0x2f8   : > { %4320 = vmatmul.mubr.f32.gmra.mrb[100].mxu0 %v5224_v17 }
 0x2f9   : > { %4321 = vmatprep.mubr.f32.mxu0 %v5225_v7 }
 0x2fc   : > { %4322 = vmatmul.mubr.f32.gmra.mrb[102].mxu0 %v5225_v7 }
 0x2fd   : > { %4323 = vmatprep.mubr.f32.mxu0 %v5226_v5 }
 0x300   : > { %4324 = vmatmul.mubr.f32.gmra.mrb[104].mxu0 %v5226_v5 }
 0x301   : > { %4325 = vmatprep.mubr.f32.mxu0 %v5227_v33 }
 0x304   : > { %4326 = vmatmul.mubr.f32.gmra.mrb[106].mxu0 %v5227_v33 }
 0x305   : > { %4327 = vmatprep.mubr.f32.mxu0 %v5228_v60 }
 0x308   : > { %4328 = vmatmul.mubr.f32.gmra.mrb[108].mxu0 %v5228_v60 }
 0x309   : > { %4329 = vmatprep.mubr.f32.mxu0 %v5229_v51 }
 0x30c   : > { %4330 = vmatmul.mubr.f32.gmra.mrb[110].mxu0 %v5229_v51 }
 0x30d   : > { %4331 = vmatprep.mubr.f32.mxu0 %v5230_v32 }
 0x310   : > { %4332 = vmatmul.mubr.f32.gmra.mrb[112].mxu0 %v5230_v32 }
 0x311   : > { %4333 = vmatprep.mubr.f32.mxu0 %v5231_v28 }
 0x314   : > { %4334 = vmatmul.mubr.f32.gmra.mrb[114].mxu0 %v5231_v28 }
 0x315   : > { %4335 = vmatprep.mubr.f32.mxu0 %v5232_v36 }
 0x318   : > { %4336 = vmatmul.mubr.f32.gmra.mrb[116].mxu0 %v5232_v36 }
 0x319   : > { %4337 = vmatprep.mubr.f32.mxu0 %v5233_v29 }
 0x31c   : > { %4338 = vmatmul.mubr.f32.gmra.mrb[118].mxu0 %v5233_v29 }
 0x31d   : > { %4339 = vmatprep.mubr.f32.mxu0 %v5234_v15 }
 0x320   : > { %4340 = vmatmul.mubr.f32.gmra.mrb[120].mxu0 %v5234_v15 }
 0x321   : > { %4341 = vmatprep.mubr.f32.mxu0 %v5235_v57 }
 0x324   : > { %4342 = vmatmul.mubr.f32.gmra.mrb[122].mxu0 %v5235_v57 }
 0x325   : > { %4343 = vmatprep.mubr.f32.mxu0 %v5236_v24 }
 0x328   : > { %4344 = vmatmul.mubr.f32.gmra.mrb[124].mxu0 %v5236_v24 }
 0x329   : > { %4345 = vmatprep.mubr.f32.mxu0 %v5237_v38 }
 0x32c   : > { %4346 = vmatmul.mubr.f32.gmra.mrb[126].mxu0 %v5237_v38 }
 0x343   : > { %v4011_v41 = vpop.f32.mrb[32].mxu0 }
 0x344   : > { %v4012_v47 = vpop.f32.mrb[33].mxu0 }
 0x345   : > { %v6462_v27 = vadd.f32 %v4012_v47, %v4011_v41 }
 0x347   : > { %7888 = vst [vmem:[#allocation40_spill] sm:$0xff] %v6462_v27  ;;  %v4014_v34 = vpop.f32.mrb[34].mxu0 }
 0x348   : > { %v4015_v56 = vpop.f32.mrb[35].mxu0 }
 0x349   : > { %v6464_v25 = vadd.f32 %v4015_v56, %v4014_v34 }
 0x34b   : > { %7889 = vst [vmem:[#allocation47_spill] sm:$0xff] %v6464_v25  ;;  %v4017_v44 = vpop.f32.mrb[36].mxu0 }
 0x34c   : > { %v4018_v52 = vpop.f32.mrb[37].mxu0 }
 0x34d   : > { %v6466_v23 = vadd.f32 %v4018_v52, %v4017_v44 }
 0x34f   : > { %7890 = vst [vmem:[#allocation48_spill] sm:$0xff] %v6466_v23  ;;  %v4020_v9 = vpop.f32.mrb[38].mxu0  ;;  %v7925_v23 = vld [vmem:[#allocation30_spill] sm:$0xff] }
 0x350   : > { %v4021_v59 = vpop.f32.mrb[39].mxu0 }
 0x351   : > { %v6468_v8 = vadd.f32 %v4021_v59, %v4020_v9 }
 0x353   : > { %7891 = vst [vmem:[#allocation50_spill] sm:$0xff] %v6468_v8  ;;  %v4023_v14 = vpop.f32.mrb[40].mxu0 }
 0x354   : > { %v4024_v61 = vpop.f32.mrb[41].mxu0 }
 0x355   : > { %v6470_v0 = vadd.f32 %v4024_v61, %v4023_v14 }
 0x357   : > { %7892 = vst [vmem:[#allocation51_spill] sm:$0xff] %v6470_v0  ;;  %v4026_v19 = vpop.f32.mrb[42].mxu0 }
 0x358   : > { %v4027_v13 = vpop.f32.mrb[43].mxu0 }
 0x359   : > { %v6472_v53 = vadd.f32 %v4027_v13, %v4026_v19 }
 0x35b   : > { %7893 = vst [vmem:[#allocation43_spill] sm:$0xff] %v6472_v53  ;;  %v4029_v62 = vpop.f32.mrb[44].mxu0 }
 0x35c   : > { %v4030_v37 = vpop.f32.mrb[45].mxu0 }
 0x35d   : > { %v6474_v18 = vadd.f32 %v4030_v37, %v4029_v62 }
 0x35f   : > { %7894 = vst [vmem:[#allocation46_spill] sm:$0xff] %v6474_v18  ;;  %v4032_v49 = vpop.f32.mrb[46].mxu0 }
 0x360   : > { %v4033_v58 = vpop.f32.mrb[47].mxu0 }
 0x361   : > { %v6476_v1 = vadd.f32 %v4033_v58, %v4032_v49  ;;  %v7904_v58 = vld [vmem:[#allocation18_spill] sm:$0xff] }
 0x363   : > { %7895 = vst [vmem:[#allocation53_spill] sm:$0xff] %v6476_v1  ;;  %v4035_v2 = vpop.f32.mrb[48].mxu0 }
 0x364   : > { %v4036_v3 = vpop.f32.mrb[49].mxu0 }
 0x365   : > { %v6478_v63 = vadd.f32 %v4036_v3, %v4035_v2 }
 0x367   : > { %7896 = vst [vmem:[#allocation54_spill] sm:$0xff] %v6478_v63  ;;  %v4038_v40 = vpop.f32.mrb[50].mxu0 }
 0x368   : > { %v4039_v17 = vpop.f32.mrb[51].mxu0 }
 0x369   : > { %v6480_v7 = vadd.f32 %v4039_v17, %v4038_v40  ;;  %v873_v17 = vpop.xlane.xlu1 %872 }
 0x36b   : > { %7897 = vst [vmem:[#allocation49_spill] sm:$0xff] %v6480_v7  ;;  %v4041_v5 = vpop.f32.mrb[52].mxu0 }
 0x36c   : > { %v4042_v33 = vpop.f32.mrb[53].mxu0 }
 0x36d   : > { %v6482_v60 = vadd.f32 %v4042_v33, %v4041_v5 }
 0x36f   : > { %7898 = vst [vmem:[#allocation52_spill] sm:$0xff] %v6482_v60  ;;  %v4044_v51 = vpop.f32.mrb[54].mxu0 }
 0x370   : > { %v4045_v32 = vpop.f32.mrb[55].mxu0 }
 0x371   : > { %v6484_v28 = vadd.f32 %v4045_v32, %v4044_v51 }
 0x373   : > { %7899 = vst [vmem:[#allocation55_spill] sm:$0xff] %v6484_v28  ;;  %v4047_v36 = vpop.f32.mrb[56].mxu0 }
 0x374   : > { %v4048_v29 = vpop.f32.mrb[57].mxu0 }
 0x375   : > { %v6486_v15 = vadd.f32 %v4048_v29, %v4047_v36 }
 0x377   : > { %7900 = vst [vmem:[#allocation3_spill] sm:$0xff] %v6486_v15  ;;  %v4050_v57 = vpop.f32.mrb[58].mxu0 }
 0x378   : > { %v4051_v24 = vpop.f32.mrb[59].mxu0 }
 0x379   : > { %v6488_v38 = vadd.f32 %v4051_v24, %v4050_v57  ;;  %v7905_v57 = vld [vmem:[#allocation19_spill] sm:$0xff] }
 0x37b   : > { %7901 = vst [vmem:[#allocation4_spill] sm:$0xff] %v6488_v38  ;;  %v4053_v41 = vpop.f32.mrb[60].mxu0 }
 0x37c   : > { %v4054_v47 = vpop.f32.mrb[61].mxu0 }
 0x37d   : > { %v6490_v34 = vadd.f32 %v4054_v47, %v4053_v41  ;;  %v7906_v41 = vld [vmem:[#allocation73_spill] sm:$0xff] }
 0x37e   : > { %v919_v47 = vsub.f32 %v7906_v41, %v873_v17 }
 0x37f   : > { %7902 = vst [vmem:[#allocation5_spill] sm:$0xff] %v6490_v34  ;;  %v4056_v56 = vpop.f32.mrb[62].mxu0 }
 0x380   : > { %v4057_v44 = vpop.f32.mrb[63].mxu0 }
 0x381   : > { %v6492_v52 = vadd.f32 %v4057_v44, %v4056_v56 }
 0x383   : > { %7903 = vst [vmem:[#allocation6_spill] sm:$0xff] %v6492_v52  ;;  %v2098_v9 = vpop.f32.mrb[64].mxu0 }
 0x384   : > { %v2193_v59 = vmul.f32 0.17677669, %v2098_v9  ;;  %v2100_v14 = vpop.f32.mrb[65].mxu0  ;;  %v7907_v9 = vld [vmem:[#allocation74_spill] sm:$0xff] }
 0x385   : > { %v2194_v61 = vmul.f32 0.17677669, %v2100_v14  ;;  %v876_v14 = vpop.xlane.xlu0 %875 }
 0x386   : > { %v2225_v19 = vadd.f32 %v2193_v59, %v5338_v11  ;;  %v920_v59 = vsub.f32 %v7907_v9, %v873_v17 }
 0x387   : > { %v2226_v13 = vadd.f32 %v2194_v61, %v5340_v12  ;;  %v2104_v62 = vpop.f32.mrb[66].mxu0 }
 0x388   : > { %v2195_v37 = vmul.f32 0.17677669, %v2104_v62  ;;  %v2106_v49 = vpop.f32.mrb[67].mxu0  ;;  %v6497_v2 = vadd.f32 %v2225_v19, %v7904_v58 }
 0x389   : > { %v2196_v3 = vmul.f32 0.17677669, %v2106_v49  ;;  %v6500_v40 = vadd.f32 %v2226_v13, %v7904_v58  ;;  %v882_v15 = vpop.xlane.xlu0 %881 }
 0x38a   : > { %v2227_v5 = vadd.f32 %v2195_v37, %v5338_v11 }
 0x38b   : > { %v2228_v33 = vadd.f32 %v2196_v3, %v5340_v12  ;;  %v2110_v51 = vpop.f32.mrb[68].mxu0  ;;  %v2289_v32 = vmax.f32 %v6497_v2, %v6500_v40  ;;  %v7908_v3 = vld [vmem:[#allocation20_spill] sm:$0xff] }
 0x38c   : > { %v2197_v36 = vmul.f32 0.17677669, %v2110_v51  ;;  %v2112_v29 = vpop.f32.mrb[69].mxu0  ;;  %v6507_v24 = vadd.f32 %v2227_v5, %v7905_v57  ;;  %v951_v51 = vmul.f32 1.442695, %v919_v47 }
 0x38d   : > { %v2198_v56 = vmul.f32 0.17677669, %v2112_v29  ;;  %2290 = vmax.xlane.f32.xlu1 %v2289_v32  ;;  %v6511_v44 = vadd.f32 %v2228_v33, %v7905_v57  ;;  %v7909_v32 = vld [vmem:[#allocation75_spill] sm:$0xff]  ;;  %v879_v29 = vpop.xlane.xlu1 %878 }
 0x38e   : > { %v2229_v61 = vadd.f32 %v2197_v36, %v5338_v11  ;;  %v921_v33 = vsub.f32 %v7909_v32, %v876_v14  ;;  %v953_v36 = vmul.f32 1.442695, %v920_v59  ;;  %v923_v47 = vsub.f32 %v6157_v22, %v879_v29 }
 0x38f   : > { %v2230_v19 = vadd.f32 %v2198_v56, %v5340_v12  ;;  %v2116_v13 = vpop.f32.mrb[70].mxu0  ;;  %v2292_v62 = vmax.f32 %v6507_v24, %v6511_v44  ;;  %v7910_v56 = vld [vmem:[#allocation76_spill] sm:$0xff]  ;;  %4934 = vpow2.f32 %v951_v51 }
 0x390   : > { %v2199_v37 = vmul.f32 0.17677669, %v2116_v13  ;;  %v2118_v49 = vpop.f32.mrb[71].mxu0  ;;  %v6519_v5 = vadd.f32 %v2229_v61, %v7908_v3  ;;  %v922_v9 = vsub.f32 %v7910_v56, %v876_v14  ;;  %4936 = vpow2.f32 %v953_v36  ;;  %v7914_v36 = vld [vmem:[#allocation24_spill] sm:$0xff] }
 0x391   : > { %v2200_v41 = vmul.f32 0.17677669, %v2118_v49  ;;  %2293 = vmax.xlane.f32.xlu0 %v2292_v62  ;;  %v6523_v17 = vadd.f32 %v2230_v19, %v7908_v3  ;;  %v7911_v49 = vld [vmem:[#allocation21_spill] sm:$0xff]  ;;  %v955_v19 = vmul.f32 1.442695, %v921_v33 }
 0x392   : > { %v2231_v52 = vadd.f32 %v2199_v37, %v5338_v11  ;;  %v957_v37 = vmul.f32 1.442695, %v922_v9  ;;  %v959_v51 = vmul.f32 1.442695, %v923_v47  ;;  %v925_v9 = vsub.f32 %v7914_v36, %v882_v15 }
 0x393   : > { %v2232_v13 = vadd.f32 %v2200_v41, %v5340_v12  ;;  %v2122_v34 = vpop.f32.mrb[72].mxu0  ;;  %v2295_v61 = vmax.f32 %v6519_v5, %v6523_v17  ;;  %v7912_v41 = vld [vmem:[#allocation23_spill] sm:$0xff]  ;;  %4938 = vpow2.f32 %v955_v19 }
 0x394   : > { %v2201_v32 = vmul.f32 0.17677669, %v2122_v34  ;;  %v2124_v38 = vpop.f32.mrb[73].mxu0  ;;  %v6532_v62 = vadd.f32 %v2231_v52, %v7911_v49  ;;  %v924_v56 = vsub.f32 %v7912_v41, %v879_v29  ;;  %4940 = vpow2.f32 %v957_v37  ;;  %v7915_v41 = vld [vmem:[#allocation26_spill] sm:$0xff]  ;;  %v7916_v19 = vld [vmem:[#allocation27_spill] sm:$0xff] }
 0x395   : > { %v2202_v59 = vmul.f32 0.17677669, %v2124_v38  ;;  %2296 = vmax.xlane.f32.xlu1 %v2295_v61  ;;  %v6535_v14 = vadd.f32 %v2232_v13, %v7911_v49  ;;  %v7913_v61 = vld [vmem:[#allocation22_spill] sm:$0xff]  ;;  %v885_v13 = vpop.xlane.xlu1 %884  ;;  %v926_v7 = vsub.f32 %v7915_v41, %v882_v15  ;;  %4942 = vpow2.f32 %v959_v51  ;;  %v888_v41 = vpop.xlane.xlu0 %887 }
 0x396   : > { %v2233_v28 = vadd.f32 %v2201_v32, %v5338_v11  ;;  %v927_v36 = vsub.f32 %v7916_v19, %v885_v13  ;;  %v963_v37 = vmul.f32 1.442695, %v925_v9  ;;  %v930_v25 = vsub.f32 %v7925_v23, %v888_v41  ;;  %v7929_v23 = vld [vmem:[#allocation31_spill] sm:$0xff] }
 0x397   : > { %v2234_v22 = vadd.f32 %v2202_v59, %v5340_v12  ;;  %v2128_v34 = vpop.f32.mrb[74].mxu0  ;;  %v2298_v52 = vmax.f32 %v6532_v62, %v6535_v14  ;;  %v961_v59 = vmul.f32 1.442695, %v924_v56 }
 0x398   : > { %v2203_v33 = vmul.f32 0.17677669, %v2128_v34  ;;  %v2130_v38 = vpop.f32.mrb[75].mxu0  ;;  %v6543_v60 = vadd.f32 %v2233_v28, %v7913_v61  ;;  %v973_v54 = vmul.f32 1.442695, %v930_v25 }
 0x399   : > { %v2204_v29 = vmul.f32 0.17677669, %v2130_v38  ;;  %2299 = vmax.xlane.f32.xlu0 %v2298_v52  ;;  %v6547_v32 = vadd.f32 %v2234_v22, %v7913_v61  ;;  %v7917_v52 = vld [vmem:[#allocation25_spill] sm:$0xff]  ;;  %4944 = vpow2.f32 %v961_v59  ;;  %v965_v22 = vmul.f32 1.442695, %v926_v7  ;;  %v6563_v19 = vpop.eup %4934  ;;  %v7921_v59 = vld [vmem:[#allocation28_spill] sm:$0xff] }
 0x39a   : > { %v2235_v47 = vadd.f32 %v2203_v33, %v5338_v11  ;;  %v7918_v33 = vld [vmem:[#allocation78_spill] sm:$0xff]  ;;  %7919 = vst [vmem:[#allocation7_spill] sm:$0xff] %v6563_v19  ;;  %v6568_v9 = vpop.eup %4936  ;;  %4946 = vpow2.f32 %v963_v37 }
 0x39b   : > { %v2236_v34 = vadd.f32 %v2204_v29, %v5340_v12  ;;  %v2134_v63 = vpop.f32.mrb[76].mxu0  ;;  %v2301_v28 = vmax.f32 %v6543_v60, %v6547_v32  ;;  %v928_v29 = vsub.f32 %v7918_v33, %v885_v13  ;;  %7920 = vst [vmem:[#allocation8_spill] sm:$0xff] %v6568_v9  ;;  %v7923_v13 = vld [vmem:[#allocation29_spill] sm:$0xff]  ;;  %4948 = vpow2.f32 %v965_v22 }
 0x39c   : > { %v2205_v1 = vmul.f32 0.17677669, %v2134_v63  ;;  %v2136_v38 = vpop.f32.mrb[77].mxu0  ;;  %v6556_v18 = vadd.f32 %v2235_v47, %v7917_v52  ;;  %v929_v33 = vsub.f32 %v7923_v13, %v888_v41 }
 0x39d   : > { %v2206_v56 = vmul.f32 0.17677669, %v2136_v38  ;;  %2302 = vmax.xlane.f32.xlu1 %v2301_v28  ;;  %v6559_v15 = vadd.f32 %v2236_v34, %v7917_v52  ;;  %v967_v28 = vmul.f32 1.442695, %v927_v36  ;;  %v969_v8 = vmul.f32 1.442695, %v928_v29 }
 0x39e   : > { %v2237_v53 = vadd.f32 %v2205_v1, %v5338_v11  ;;  %v891_v1 = vpop.xlane.xlu1 %890 }
 0x39f   : > { %v2238_v63 = vadd.f32 %v2206_v56, %v5340_v12  ;;  %v2140_v47 = vpop.f32.mrb[78].mxu0  ;;  %v2304_v51 = vmax.f32 %v6556_v18, %v6559_v15  ;;  %4950 = vpow2.f32 %v967_v28 }
 0x3a0   : > { %v2207_v34 = vmul.f32 0.17677669, %v2140_v47  ;;  %v2142_v38 = vpop.f32.mrb[79].mxu0  ;;  %v6571_v7 = vadd.f32 %v2237_v53, %v7921_v59  ;;  %v6579_v47 = vpop.eup %4938  ;;  %4952 = vpow2.f32 %v969_v8 }
 0x3a1   : > { %v2208_v0 = vmul.f32 0.17677669, %v2142_v38  ;;  %2305 = vmax.xlane.f32.xlu0 %v2304_v51  ;;  %v6575_v56 = vadd.f32 %v2238_v63, %v7921_v59  ;;  %7926 = vst [vmem:[#allocation11_spill] sm:$0xff] %v6579_v47  ;;  %v1015_v51 = vadd.f32 %v6568_v9, %v6563_v19  ;;  %v6586_v38 = vpop.eup %4940  ;;  %v7928_v63 = vld [vmem:[#allocation32_spill] sm:$0xff]  ;;  %v7930_v9 = vld [vmem:[#allocation33_spill] sm:$0xff] }
 0x3a2   : > { %7922 = vst [vmem:[#allocation9_spill] sm:$0xff] %v6571_v7  ;;  %v2239_v36 = vadd.f32 %v2207_v34, %v5338_v11  ;;  %7927 = vst [vmem:[#allocation12_spill] sm:$0xff] %v6586_v38  ;;  %v931_v22 = vsub.f32 %v7928_v63, %v891_v1  ;;  %v971_v34 = vmul.f32 1.442695, %v929_v33  ;;  %v932_v19 = vsub.f32 %v7930_v9, %v891_v1  ;;  %v7933_v9 = vld [vmem:[#allocation34_spill] sm:$0xff] }
 0x3a3   : > { %7924 = vst [vmem:[#allocation10_spill] sm:$0xff] %v6575_v56  ;;  %v2240_v53 = vadd.f32 %v2208_v0, %v5340_v12  ;;  %v2146_v27 = vpop.f32.mrb[80].mxu0  ;;  %v2307_v37 = vmax.f32 %v6571_v7, %v6575_v56  ;;  %v894_v56 = vpop.xlane.xlu0 %893  ;;  %v1018_v33 = vadd.f32 %v6586_v38, %v6579_v47 }
 0x3a4   : > { %v2209_v29 = vmul.f32 0.17677669, %v2146_v27  ;;  %v2148_v13 = vpop.f32.mrb[81].mxu0  ;;  %v6590_v41 = vadd.f32 %v2239_v36, %v7929_v23  ;;  %v6597_v27 = vpop.eup %4942  ;;  %v975_v8 = vmul.f32 1.442695, %v931_v22  ;;  %4954 = vpow2.f32 %v971_v34 }
 0x3a5   : > { %v2210_v4 = vmul.f32 0.17677669, %v2148_v13  ;;  %2308 = vmax.xlane.f32.xlu1 %v2307_v37  ;;  %1016 = vadd.xlane.f32.xlu0 %v1015_v51  ;;  %v6593_v0 = vadd.f32 %v2240_v53, %v7929_v23  ;;  %7931 = vst [vmem:[#allocation13_spill] sm:$0xff] %v6597_v27  ;;  %v6604_v53 = vpop.eup %4944  ;;  %v933_v51 = vsub.f32 %v6223_v10, %v894_v56  ;;  %4956 = vpow2.f32 %v973_v54 }
 0x3a6   : > { %v2241_v63 = vadd.f32 %v2209_v29, %v5338_v11  ;;  %7932 = vst [vmem:[#allocation14_spill] sm:$0xff] %v6604_v53  ;;  %v897_v29 = vpop.xlane.xlu1 %896  ;;  %v977_v47 = vmul.f32 1.442695, %v932_v19  ;;  %v934_v38 = vsub.f32 %v6226_v31, %v894_v56  ;;  %v6615_v22 = vpop.eup %4946  ;;  %v7938_v31 = vld [vmem:[#allocation37_spill] sm:$0xff]  ;;  %4958 = vpow2.f32 %v975_v8 }
 0x3a7   : > { %v2242_v36 = vadd.f32 %v2210_v4, %v5340_v12  ;;  %v2152_v7 = vpop.f32.mrb[82].mxu0  ;;  %v2310_v28 = vmax.f32 %v6590_v41, %v6593_v0  ;;  %7936 = vst [vmem:[#allocation17_spill] sm:$0xff] %v6615_v22  ;;  %v935_v54 = vsub.f32 %v6229_v42, %v897_v29 }
 0x3a8   : > { %v2211_v25 = vmul.f32 0.17677669, %v2152_v7  ;;  %v2154_v37 = vpop.f32.mrb[83].mxu0  ;;  %v6607_v1 = vadd.f32 %v2241_v63, %v7933_v9  ;;  %4960 = vpow2.f32 %v977_v47 }
 0x3a9   : > { %v2212_v4 = vmul.f32 0.17677669, %v2154_v37  ;;  %2311 = vmax.xlane.f32.xlu1 %v2310_v28  ;;  %1019 = vadd.xlane.f32.xlu0 %v1018_v33  ;;  %v6611_v13 = vadd.f32 %v2242_v36, %v7933_v9  ;;  %v1021_v28 = vadd.f32 %v6604_v53, %v6597_v27  ;;  %v6622_v33 = vpop.eup %4948  ;;  %v936_v27 = vsub.f32 %v6232_v46, %v897_v29  ;;  %v900_v53 = vpop.xlane.xlu0 %899  ;;  %v7944_v29 = vld [vmem:[#allocation35_spill] sm:$0xff] }
 0x3aa   : > { %7934 = vst [vmem:[#allocation15_spill] sm:$0xff] %v6607_v1  ;;  %v2243_v7 = vadd.f32 %v2211_v25, %v5338_v11  ;;  %7937 = vst [vmem:[#allocation77_spill] sm:$0xff] %v6622_v33  ;;  %v979_v25 = vmul.f32 1.442695, %v933_v51  ;;  %v1024_v51 = vadd.f32 %v6622_v33, %v6615_v22  ;;  %v983_v47 = vmul.f32 1.442695, %v935_v54 }
 0x3ab   : > { %7935 = vst [vmem:[#allocation16_spill] sm:$0xff] %v6611_v13  ;;  %v2244_v63 = vadd.f32 %v2212_v4, %v5340_v12  ;;  %v2158_v34 = vpop.f32.mrb[84].mxu0  ;;  %v2313_v10 = vmax.f32 %v6607_v1, %v6611_v13  ;;  %v981_v13 = vmul.f32 1.442695, %v934_v38  ;;  %v985_v22 = vmul.f32 1.442695, %v936_v27 }
 0x3ac   : > { %v2213_v19 = vmul.f32 0.17677669, %v2158_v34  ;;  %v2160_v36 = vpop.f32.mrb[85].mxu0  ;;  %v6626_v56 = vadd.f32 %v2243_v7, %v7938_v31  ;;  %v6633_v34 = vpop.eup %4950  ;;  %4962 = vpow2.f32 %v979_v25  ;;  %v7946_v33 = vld [vmem:[#allocation36_spill] sm:$0xff] }
 0x3ad   : > { %v2214_v37 = vmul.f32 0.17677669, %v2160_v36  ;;  %2314 = vmax.xlane.f32.xlu1 %v2313_v10  ;;  %1022 = vadd.xlane.f32.xlu0 %v1021_v28  ;;  %v6629_v4 = vadd.f32 %v2244_v63, %v7938_v31  ;;  %7941 = vst [vmem:[#allocation19_spill] sm:$0xff] %v6633_v34  ;;  %v6640_v63 = vpop.eup %4952  ;;  %v937_v28 = vsub.f32 %v7944_v29, %v900_v53  ;;  %4964 = vpow2.f32 %v981_v13 }
 0x3ae   : > { %7939 = vst [vmem:[#allocation2_spill] sm:$0xff] %v6626_v56  ;;  %v2245_v42 = vadd.f32 %v2213_v19, %v5338_v11  ;;  %7942 = vst [vmem:[#allocation73_spill] sm:$0xff] %v6640_v63  ;;  %v903_v19 = vpop.xlane.xlu1 %902  ;;  %v6651_v54 = vpop.eup %4954  ;;  %4966 = vpow2.f32 %v983_v47 }
 0x3af   : > { %7940 = vst [vmem:[#allocation18_spill] sm:$0xff] %v6629_v4  ;;  %v2246_v7 = vadd.f32 %v2214_v37, %v5340_v12  ;;  %v2164_v1 = vpop.f32.mrb[86].mxu0  ;;  %v2316_v8 = vmax.f32 %v6626_v56, %v6629_v4  ;;  %v938_v4 = vsub.f32 %v7946_v33, %v900_v53  ;;  %7947 = vst [vmem:[#allocation75_spill] sm:$0xff] %v6651_v54  ;;  %v987_v33 = vmul.f32 1.442695, %v937_v28 }
 0x3b0   : > { %v2215_v38 = vmul.f32 0.17677669, %v2164_v1  ;;  %v2166_v10 = vpop.f32.mrb[87].mxu0  ;;  %v6643_v46 = vadd.f32 %v2245_v42, %v7851_v55  ;;  %4968 = vpow2.f32 %v985_v22 }
 0x3b1   : > { %v2216_v36 = vmul.f32 0.17677669, %v2166_v10  ;;  %2317 = vmax.xlane.f32.xlu1 %v2316_v8  ;;  %1025 = vadd.xlane.f32.xlu0 %v1024_v51  ;;  %v6647_v37 = vadd.f32 %v2246_v7, %v7851_v55  ;;  %v1027_v8 = vadd.f32 %v6640_v63, %v6633_v34  ;;  %v6658_v51 = vpop.eup %4956  ;;  %v7949_v7 = vld [vmem:[#allocation38_spill] sm:$0xff]  ;;  %v7950_v34 = vld [vmem:[#allocation39_spill] sm:$0xff]  ;;  %4970 = vpow2.f32 %v987_v33 }
 0x3b2   : > { %7943 = vst [vmem:[#allocation74_spill] sm:$0xff] %v6643_v46  ;;  %v2247_v1 = vadd.f32 %v2215_v38, %v5338_v11  ;;  %7948 = vst [vmem:[#allocation76_spill] sm:$0xff] %v6658_v51  ;;  %v939_v13 = vsub.f32 %v7949_v7, %v903_v19  ;;  %v940_v63 = vsub.f32 %v7950_v34, %v903_v19 }
 0x3b3   : > { %7945 = vst [vmem:[#allocation20_spill] sm:$0xff] %v6647_v37  ;;  %v2248_v42 = vadd.f32 %v2216_v36, %v5340_v12  ;;  %v2170_v25 = vpop.f32.mrb[88].mxu0  ;;  %v2319_v29 = vmax.f32 %v6643_v46, %v6647_v37  ;;  %v989_v37 = vmul.f32 1.442695, %v938_v4  ;;  %v906_v46 = vpop.xlane.xlu0 %905  ;;  %v1030_v28 = vadd.f32 %v6658_v51, %v6651_v54 }
 0x3b4   : > { %v2217_v27 = vmul.f32 0.17677669, %v2170_v25  ;;  %v2172_v10 = vpop.f32.mrb[89].mxu0  ;;  %v6662_v53 = vadd.f32 %v2247_v1, %v7858_v43  ;;  %v6669_v25 = vpop.eup %4958  ;;  %v991_v22 = vmul.f32 1.442695, %v939_v13  ;;  %v941_v19 = vsub.f32 %v6263_v35, %v906_v46 }
 0x3b5   : > { %v2218_v38 = vmul.f32 0.17677669, %v2172_v10  ;;  %2320 = vmax.xlane.f32.xlu1 %v2319_v29  ;;  %1028 = vadd.xlane.f32.xlu0 %v1027_v8  ;;  %v6665_v36 = vadd.f32 %v2248_v42, %v7858_v43  ;;  %7951 = vst [vmem:[#allocation21_spill] sm:$0xff] %v6669_v25  ;;  %v6676_v42 = vpop.eup %4960  ;;  %v909_v8 = vpop.xlane.xlu1 %908  ;;  %4972 = vpow2.f32 %v989_v37  ;;  %v942_v54 = vsub.f32 %v6266_v20, %v906_v46 }
 0x3b6   : > { %v2249_v7 = vadd.f32 %v2217_v27, %v5338_v11  ;;  %7952 = vst [vmem:[#allocation23_spill] sm:$0xff] %v6676_v42  ;;  %v6687_v13 = vpop.eup %4962  ;;  %v943_v37 = vsub.f32 %v6271_v30, %v909_v8  ;;  %4974 = vpow2.f32 %v991_v22  ;;  %v995_v46 = vmul.f32 1.442695, %v941_v19 }
 0x3b7   : > { %v2250_v1 = vadd.f32 %v2218_v38, %v5340_v12  ;;  %v2176_v56 = vpop.f32.mrb[90].mxu0  ;;  %v2322_v47 = vmax.f32 %v6662_v53, %v6665_v36  ;;  %v993_v38 = vmul.f32 1.442695, %v940_v63  ;;  %7954 = vst [vmem:[#allocation24_spill] sm:$0xff] %v6687_v13  ;;  %v912_v51 = vpop.xlane.xlu0 %911 }
 0x3b8   : > { %v2219_v4 = vmul.f32 0.17677669, %v2176_v56  ;;  %v2178_v29 = vpop.f32.mrb[91].mxu0  ;;  %v6679_v34 = vadd.f32 %v2249_v7, %v7859_v16 }
 0x3b9   : > { %v2220_v27 = vmul.f32 0.17677669, %v2178_v29  ;;  %2323 = vmax.xlane.f32.xlu1 %v2322_v47  ;;  %1031 = vadd.xlane.f32.xlu0 %v1030_v28  ;;  %v6683_v10 = vadd.f32 %v2250_v1, %v7859_v16  ;;  %v1033_v47 = vadd.f32 %v6676_v42, %v6669_v25  ;;  %v6694_v28 = vpop.eup %4964  ;;  %4976 = vpow2.f32 %v993_v38  ;;  %v7956_v25 = vld [vmem:[#allocation41_spill] sm:$0xff] }
 0x3ba   : > { %v2251_v56 = vadd.f32 %v2219_v4, %v5338_v11  ;;  %7955 = vst [vmem:[#allocation26_spill] sm:$0xff] %v6694_v28  ;;  %v944_v42 = vsub.f32 %v7956_v25, %v909_v8  ;;  %v1036_v19 = vadd.f32 %v6694_v28, %v6687_v13  ;;  %v999_v38 = vmul.f32 1.442695, %v943_v37 }
 0x3bb   : > { %7953 = vst [vmem:[#allocation22_spill] sm:$0xff] %v6683_v10  ;;  %v2252_v7 = vadd.f32 %v2220_v27, %v5340_v12  ;;  %v2182_v33 = vpop.f32.mrb[92].mxu0  ;;  %v2325_v35 = vmax.f32 %v6679_v34, %v6683_v10  ;;  %v997_v27 = vmul.f32 1.442695, %v942_v54  ;;  %4978 = vpow2.f32 %v995_v46 }
 0x3bc   : > { %v2221_v63 = vmul.f32 0.17677669, %v2182_v33  ;;  %v2184_v1 = vpop.f32.mrb[93].mxu0  ;;  %v6698_v20 = vadd.f32 %v2251_v56, %v7863_v45  ;;  %v6705_v33 = vpop.eup %4966  ;;  %v945_v8 = vsub.f32 %v6285_v48, %v912_v51  ;;  %v946_v13 = vsub.f32 %v6288_v50, %v912_v51 }
 0x3bd   : > { %v2222_v4 = vmul.f32 0.17677669, %v2184_v1  ;;  %2326 = vmax.xlane.f32.xlu1 %v2325_v35  ;;  %1034 = vadd.xlane.f32.xlu0 %v1033_v47  ;;  %v6701_v29 = vadd.f32 %v2252_v7, %v7863_v45  ;;  %7957 = vst [vmem:[#allocation27_spill] sm:$0xff] %v6705_v33  ;;  %v6712_v7 = vpop.eup %4968  ;;  %v915_v47 = vpop.xlane.xlu1 %914  ;;  %4980 = vpow2.f32 %v997_v27 }
 0x3be   : > { %v2253_v30 = vadd.f32 %v2221_v63, %v5338_v11  ;;  %7958 = vst [vmem:[#allocation25_spill] sm:$0xff] %v6712_v7  ;;  %v6723_v37 = vpop.eup %4970  ;;  %4982 = vpow2.f32 %v999_v38  ;;  %v1003_v51 = vmul.f32 1.442695, %v945_v8  ;;  %v1005_v28 = vmul.f32 1.442695, %v946_v13 }
 0x3bf   : > { %v2254_v56 = vadd.f32 %v2222_v4, %v5340_v12  ;;  %v2188_v10 = vpop.f32.mrb[94].mxu0  ;;  %v2328_v22 = vmax.f32 %v6698_v20, %v6701_v29  ;;  %v1001_v4 = vmul.f32 1.442695, %v944_v42  ;;  %7961 = vst [vmem:[#allocation29_spill] sm:$0xff] %v6723_v37 }
 0x3c0   : > { %v2223_v54 = vmul.f32 0.17677669, %v2188_v10  ;;  %v2190_v35 = vpop.f32.mrb[95].mxu0  ;;  %v6715_v25 = vadd.f32 %v2253_v30, %v7864_v21 }
 0x3c1   : > { %v2224_v63 = vmul.f32 0.17677669, %v2190_v35  ;;  %2329 = vmax.xlane.f32.xlu1 %v2328_v22  ;;  %1037 = vadd.xlane.f32.xlu0 %v1036_v19  ;;  %v6719_v1 = vadd.f32 %v2254_v56, %v7864_v21  ;;  %v1039_v22 = vadd.f32 %v6712_v7, %v6705_v33  ;;  %v6730_v19 = vpop.eup %4972  ;;  %v7962_v56 = vld [vmem:[#allocation42_spill] sm:$0xff]  ;;  %4984 = vpow2.f32 %v1001_v4  ;;  %v7963_v33 = vld [vmem:[#allocation44_spill] sm:$0xff] }
 0x3c2   : > { %7959 = vst [vmem:[#allocation78_spill] sm:$0xff] %v6715_v25  ;;  %v2255_v10 = vadd.f32 %v2223_v54, %v5338_v11  ;;  %v947_v27 = vsub.f32 %v7962_v56, %v915_v47  ;;  %v948_v7 = vsub.f32 %v7963_v33, %v915_v47  ;;  %v1042_v8 = vadd.f32 %v6730_v19, %v6723_v37 }
 0x3c3   : > { %7960 = vst [vmem:[#allocation28_spill] sm:$0xff] %v6719_v1  ;;  %v2256_v30 = vadd.f32 %v2224_v63, %v5340_v12  ;;  %v2823_v46 = vpop.f32.mrb[96].mxu0  ;;  %v2331_v48 = vmax.f32 %v6715_v25, %v6719_v1  ;;  %v918_v1 = vpop.xlane.xlu0 %917  ;;  %4986 = vpow2.f32 %v1003_v51 }
 0x3c4   : > { %v2918_v42 = vmul.f32 0.17677669, %v2823_v46  ;;  %v2825_v35 = vpop.f32.mrb[97].mxu0  ;;  %v6734_v50 = vadd.f32 %v2255_v10, %v7867_v39  ;;  %v6741_v46 = vpop.eup %4974  ;;  %v1007_v4 = vmul.f32 1.442695, %v947_v27  ;;  %v949_v47 = vsub.f32 %v6303_v6, %v918_v1 }
 0x3c5   : > { %v2919_v54 = vmul.f32 0.17677669, %v2825_v35  ;;  %2332 = vmax.xlane.f32.xlu1 %v2331_v48  ;;  %1040 = vadd.xlane.f32.xlu0 %v1039_v22  ;;  %v6737_v63 = vadd.f32 %v2256_v30, %v7867_v39  ;;  %v6748_v30 = vpop.eup %4976  ;;  %4988 = vpow2.f32 %v1005_v28  ;;  %v1009_v35 = vmul.f32 1.442695, %v948_v7 }
 0x3c6   : > { %v2950_v56 = vadd.f32 %v2918_v42, %v5338_v11  ;;  %v1045_v51 = vadd.f32 %v6748_v30, %v6741_v46  ;;  %4990 = vpow2.f32 %v1007_v4 }
 0x3c7   : > { %v2951_v10 = vadd.f32 %v2919_v54, %v5340_v12  ;;  %v2829_v25 = vpop.f32.mrb[98].mxu0  ;;  %v2334_v38 = vmax.f32 %v6734_v50, %v6737_v63  ;;  %v950_v54 = vsub.f32 %v6306_v26, %v918_v1  ;;  %v1011_v26 = vmul.f32 1.442695, %v949_v47 }
 0x3c8   : > { %v2920_v13 = vmul.f32 0.17677669, %v2829_v25  ;;  %v2831_v48 = vpop.f32.mrb[99].mxu0  ;;  %v6751_v33 = vadd.f32 %v2950_v56, %v7904_v58  ;;  %v6759_v25 = vpop.eup %4978  ;;  %4992 = vpow2.f32 %v1009_v35 }
 0x3c9   : > { %v2921_v22 = vmul.f32 0.17677669, %v2831_v48  ;;  %2335 = vmax.xlane.f32.xlu1 %v2334_v38  ;;  %1043 = vadd.xlane.f32.xlu0 %v1042_v8  ;;  %v6755_v42 = vadd.f32 %v2951_v10, %v7904_v58  ;;  %7964 = vst [vmem:[#allocation30_spill] sm:$0xff] %v6759_v25  ;;  %v6766_v38 = vpop.eup %4980  ;;  %v1013_v8 = vmul.f32 1.442695, %v950_v54  ;;  %4994 = vpow2.f32 %v1011_v26 }
 0x3ca   : > { %v2952_v27 = vadd.f32 %v2920_v13, %v5338_v11  ;;  %7965 = vst [vmem:[#allocation32_spill] sm:$0xff] %v6766_v38  ;;  %v6775_v48 = vpop.eup %4982  ;;  %v1048_v4 = vadd.f32 %v6766_v38, %v6759_v25 }
 0x3cb   : > { %v2953_v56 = vadd.f32 %v2921_v22, %v5340_v12  ;;  %v2835_v37 = vpop.f32.mrb[100].mxu0  ;;  %v3014_v6 = vmax.f32 %v6751_v33, %v6755_v42  ;;  %7966 = vst [vmem:[#allocation31_spill] sm:$0xff] %v6775_v48  ;;  %v6782_v47 = vpop.eup %4984  ;;  %4996 = vpow2.f32 %v1013_v8 }
 0x3cc   : > { %v2922_v58 = vmul.f32 0.17677669, %v2835_v37  ;;  %v2837_v28 = vpop.f32.mrb[101].mxu0  ;;  %v6769_v7 = vadd.f32 %v2952_v27, %v7905_v57  ;;  %7967 = vst [vmem:[#allocation33_spill] sm:$0xff] %v6782_v47  ;;  %v1051_v26 = vadd.f32 %v6782_v47, %v6775_v48 }
 0x3cd   : > { %v2923_v1 = vmul.f32 0.17677669, %v2837_v28  ;;  %3015 = vmax.xlane.f32.xlu1 %v3014_v6  ;;  %1046 = vadd.xlane.f32.xlu0 %v1045_v51  ;;  %v6772_v10 = vadd.f32 %v2953_v56, %v7905_v57 }
 0x3ce   : > { %v2954_v13 = vadd.f32 %v2922_v58, %v5338_v11  ;;  %v6791_v58 = vpop.eup %4986 }
 0x3cf   : > { %v2955_v37 = vadd.f32 %v2923_v1, %v5340_v12  ;;  %v2841_v22 = vpop.f32.mrb[102].mxu0  ;;  %v3017_v27 = vmax.f32 %v6769_v7, %v6772_v10  ;;  %7968 = vst [vmem:[#allocation34_spill] sm:$0xff] %v6791_v58 }
 0x3d0   : > { %v2924_v6 = vmul.f32 0.17677669, %v2841_v22  ;;  %v2843_v57 = vpop.f32.mrb[103].mxu0  ;;  %v6785_v35 = vadd.f32 %v2954_v13, %v7908_v3  ;;  %v6798_v13 = vpop.eup %4988 }
 0x3d1   : > { %v2925_v54 = vmul.f32 0.17677669, %v2843_v57  ;;  %3018 = vmax.xlane.f32.xlu1 %v3017_v27  ;;  %1049 = vadd.xlane.f32.xlu0 %v1048_v4  ;;  %v6788_v56 = vadd.f32 %v2955_v37, %v7908_v3  ;;  %7969 = vst [vmem:[#allocation37_spill] sm:$0xff] %v6798_v13  ;;  %v6807_v57 = vpop.eup %4990 }
 0x3d2   : > { %v2956_v51 = vadd.f32 %v2924_v6, %v5338_v11  ;;  %7970 = vst [vmem:[#allocation35_spill] sm:$0xff] %v6807_v57  ;;  %v6814_v47 = vpop.eup %4992 }
 0x3d3   : > { %v2957_v28 = vadd.f32 %v2925_v54, %v5340_v12  ;;  %v2847_v1 = vpop.f32.mrb[104].mxu0  ;;  %v3020_v22 = vmax.f32 %v6785_v35, %v6788_v56  ;;  %7971 = vst [vmem:[#allocation36_spill] sm:$0xff] %v6814_v47 }
 0x3d4   : > { %v2926_v27 = vmul.f32 0.17677669, %v2847_v1  ;;  %v2849_v4 = vpop.f32.mrb[105].mxu0  ;;  %v6801_v3 = vadd.f32 %v2956_v51, %v7911_v49  ;;  %v1054_v51 = vadd.f32 %v6798_v13, %v6791_v58 }
 0x3d5   : > { %v2927_v8 = vmul.f32 0.17677669, %v2849_v4  ;;  %3021 = vmax.xlane.f32.xlu1 %v3020_v22  ;;  %1052 = vadd.xlane.f32.xlu0 %v1051_v26  ;;  %v6804_v37 = vadd.f32 %v2957_v28, %v7911_v49 }
 0x3d6   : > { %v2958_v6 = vadd.f32 %v2926_v27, %v5338_v11 }
 0x3d7   : > { %v2959_v54 = vadd.f32 %v2927_v8, %v5340_v12  ;;  %v2853_v48 = vpop.f32.mrb[106].mxu0  ;;  %v3023_v1 = vmax.f32 %v6801_v3, %v6804_v37  ;;  %v6823_v8 = vpop.eup %4994 }
 0x3d8   : > { %v2928_v22 = vmul.f32 0.17677669, %v2853_v48  ;;  %v2855_v26 = vpop.f32.mrb[107].mxu0  ;;  %v6817_v49 = vadd.f32 %v2958_v6, %v7913_v61  ;;  %7972 = vst [vmem:[#allocation38_spill] sm:$0xff] %v6823_v8  ;;  %v1057_v6 = vadd.f32 %v6814_v47, %v6807_v57  ;;  %v6830_v13 = vpop.eup %4996 }
 0x3d9   : > { %v2929_v28 = vmul.f32 0.17677669, %v2855_v26  ;;  %3024 = vmax.xlane.f32.xlu1 %v3023_v1  ;;  %1055 = vadd.xlane.f32.xlu0 %v1054_v51  ;;  %v6820_v27 = vadd.f32 %v2959_v54, %v7913_v61  ;;  %7973 = vst [vmem:[#allocation39_spill] sm:$0xff] %v6830_v13 }
 0x3da   : > { %v2960_v4 = vadd.f32 %v2928_v22, %v5338_v11 }
 0x3db   : > { %v2961_v25 = vadd.f32 %v2929_v28, %v5340_v12  ;;  %v2859_v58 = vpop.f32.mrb[108].mxu0  ;;  %v3026_v48 = vmax.f32 %v6817_v49, %v6820_v27 }
 0x3dc   : > { %v6833_v1 = vadd.f32 %v2960_v4, %v7917_v52  ;;  %v2930_v61 = vmul.f32 0.17677669, %v2859_v58  ;;  %v2861_v54 = vpop.f32.mrb[109].mxu0  ;;  %v1060_v4 = vadd.f32 %v6830_v13, %v6823_v8 }
 0x3dd   : > { %v6836_v51 = vadd.f32 %v2961_v25, %v7917_v52  ;;  %v2931_v22 = vmul.f32 0.17677669, %v2861_v54  ;;  %3027 = vmax.xlane.f32.xlu1 %v3026_v48  ;;  %1058 = vadd.xlane.f32.xlu0 %v1057_v6 }
 0x3de   : > { %v2962_v26 = vadd.f32 %v2930_v61, %v5338_v11 }
 0x3df   : > { %v2963_v28 = vadd.f32 %v2931_v22, %v5340_v12  ;;  %v2865_v38 = vpop.f32.mrb[110].mxu0  ;;  %v3029_v57 = vmax.f32 %v6833_v1, %v6836_v51 }
 0x3e0   : > { %v6845_v58 = vadd.f32 %v2962_v26, %v7921_v59  ;;  %v2932_v47 = vmul.f32 0.17677669, %v2865_v38  ;;  %v2867_v52 = vpop.f32.mrb[111].mxu0 }
 0x3e1   : > { %v6848_v25 = vadd.f32 %v2963_v28, %v7921_v59  ;;  %v2933_v48 = vmul.f32 0.17677669, %v2867_v52  ;;  %3030 = vmax.xlane.f32.xlu1 %v3029_v57  ;;  %1061 = vadd.xlane.f32.xlu0 %v1060_v4 }
 0x3e2   : > { %v2964_v6 = vadd.f32 %v2932_v47, %v5338_v11 }
 0x3e3   : > { %v2965_v61 = vadd.f32 %v2933_v48, %v5340_v12  ;;  %v2871_v54 = vpop.f32.mrb[112].mxu0  ;;  %v3032_v22 = vmax.f32 %v6845_v58, %v6848_v25 }
 0x3e4   : > { %v6855_v8 = vadd.f32 %v2964_v6, %v7929_v23  ;;  %v2934_v26 = vmul.f32 0.17677669, %v2871_v54  ;;  %v2873_v38 = vpop.f32.mrb[113].mxu0 }
 0x3e5   : > { %v6858_v13 = vadd.f32 %v2965_v61, %v7929_v23  ;;  %v2935_v59 = vmul.f32 0.17677669, %v2873_v38  ;;  %3033 = vmax.xlane.f32.xlu1 %v3032_v22 }
 0x3e6   : > { %v2966_v57 = vadd.f32 %v2934_v26, %v5338_v11 }
 0x3e7   : > { %7974 = vst [vmem:[#allocation41_spill] sm:$0xff] %v6858_v13  ;;  %v2967_v47 = vadd.f32 %v2935_v59, %v5340_v12  ;;  %v2877_v28 = vpop.f32.mrb[114].mxu0  ;;  %v3035_v4 = vmax.f32 %v6855_v8, %v6858_v13 }
 0x3e8   : > { %v6865_v52 = vadd.f32 %v2966_v57, %v7933_v9  ;;  %v2936_v48 = vmul.f32 0.17677669, %v2877_v28  ;;  %v2879_v6 = vpop.f32.mrb[115].mxu0 }
 0x3e9   : > { %v6868_v54 = vadd.f32 %v2967_v47, %v7933_v9  ;;  %v2937_v23 = vmul.f32 0.17677669, %v2879_v6  ;;  %3036 = vmax.xlane.f32.xlu1 %v3035_v4 }
 0x3ea   : > { %v2968_v61 = vadd.f32 %v2936_v48, %v5338_v11 }
 0x3eb   : > { %7975 = vst [vmem:[#allocation42_spill] sm:$0xff] %v6868_v54  ;;  %v2969_v22 = vadd.f32 %v2937_v23, %v5340_v12  ;;  %v2883_v26 = vpop.f32.mrb[116].mxu0  ;;  %v3038_v38 = vmax.f32 %v6865_v52, %v6868_v54 }
 0x3ec   : > { %v6875_v59 = vadd.f32 %v2968_v61, %v7938_v31  ;;  %v2938_v57 = vmul.f32 0.17677669, %v2883_v26  ;;  %v2885_v13 = vpop.f32.mrb[117].mxu0 }
 0x3ed   : > { %v6878_v28 = vadd.f32 %v2969_v22, %v7938_v31  ;;  %v2939_v9 = vmul.f32 0.17677669, %v2885_v13  ;;  %3039 = vmax.xlane.f32.xlu1 %v3038_v38 }
 0x3ee   : > { %v2970_v47 = vadd.f32 %v2938_v57, %v5338_v11 }
 0x3ef   : > { %7976 = vst [vmem:[#allocation44_spill] sm:$0xff] %v6878_v28  ;;  %v2971_v4 = vadd.f32 %v2939_v9, %v5340_v12  ;;  %v2889_v48 = vpop.f32.mrb[118].mxu0  ;;  %v3041_v6 = vmax.f32 %v6875_v59, %v6878_v28 }
 0x3f0   : > { %v6885_v23 = vadd.f32 %v2970_v47, %v7851_v55  ;;  %v2940_v61 = vmul.f32 0.17677669, %v2889_v48  ;;  %v2891_v54 = vpop.f32.mrb[119].mxu0 }
 0x3f1   : > { %v6888_v26 = vadd.f32 %v2971_v4, %v7851_v55  ;;  %v2941_v31 = vmul.f32 0.17677669, %v2891_v54  ;;  %3042 = vmax.xlane.f32.xlu1 %v3041_v6 }
 0x3f2   : > { %v2972_v13 = vadd.f32 %v2940_v61, %v5338_v11 }
 0x3f3   : > { %7977 = vst [vmem:[#allocation79_spill] sm:$0xff] %v6888_v26  ;;  %v2973_v22 = vadd.f32 %v2941_v31, %v5340_v12  ;;  %v2895_v38 = vpop.f32.mrb[120].mxu0  ;;  %v3044_v57 = vmax.f32 %v6885_v23, %v6888_v26 }
 0x3f4   : > { %v6895_v9 = vadd.f32 %v2972_v13, %v7858_v43  ;;  %v2942_v47 = vmul.f32 0.17677669, %v2895_v38  ;;  %v2897_v28 = vpop.f32.mrb[121].mxu0 }
 0x3f5   : > { %v6898_v48 = vadd.f32 %v2973_v22, %v7858_v43  ;;  %v2943_v55 = vmul.f32 0.17677669, %v2897_v28  ;;  %3045 = vmax.xlane.f32.xlu1 %v3044_v57 }
 0x3f6   : > { %v2974_v54 = vadd.f32 %v2942_v47, %v5338_v11 }
 0x3f7   : > { %7978 = vst [vmem:[#allocation80_spill] sm:$0xff] %v6898_v48  ;;  %v2975_v4 = vadd.f32 %v2943_v55, %v5340_v12  ;;  %v2901_v6 = vpop.f32.mrb[122].mxu0  ;;  %v3047_v61 = vmax.f32 %v6895_v9, %v6898_v48 }
 0x3f8   : > { %v6905_v31 = vadd.f32 %v2974_v54, %v7859_v16  ;;  %v2944_v13 = vmul.f32 0.17677669, %v2901_v6  ;;  %v2903_v26 = vpop.f32.mrb[123].mxu0 }
 0x3f9   : > { %v6908_v38 = vadd.f32 %v2975_v4, %v7859_v16  ;;  %v2945_v43 = vmul.f32 0.17677669, %v2903_v26  ;;  %3048 = vmax.xlane.f32.xlu1 %v3047_v61 }
 0x3fa   : > { %v2976_v28 = vadd.f32 %v2944_v13, %v5338_v11 }
 0x3fb   : > { %7979 = vst [vmem:[#allocation81_spill] sm:$0xff] %v6908_v38  ;;  %v2977_v22 = vadd.f32 %v2945_v43, %v5340_v12  ;;  %v2907_v57 = vpop.f32.mrb[124].mxu0  ;;  %v3050_v47 = vmax.f32 %v6905_v31, %v6908_v38 }
 0x3fc   : > { %v6915_v55 = vadd.f32 %v2976_v28, %v7863_v45  ;;  %v2946_v54 = vmul.f32 0.17677669, %v2907_v57  ;;  %v2909_v48 = vpop.f32.mrb[125].mxu0 }
 0x3fd   : > { %v6918_v6 = vadd.f32 %v2977_v22, %v7863_v45  ;;  %v2947_v16 = vmul.f32 0.17677669, %v2909_v48  ;;  %3051 = vmax.xlane.f32.xlu1 %v3050_v47 }
 0x3fe   : > { %v2978_v26 = vadd.f32 %v2946_v54, %v5338_v11 }
 0x3ff   : > { %v2979_v4 = vadd.f32 %v2947_v16, %v5340_v12  ;;  %v2913_v61 = vpop.f32.mrb[126].mxu0  ;;  %v3053_v13 = vmax.f32 %v6915_v55, %v6918_v6 }
 0x400   : > { %v6925_v43 = vadd.f32 %v2978_v26, %v7864_v21  ;;  %v2948_v28 = vmul.f32 0.17677669, %v2913_v61  ;;  %v2915_v38 = vpop.f32.mrb[127].mxu0 }
 0x401   : > { %v6928_v57 = vadd.f32 %v2979_v4, %v7864_v21  ;;  %v2949_v45 = vmul.f32 0.17677669, %v2915_v38  ;;  %3054 = vmax.xlane.f32.xlu1 %v3053_v13 }
 0x402   : > { %v2980_v48 = vadd.f32 %v2948_v28, %v5338_v11 }
 0x403   : > { %v2981_v22 = vadd.f32 %v2949_v45, %v5340_v12  ;;  %v3056_v47 = vmax.f32 %v6925_v43, %v6928_v57 }
 0x404   : > { %v6935_v54 = vadd.f32 %v2980_v48, %v7867_v39 }
 0x405   : > { %v6938_v16 = vadd.f32 %v2981_v22, %v7867_v39  ;;  %3057 = vmax.xlane.f32.xlu1 %v3056_v47 }
 0x407   : > { %v3059_v21 = vmax.f32 %v6935_v54, %v6938_v16 }
 0x409   : > { %3060 = vmax.xlane.f32.xlu1 %v3059_v21 }
 0x41a   : > { %v2291_v38 = vpop.xlane.xlu1 %2290 }
 0x41b   : > { %v2337_v26 = vsub.f32 %v6497_v2, %v2291_v38  ;;  %v2338_v11 = vsub.f32 %v6500_v40, %v2291_v38 }
 0x41d   : > { %v2369_v12 = vmul.f32 1.442695, %v2337_v26  ;;  %v2371_v4 = vmul.f32 1.442695, %v2338_v11 }
 0x41e   : > { %v2294_v61 = vpop.xlane.xlu0 %2293 }
 0x41f   : > { %4998 = vpow2.f32 %v2369_v12  ;;  %v2339_v13 = vsub.f32 %v6507_v24, %v2294_v61  ;;  %v2340_v28 = vsub.f32 %v6511_v44, %v2294_v61 }
 0x420   : > { %5000 = vpow2.f32 %v2371_v4 }
 0x421   : > { %v2373_v39 = vmul.f32 1.442695, %v2339_v13  ;;  %v2375_v45 = vmul.f32 1.442695, %v2340_v28 }
 0x422   : > { %v2297_v48 = vpop.xlane.xlu1 %2296 }
 0x423   : > { %5002 = vpow2.f32 %v2373_v39  ;;  %v2341_v22 = vsub.f32 %v6519_v5, %v2297_v48  ;;  %v2342_v47 = vsub.f32 %v6523_v17, %v2297_v48 }
 0x424   : > { %5004 = vpow2.f32 %v2375_v45 }
 0x425   : > { %v2377_v2 = vmul.f32 1.442695, %v2341_v22  ;;  %v2379_v40 = vmul.f32 1.442695, %v2342_v47 }
 0x426   : > { %v2300_v21 = vpop.xlane.xlu0 %2299 }
 0x427   : > { %5006 = vpow2.f32 %v2377_v2  ;;  %v2343_v38 = vsub.f32 %v6532_v62, %v2300_v21  ;;  %v2344_v24 = vsub.f32 %v6535_v14, %v2300_v21 }
 0x428   : > { %5008 = vpow2.f32 %v2379_v40 }
 0x429   : > { %v6950_v44 = vpop.eup %4998  ;;  %v2381_v26 = vmul.f32 1.442695, %v2343_v38  ;;  %v2383_v11 = vmul.f32 1.442695, %v2344_v24  ;;  %v7980_v38 = vld [vmem:[#allocation9_spill] sm:$0xff] }
 0x42a   : > { %v6952_v12 = vpop.eup %5000  ;;  %v2303_v4 = vpop.xlane.xlu1 %2302 }
 0x42b   : > { %5010 = vpow2.f32 %v2381_v26  ;;  %v2345_v5 = vsub.f32 %v6543_v60, %v2303_v4  ;;  %v2346_v17 = vsub.f32 %v6547_v32, %v2303_v4  ;;  %v2433_v61 = vadd.f32 %v6952_v12, %v6950_v44  ;;  %v7981_v26 = vld [vmem:[#allocation10_spill] sm:$0xff] }
 0x42c   : > { %5012 = vpow2.f32 %v2383_v11 }
 0x42d   : > { %v6958_v62 = vpop.eup %5002  ;;  %v2385_v14 = vmul.f32 1.442695, %v2345_v5  ;;  %v2387_v13 = vmul.f32 1.442695, %v2346_v17  ;;  %2434 = vadd.xlane.f32.xlu0 %v2433_v61 }
 0x42e   : > { %v6960_v28 = vpop.eup %5004  ;;  %v2306_v39 = vpop.xlane.xlu0 %2305 }
 0x42f   : > { %5014 = vpow2.f32 %v2385_v14  ;;  %v2347_v45 = vsub.f32 %v6556_v18, %v2306_v39  ;;  %v2348_v48 = vsub.f32 %v6559_v15, %v2306_v39  ;;  %v2436_v60 = vadd.f32 %v6960_v28, %v6958_v62 }
 0x430   : > { %5016 = vpow2.f32 %v2387_v13 }
 0x431   : > { %v6966_v32 = vpop.eup %5006  ;;  %v2389_v22 = vmul.f32 1.442695, %v2347_v45  ;;  %v2391_v47 = vmul.f32 1.442695, %v2348_v48  ;;  %2437 = vadd.xlane.f32.xlu0 %v2436_v60 }
 0x432   : > { %v6968_v2 = vpop.eup %5008  ;;  %v2309_v40 = vpop.xlane.xlu1 %2308 }
 0x433   : > { %v1017_v21 = vpop.xlane.xlu0 %1016  ;;  %5018 = vpow2.f32 %v2389_v22  ;;  %v2349_v24 = vsub.f32 %v7980_v38, %v2309_v40  ;;  %v2350_v18 = vsub.f32 %v7981_v26, %v2309_v40  ;;  %v2439_v15 = vadd.f32 %v6968_v2, %v6966_v32  ;;  %v7985_v38 = vld [vmem:[#allocation15_spill] sm:$0xff] }
 0x434   : > { %5020 = vpow2.f32 %v2391_v47 }
 0x435   : > { %v6974_v11 = vpop.eup %5010  ;;  %v2393_v4 = vmul.f32 1.442695, %v2349_v24  ;;  %v2395_v5 = vmul.f32 1.442695, %v2350_v18  ;;  %5022 = vrcp.f32 %v1017_v21  ;;  %2440 = vadd.xlane.f32.xlu0 %v2439_v15 }
 0x436   : > { %7982 = vst [vmem:[#allocation9_spill] sm:$0xff] %v6974_v11  ;;  %v6976_v17 = vpop.eup %5012  ;;  %v2312_v61 = vpop.xlane.xlu1 %2311 }
 0x437   : > { %v1020_v14 = vpop.xlane.xlu0 %1019  ;;  %5024 = vpow2.f32 %v2393_v4  ;;  %v2351_v13 = vsub.f32 %v6590_v41, %v2312_v61  ;;  %v2352_v39 = vsub.f32 %v6593_v0, %v2312_v61  ;;  %v2442_v45 = vadd.f32 %v6976_v17, %v6974_v11  ;;  %v7986_v41 = vld [vmem:[#allocation16_spill] sm:$0xff]  ;;  %v8013_v11 = vld [vmem:[#allocation61_spill] sm:$0xff] }
 0x438   : > { %5026 = vpow2.f32 %v2395_v5 }
 0x439   : > { %v6982_v48 = vpop.eup %5014  ;;  %v2397_v60 = vmul.f32 1.442695, %v2351_v13  ;;  %v2399_v22 = vmul.f32 1.442695, %v2352_v39  ;;  %5028 = vrcp.f32 %v1020_v14  ;;  %2443 = vadd.xlane.f32.xlu0 %v2442_v45  ;;  %v7989_v39 = vld [vmem:[#allocation2_spill] sm:$0xff] }
 0x43a   : > { %7983 = vst [vmem:[#allocation10_spill] sm:$0xff] %v6982_v48  ;;  %v6984_v47 = vpop.eup %5016  ;;  %v2315_v40 = vpop.xlane.xlu1 %2314 }
 0x43b   : > { %7984 = vst [vmem:[#allocation82_spill] sm:$0xff] %v6984_v47  ;;  %v1023_v21 = vpop.xlane.xlu0 %1022  ;;  %5030 = vpow2.f32 %v2397_v60  ;;  %v2353_v24 = vsub.f32 %v7985_v38, %v2315_v40  ;;  %v2354_v26 = vsub.f32 %v7986_v41, %v2315_v40  ;;  %v2445_v0 = vadd.f32 %v6984_v47, %v6982_v48  ;;  %v7990_v60 = vld [vmem:[#allocation18_spill] sm:$0xff] }
 0x43c   : > { %5032 = vpow2.f32 %v2399_v22  ;;  %v7991_v22 = vld [vmem:[#allocation7_spill] sm:$0xff] }
 0x43d   : > { %v6990_v18 = vpop.eup %5018  ;;  %v2401_v15 = vmul.f32 1.442695, %v2353_v24  ;;  %v2403_v4 = vmul.f32 1.442695, %v2354_v26  ;;  %5034 = vrcp.f32 %v1023_v21  ;;  %2446 = vadd.xlane.f32.xlu0 %v2445_v0  ;;  %v7992_v24 = vld [vmem:[#allocation8_spill] sm:$0xff] }
 0x43e   : > { %7987 = vst [vmem:[#allocation15_spill] sm:$0xff] %v6990_v18  ;;  %v6992_v5 = vpop.eup %5020  ;;  %v2318_v61 = vpop.xlane.xlu1 %2317 }
 0x43f   : > { %7988 = vst [vmem:[#allocation16_spill] sm:$0xff] %v6992_v5  ;;  %v1026_v14 = vpop.xlane.xlu0 %1025  ;;  %v5023_v13 = vpop.eup %5022  ;;  %5036 = vpow2.f32 %v2401_v15  ;;  %v2355_v45 = vsub.f32 %v7989_v39, %v2318_v61  ;;  %v2356_v40 = vsub.f32 %v7990_v60, %v2318_v61  ;;  %v2448_v38 = vadd.f32 %v6992_v5, %v6990_v18  ;;  %v7995_v60 = vld [vmem:[#allocation74_spill] sm:$0xff] }
 0x440   : > { %v1079_v41 = vmul.f32 %v5023_v13, %v7991_v22  ;;  %5038 = vpow2.f32 %v2403_v4  ;;  %v1080_v26 = vmul.f32 %v5023_v13, %v7992_v24  ;;  %v7996_v22 = vld [vmem:[#allocation20_spill] sm:$0xff]  ;;  %v7999_v24 = vld [vmem:[#allocation57_spill] sm:$0xff] }
 0x441   : > { %v7000_v21 = vpop.eup %5024  ;;  %v2405_v0 = vmul.f32 1.442695, %v2355_v45  ;;  %v2407_v48 = vmul.f32 1.442695, %v2356_v40  ;;  %5040 = vrcp.f32 %v1026_v14  ;;  %2449 = vadd.xlane.f32.xlu0 %v2448_v38  ;;  %v7997_v45 = vld [vmem:[#allocation12_spill] sm:$0xff]  ;;  %v7998_v14 = vld [vmem:[#allocation11_spill] sm:$0xff] }
 0x442   : > { %7993 = vst [vmem:[#allocation2_spill] sm:$0xff] %v7000_v21  ;;  %v7002_v47 = vpop.eup %5026  ;;  %1884 = vmatprep.mubr.f32.mxu1 %v1080_v26  ;;  %v2321_v15 = vpop.xlane.xlu1 %2320 }
 0x443   : > { %7994 = vst [vmem:[#allocation18_spill] sm:$0xff] %v7002_v47  ;;  %v1029_v39 = vpop.xlane.xlu0 %1028  ;;  %v5029_v61 = vpop.eup %5028  ;;  %5042 = vpow2.f32 %v2405_v0  ;;  %1885 = vmatmul.mubr.f32.vlgmr.msra.gmra.mrb[32].mxu1 %v1079_v41  ;;  %v2357_v18 = vsub.f32 %v7995_v60, %v2321_v15  ;;  %v2358_v4 = vsub.f32 %v7996_v22, %v2321_v15  ;;  %v2451_v13 = vadd.f32 %v7002_v47, %v7000_v21  ;;  %v8002_v60 = vld [vmem:[#allocation58_spill] sm:$0xff]  ;;  %v8006_v47 = vld [vmem:[#allocation59_spill] sm:$0xff] }
 0x444   : > { %5044 = vpow2.f32 %v2407_v48  ;;  %v1082_v40 = vmul.f32 %v5029_v61, %v7997_v45  ;;  %v1081_v38 = vmul.f32 %v5029_v61, %v7998_v14  ;;  %4672 = vmatpush3.bf16.msk.msra.mxu1 %vm6052_vm9, %v7999_v24 }
 0x445   : > { %v7013_v26 = vpop.eup %5030  ;;  %v2409_v0 = vmul.f32 1.442695, %v2357_v18  ;;  %v2411_v41 = vmul.f32 1.442695, %v2358_v4  ;;  %5046 = vrcp.f32 %v1029_v39  ;;  %2452 = vadd.xlane.f32.xlu0 %v2451_v13  ;;  %4675 = vmatprep.subr.msk.bf16.mxu1 %vm6052_vm9, %v8002_v60  ;;  %v8004_v39 = vld [vmem:[#allocation14_spill] sm:$0xff]  ;;  %v8005_v13 = vld [vmem:[#allocation13_spill] sm:$0xff] }
 0x446   : > { %8001 = vst [vmem:[#allocation7_spill] sm:$0xff] %v7013_v26  ;;  %v7018_v15 = vpop.eup %5032  ;;  %1889 = vmatprep.mubr.f32.mxu1 %v1082_v40  ;;  %v2324_v48 = vpop.xlane.xlu1 %2323 }
 0x447   : > { %8003 = vst [vmem:[#allocation8_spill] sm:$0xff] %v7018_v15  ;;  %v1032_v22 = vpop.xlane.xlu0 %1031  ;;  %v5035_v61 = vpop.eup %5034  ;;  %5048 = vpow2.f32 %v2409_v0  ;;  %1890 = vmatmul.mubr.f32.gmra.mrb[34].mxu1 %v1081_v38  ;;  %v2359_v45 = vsub.f32 %v6662_v53, %v2324_v48  ;;  %v2360_v14 = vsub.f32 %v6665_v36, %v2324_v48  ;;  %v2454_v18 = vadd.f32 %v7018_v15, %v7013_v26  ;;  %v8008_v53 = vld [vmem:[#allocation60_spill] sm:$0xff] }
 0x448   : > { %5050 = vpow2.f32 %v2411_v41  ;;  %v1084_v4 = vmul.f32 %v5035_v61, %v8004_v39  ;;  %v1083_v21 = vmul.f32 %v5035_v61, %v8005_v13  ;;  %4678 = vmatpush3.bf16.msk.msra.mxu1 %vm6052_vm9, %v8006_v47  ;;  %v8010_v13 = vld [vmem:[#allocation22_spill] sm:$0xff] }
 0x449   : > { %v7029_v40 = vpop.eup %5036  ;;  %v2413_v0 = vmul.f32 1.442695, %v2359_v45  ;;  %v2415_v38 = vmul.f32 1.442695, %v2360_v14  ;;  %5052 = vrcp.f32 %v1032_v22  ;;  %2455 = vadd.xlane.f32.xlu0 %v2454_v18  ;;  %4681 = vmatprep.subr.msk.bf16.mxu1 %vm6052_vm9, %v8008_v53  ;;  %v8011_v45 = vld [vmem:[#allocation77_spill] sm:$0xff] }
 0x44a   : > { %8007 = vst [vmem:[#allocation74_spill] sm:$0xff] %v7029_v40  ;;  %v7034_v36 = vpop.eup %5038  ;;  %1894 = vmatprep.mubr.f32.mxu1 %v1084_v4  ;;  %v2327_v41 = vpop.xlane.xlu1 %2326  ;;  %v8012_v18 = vld [vmem:[#allocation17_spill] sm:$0xff] }
 0x44b   : > { %8009 = vst [vmem:[#allocation20_spill] sm:$0xff] %v7034_v36  ;;  %v1035_v48 = vpop.xlane.xlu0 %1034  ;;  %v5041_v61 = vpop.eup %5040  ;;  %5054 = vpow2.f32 %v2413_v0  ;;  %1895 = vmatmul.mubr.f32.gmra.mrb[36].mxu1 %v1083_v21  ;;  %v2361_v39 = vsub.f32 %v6679_v34, %v2327_v41  ;;  %v2362_v26 = vsub.f32 %v8010_v13, %v2327_v41  ;;  %v2457_v22 = vadd.f32 %v7034_v36, %v7029_v40  ;;  %v8015_v34 = vld [vmem:[#allocation62_spill] sm:$0xff]  ;;  %v8019_v36 = vld [vmem:[#allocation63_spill] sm:$0xff] }
 0x44c   : > { %5056 = vpow2.f32 %v2415_v38  ;;  %v1086_v14 = vmul.f32 %v5041_v61, %v8011_v45  ;;  %v1085_v15 = vmul.f32 %v5041_v61, %v8012_v18  ;;  %4684 = vmatpush3.bf16.msk.msra.mxu1 %vm6052_vm9, %v8013_v11 }
 0x44d   : > { %v7045_v4 = vpop.eup %5042  ;;  %v2417_v0 = vmul.f32 1.442695, %v2361_v39  ;;  %v2419_v21 = vmul.f32 1.442695, %v2362_v26  ;;  %5058 = vrcp.f32 %v1035_v48  ;;  %2458 = vadd.xlane.f32.xlu0 %v2457_v22  ;;  %4687 = vmatprep.subr.msk.bf16.mxu1 %vm6052_vm9, %v8015_v34  ;;  %v8017_v48 = vld [vmem:[#allocation73_spill] sm:$0xff]  ;;  %v8018_v22 = vld [vmem:[#allocation19_spill] sm:$0xff] }
 0x44e   : > { %8014 = vst [vmem:[#allocation12_spill] sm:$0xff] %v7045_v4  ;;  %v7050_v41 = vpop.eup %5044  ;;  %1899 = vmatprep.mubr.f32.mxu1 %v1086_v14  ;;  %v2330_v38 = vpop.xlane.xlu1 %2329 }
 0x44f   : > { %8016 = vst [vmem:[#allocation11_spill] sm:$0xff] %v7050_v41  ;;  %v1038_v13 = vpop.xlane.xlu0 %1037  ;;  %v5047_v61 = vpop.eup %5046  ;;  %5060 = vpow2.f32 %v2417_v0  ;;  %1900 = vmatmul.mubr.f32.gmra.mrb[38].mxu1 %v1085_v15  ;;  %v2363_v45 = vsub.f32 %v6698_v20, %v2330_v38  ;;  %v2364_v18 = vsub.f32 %v6701_v29, %v2330_v38  ;;  %v2460_v26 = vadd.f32 %v7050_v41, %v7045_v4  ;;  %v8021_v20 = vld [vmem:[#allocation64_spill] sm:$0xff] }
 0x450   : > { %5062 = vpow2.f32 %v2419_v21  ;;  %v1088_v39 = vmul.f32 %v5047_v61, %v8017_v48  ;;  %v1087_v40 = vmul.f32 %v5047_v61, %v8018_v22  ;;  %4690 = vmatpush3.bf16.msk.msra.mxu1 %vm6052_vm9, %v8019_v36  ;;  %v8023_v48 = vld [vmem:[#allocation78_spill] sm:$0xff]  ;;  %v8024_v4 = vld [vmem:[#allocation28_spill] sm:$0xff]  ;;  %v8027_v36 = vld [vmem:[#allocation65_spill] sm:$0xff] }
 0x451   : > { %v7061_v14 = vpop.eup %5048  ;;  %v2421_v0 = vmul.f32 1.442695, %v2363_v45  ;;  %v2423_v15 = vmul.f32 1.442695, %v2364_v18  ;;  %5064 = vrcp.f32 %v1038_v13  ;;  %2461 = vadd.xlane.f32.xlu0 %v2460_v26  ;;  %4693 = vmatprep.subr.msk.bf16.mxu1 %vm6052_vm9, %v8021_v20  ;;  %v8025_v45 = vld [vmem:[#allocation76_spill] sm:$0xff]  ;;  %v8026_v26 = vld [vmem:[#allocation75_spill] sm:$0xff] }
 0x452   : > { %8020 = vst [vmem:[#allocation57_spill] sm:$0xff] %v7061_v14  ;;  %v7066_v29 = vpop.eup %5050  ;;  %1904 = vmatprep.mubr.f32.mxu1 %v1088_v39  ;;  %v2333_v21 = vpop.xlane.xlu1 %2332 }
 0x453   : > { %8022 = vst [vmem:[#allocation72_spill] sm:$0xff] %v7066_v29  ;;  %v1041_v38 = vpop.xlane.xlu0 %1040  ;;  %v5053_v61 = vpop.eup %5052  ;;  %5066 = vpow2.f32 %v2421_v0  ;;  %1905 = vmatmul.mubr.f32.gmra.mrb[40].mxu1 %v1087_v40  ;;  %v2365_v22 = vsub.f32 %v8023_v48, %v2333_v21  ;;  %v2366_v41 = vsub.f32 %v8024_v4, %v2333_v21  ;;  %v2463_v13 = vadd.f32 %v7066_v29, %v7061_v14  ;;  %v8029_v48 = vld [vmem:[#allocation66_spill] sm:$0xff]  ;;  %v8033_v29 = vld [vmem:[#allocation67_spill] sm:$0xff] }
 0x454   : > { %5068 = vpow2.f32 %v2423_v15  ;;  %v1090_v18 = vmul.f32 %v5053_v61, %v8025_v45  ;;  %v1089_v20 = vmul.f32 %v5053_v61, %v8026_v26  ;;  %4696 = vmatpush3.bf16.msk.msra.mxu1 %vm6052_vm9, %v8027_v36 }
 0x455   : > { %v7077_v39 = vpop.eup %5054  ;;  %v2425_v0 = vmul.f32 1.442695, %v2365_v22  ;;  %v2427_v40 = vmul.f32 1.442695, %v2366_v41  ;;  %5070 = vrcp.f32 %v1041_v38  ;;  %2464 = vadd.xlane.f32.xlu1 %v2463_v13  ;;  %4699 = vmatprep.subr.msk.bf16.mxu1 %vm6052_vm9, %v8029_v48  ;;  %v8031_v38 = vld [vmem:[#allocation23_spill] sm:$0xff]  ;;  %v8032_v13 = vld [vmem:[#allocation21_spill] sm:$0xff] }
 0x456   : > { %8028 = vst [vmem:[#allocation58_spill] sm:$0xff] %v7077_v39  ;;  %v7082_v4 = vpop.eup %5056  ;;  %1909 = vmatprep.mubr.f32.mxu1 %v1090_v18  ;;  %v2336_v15 = vpop.xlane.xlu1 %2335 }
 0x457   : > { %8030 = vst [vmem:[#allocation14_spill] sm:$0xff] %v7082_v4  ;;  %v1044_v21 = vpop.xlane.xlu0 %1043  ;;  %v5059_v61 = vpop.eup %5058  ;;  %5072 = vpow2.f32 %v2425_v0  ;;  %1910 = vmatmul.mubr.f32.gmra.mrb[42].mxu1 %v1089_v20  ;;  %v2367_v45 = vsub.f32 %v6734_v50, %v2336_v15  ;;  %v2368_v26 = vsub.f32 %v6737_v63, %v2336_v15  ;;  %v2466_v41 = vadd.f32 %v7082_v4, %v7077_v39  ;;  %v8035_v50 = vld [vmem:[#allocation68_spill] sm:$0xff]  ;;  %v8039_v4 = vld [vmem:[#allocation69_spill] sm:$0xff] }
 0x458   : > { %5074 = vpow2.f32 %v2427_v40  ;;  %v1092_v22 = vmul.f32 %v5059_v61, %v8031_v38  ;;  %v1091_v14 = vmul.f32 %v5059_v61, %v8032_v13  ;;  %4702 = vmatpush3.bf16.msk.msra.mxu1 %vm6052_vm9, %v8033_v29 }
 0x459   : > { %v7093_v18 = vpop.eup %5060  ;;  %v2429_v0 = vmul.f32 1.442695, %v2367_v45  ;;  %v2431_v20 = vmul.f32 1.442695, %v2368_v26  ;;  %5076 = vrcp.f32 %v1044_v21  ;;  %2467 = vadd.xlane.f32.xlu0 %v2466_v41  ;;  %4705 = vmatprep.subr.msk.bf16.mxu1 %vm6052_vm9, %v8035_v50  ;;  %v8037_v45 = vld [vmem:[#allocation26_spill] sm:$0xff]  ;;  %v8038_v41 = vld [vmem:[#allocation24_spill] sm:$0xff] }
 0x45a   : > { %8034 = vst [vmem:[#allocation13_spill] sm:$0xff] %v7093_v18  ;;  %v7098_v63 = vpop.eup %5062  ;;  %1914 = vmatprep.mubr.f32.mxu1 %v1092_v22  ;;  %v3016_v40 = vpop.xlane.xlu1 %3015 }
 0x45b   : > { %8036 = vst [vmem:[#allocation59_spill] sm:$0xff] %v7098_v63  ;;  %v1047_v15 = vpop.xlane.xlu0 %1046  ;;  %v5065_v61 = vpop.eup %5064  ;;  %5078 = vpow2.f32 %v2429_v0  ;;  %1915 = vmatmul.mubr.f32.gmra.mrb[44].mxu1 %v1091_v14  ;;  %v3062_v38 = vsub.f32 %v6751_v33, %v3016_v40  ;;  %v3063_v13 = vsub.f32 %v6755_v42, %v3016_v40  ;;  %v2469_v21 = vadd.f32 %v7098_v63, %v7093_v18  ;;  %v8041_v33 = vld [vmem:[#allocation70_spill] sm:$0xff]  ;;  %v8044_v63 = vld [vmem:[#allocation71_spill] sm:$0xff] }
 0x45c   : > { %5080 = vpow2.f32 %v2431_v20  ;;  %v1094_v26 = vmul.f32 %v5065_v61, %v8037_v45  ;;  %v1093_v39 = vmul.f32 %v5065_v61, %v8038_v41  ;;  %4708 = vmatpush3.bf16.msk.msra.mxu1 %vm6052_vm9, %v8039_v4 }
 0x45d   : > { %v7109_v22 = vpop.eup %5066  ;;  %v3094_v0 = vmul.f32 1.442695, %v3062_v38  ;;  %v3096_v14 = vmul.f32 1.442695, %v3063_v13  ;;  %5082 = vrcp.f32 %v1047_v15  ;;  %2470 = vadd.xlane.f32.xlu1 %v2469_v21  ;;  %4711 = vmatprep.subr.msk.bf16.mxu1 %vm6052_vm9, %v8041_v33  ;;  %v8042_v38 = vld [vmem:[#allocation25_spill] sm:$0xff]  ;;  %v8043_v21 = vld [vmem:[#allocation27_spill] sm:$0xff] }
 0x45e   : > { %8040 = vst [vmem:[#allocation60_spill] sm:$0xff] %v7109_v22  ;;  %v7114_v42 = vpop.eup %5068  ;;  %1919 = vmatprep.mubr.f32.mxu1 %v1094_v26  ;;  %v3019_v20 = vpop.xlane.xlu1 %3018 }
 0x45f   : > { %v1050_v40 = vpop.xlane.xlu0 %1049  ;;  %v5071_v61 = vpop.eup %5070  ;;  %5084 = vpow2.f32 %v3094_v0  ;;  %1920 = vmatmul.mubr.f32.gmra.mrb[46].mxu1 %v1093_v39  ;;  %v3064_v45 = vsub.f32 %v6769_v7, %v3019_v20  ;;  %v3065_v41 = vsub.f32 %v6772_v10, %v3019_v20  ;;  %v2472_v15 = vadd.f32 %v7114_v42, %v7109_v22  ;;  %v8045_v7 = vld [vmem:[#allocation56_spill] sm:$0xff] }
 0x460   : > { %5086 = vpow2.f32 %v3096_v14  ;;  %v1096_v13 = vmul.f32 %v5071_v61, %v8042_v38  ;;  %v1095_v18 = vmul.f32 %v5071_v61, %v8043_v21  ;;  %4714 = vmatpush3.bf16.msk.msra.mxu1 %vm6052_vm9, %v8044_v63 }
 0x461   : > { %v7125_v26 = vpop.eup %5072  ;;  %v3098_v0 = vmul.f32 1.442695, %v3064_v45  ;;  %v3100_v39 = vmul.f32 1.442695, %v3065_v41  ;;  %5088 = vrcp.f32 %v1050_v40  ;;  %2473 = vadd.xlane.f32.xlu0 %v2472_v15  ;;  %4765 = vmatprep.subr.msk.bf16.mxu1 %vm6383_vm11, %v8045_v7  ;;  %v8047_v41 = vld [vmem:[#allocation29_spill] sm:$0xff] }
 0x462   : > { %v7130_v20 = vpop.eup %5074  ;;  %1924 = vmatprep.mubr.f32.mxu1 %v1096_v13  ;;  %v3022_v14 = vpop.xlane.xlu1 %3021 }
 0x463   : > { %v1053_v38 = vpop.xlane.xlu0 %1052  ;;  %v5077_v61 = vpop.eup %5076  ;;  %5090 = vpow2.f32 %v3098_v0  ;;  %1925 = vmatmul.mubr.f32.gmra.mrb[48].mxu1 %v1095_v18  ;;  %v3066_v5 = vsub.f32 %v6785_v35, %v3022_v14  ;;  %v3067_v21 = vsub.f32 %v6788_v56, %v3022_v14  ;;  %v2475_v40 = vadd.f32 %v7130_v20, %v7125_v26 }
 0x464   : > { %5092 = vpow2.f32 %v3100_v39  ;;  %v1098_v45 = vmul.f32 %v5077_v61, %v6730_v19  ;;  %v1097_v15 = vmul.f32 %v5077_v61, %v8047_v41 }
 0x465   : > { %v7138_v7 = vpop.eup %5078  ;;  %v3102_v13 = vmul.f32 1.442695, %v3066_v5  ;;  %v3104_v22 = vmul.f32 1.442695, %v3067_v21  ;;  %5094 = vrcp.f32 %v1053_v38  ;;  %2476 = vadd.xlane.f32.xlu1 %v2475_v40 }
 0x466   : > { %v7140_v0 = vpop.eup %5080  ;;  %1929 = vmatprep.mubr.f32.mxu1 %v1098_v45  ;;  %v3025_v35 = vpop.xlane.xlu1 %3024 }
 0x467   : > { %v1056_v18 = vpop.xlane.xlu0 %1055  ;;  %v5083_v56 = vpop.eup %5082  ;;  %5096 = vpow2.f32 %v3102_v13  ;;  %1930 = vmatmul.mubr.f32.gmra.mrb[50].mxu1 %v1097_v15  ;;  %v3068_v39 = vsub.f32 %v6801_v3, %v3025_v35  ;;  %v3069_v19 = vsub.f32 %v6804_v37, %v3025_v35  ;;  %v2478_v14 = vadd.f32 %v7140_v0, %v7138_v7  ;;  %v8048_v15 = vld [vmem:[#allocation32_spill] sm:$0xff]  ;;  %v8049_v35 = vld [vmem:[#allocation30_spill] sm:$0xff] }
 0x468   : > { %5098 = vpow2.f32 %v3104_v22  ;;  %v1100_v61 = vmul.f32 %v5083_v56, %v6748_v30  ;;  %v1099_v38 = vmul.f32 %v5083_v56, %v6741_v46 }
 0x469   : > { %v7148_v5 = vpop.eup %5084  ;;  %v3106_v21 = vmul.f32 1.442695, %v3068_v39  ;;  %v3108_v40 = vmul.f32 1.442695, %v3069_v19  ;;  %5100 = vrcp.f32 %v1056_v18  ;;  %2479 = vadd.xlane.f32.xlu0 %v2478_v14 }
 0x46a   : > { %v7150_v45 = vpop.eup %5086  ;;  %1934 = vmatprep.mubr.f32.mxu1 %v1100_v61  ;;  %v3028_v3 = vpop.xlane.xlu1 %3027 }
 0x46b   : > { %v1059_v41 = vpop.xlane.xlu0 %1058  ;;  %v5089_v37 = vpop.eup %5088  ;;  %5102 = vpow2.f32 %v3106_v21  ;;  %1935 = vmatmul.mubr.f32.gmra.mrb[52].mxu1 %v1099_v38  ;;  %v3070_v22 = vsub.f32 %v6817_v49, %v3028_v3  ;;  %v3071_v30 = vsub.f32 %v6820_v27, %v3028_v3  ;;  %v3158_v46 = vadd.f32 %v7150_v45, %v7148_v5  ;;  %v8050_v3 = vld [vmem:[#allocation33_spill] sm:$0xff] }
 0x46c   : > { %5104 = vpow2.f32 %v3108_v40  ;;  %v1102_v13 = vmul.f32 %v5089_v37, %v8048_v15  ;;  %v1101_v18 = vmul.f32 %v5089_v37, %v8049_v35 }
 0x46d   : > { %v7158_v56 = vpop.eup %5090  ;;  %v3110_v39 = vmul.f32 1.442695, %v3070_v22  ;;  %v3112_v19 = vmul.f32 1.442695, %v3071_v30  ;;  %5106 = vrcp.f32 %v1059_v41  ;;  %3159 = vadd.xlane.f32.xlu1 %v3158_v46  ;;  %v8051_v41 = vld [vmem:[#allocation31_spill] sm:$0xff] }
 0x46e   : > { %v7160_v14 = vpop.eup %5092  ;;  %1939 = vmatprep.mubr.f32.mxu1 %v1102_v13  ;;  %v3031_v49 = vpop.xlane.xlu1 %3030 }
 0x46f   : > { %v1062_v61 = vpop.xlane.xlu0 %1061  ;;  %v5095_v27 = vpop.eup %5094  ;;  %5108 = vpow2.f32 %v3110_v39  ;;  %1940 = vmatmul.mubr.f32.gmra.mrb[54].mxu1 %v1101_v18  ;;  %v3072_v38 = vsub.f32 %v6833_v1, %v3031_v49  ;;  %v3073_v21 = vsub.f32 %v6836_v51, %v3031_v49  ;;  %v3161_v40 = vadd.f32 %v7160_v14, %v7158_v56 }
 0x470   : > { %5110 = vpow2.f32 %v3112_v19  ;;  %v1104_v37 = vmul.f32 %v5095_v27, %v8050_v3  ;;  %v1103_v22 = vmul.f32 %v5095_v27, %v8051_v41  ;;  %v8052_v19 = vld [vmem:[#allocation37_spill] sm:$0xff]  ;;  %v8053_v27 = vld [vmem:[#allocation34_spill] sm:$0xff] }
 0x471   : > { %v7168_v30 = vpop.eup %5096  ;;  %v3114_v46 = vmul.f32 1.442695, %v3072_v38  ;;  %v3116_v15 = vmul.f32 1.442695, %v3073_v21  ;;  %5112 = vrcp.f32 %v1062_v61  ;;  %3162 = vadd.xlane.f32.xlu0 %v3161_v40  ;;  %v8054_v41 = vld [vmem:[#allocation41_spill] sm:$0xff] }
 0x472   : > { %v7170_v13 = vpop.eup %5098  ;;  %1944 = vmatprep.mubr.f32.mxu1 %v1104_v37  ;;  %v3034_v1 = vpop.xlane.xlu1 %3033 }
 0x473   : > { %v5101_v35 = vpop.eup %5100  ;;  %5114 = vpow2.f32 %v3114_v46  ;;  %1945 = vmatmul.mubr.f32.gmra.mrb[56].mxu1 %v1103_v22  ;;  %v3074_v51 = vsub.f32 %v6845_v58, %v3034_v1  ;;  %v3075_v18 = vsub.f32 %v6848_v25, %v3034_v1  ;;  %v3164_v39 = vadd.f32 %v7170_v13, %v7168_v30 }
 0x474   : > { %5116 = vpow2.f32 %v3116_v15  ;;  %v1106_v49 = vmul.f32 %v5101_v35, %v8052_v19  ;;  %v1105_v61 = vmul.f32 %v5101_v35, %v8053_v27  ;;  %v8055_v15 = vld [vmem:[#allocation36_spill] sm:$0xff]  ;;  %v8056_v35 = vld [vmem:[#allocation35_spill] sm:$0xff] }
 0x475   : > { %v7178_v38 = vpop.eup %5102  ;;  %v3118_v21 = vmul.f32 1.442695, %v3074_v51  ;;  %v3120_v40 = vmul.f32 1.442695, %v3075_v18  ;;  %3165 = vadd.xlane.f32.xlu1 %v3164_v39 }
 0x476   : > { %v7180_v3 = vpop.eup %5104  ;;  %1949 = vmatprep.mubr.f32.mxu1 %v1106_v49  ;;  %v3037_v37 = vpop.xlane.xlu1 %3036 }
 0x477   : > { %v5107_v58 = vpop.eup %5106  ;;  %5118 = vpow2.f32 %v3118_v21  ;;  %1950 = vmatmul.mubr.f32.gmra.mrb[58].mxu1 %v1105_v61  ;;  %v3076_v25 = vsub.f32 %v6855_v8, %v3037_v37  ;;  %v3077_v22 = vsub.f32 %v8054_v41, %v3037_v37  ;;  %v3167_v46 = vadd.f32 %v7180_v3, %v7178_v38  ;;  %v8057_v21 = vld [vmem:[#allocation42_spill] sm:$0xff] }
 0x478   : > { %5120 = vpow2.f32 %v3120_v40  ;;  %v1108_v1 = vmul.f32 %v5107_v58, %v8055_v15  ;;  %v1107_v51 = vmul.f32 %v5107_v58, %v8056_v35  ;;  %v8058_v58 = vld [vmem:[#allocation39_spill] sm:$0xff] }
 0x479   : > { %v7188_v18 = vpop.eup %5108  ;;  %v3122_v39 = vmul.f32 1.442695, %v3076_v25  ;;  %v3124_v19 = vmul.f32 1.442695, %v3077_v22  ;;  %3168 = vadd.xlane.f32.xlu0 %v3167_v46  ;;  %v8059_v25 = vld [vmem:[#allocation38_spill] sm:$0xff] }
 0x47a   : > { %v7190_v49 = vpop.eup %5110  ;;  %1954 = vmatprep.mubr.f32.mxu1 %v1108_v1  ;;  %v3040_v27 = vpop.xlane.xlu1 %3039 }
 0x47b   : > { %v5113_v8 = vpop.eup %5112  ;;  %5122 = vpow2.f32 %v3122_v39  ;;  %1955 = vmatmul.mubr.f32.gmra.mrb[60].mxu1 %v1107_v51  ;;  %v3078_v61 = vsub.f32 %v6865_v52, %v3040_v27  ;;  %v3079_v40 = vsub.f32 %v8057_v21, %v3040_v27  ;;  %v3170_v37 = vadd.f32 %v7190_v49, %v7188_v18  ;;  %v8060_v39 = vld [vmem:[#allocation44_spill] sm:$0xff] }
 0x47c   : > { %5124 = vpow2.f32 %v3124_v19  ;;  %v1110_v41 = vmul.f32 %v5113_v8, %v8058_v58  ;;  %v1109_v22 = vmul.f32 %v5113_v8, %v8059_v25 }
 0x47d   : > { %v7198_v46 = vpop.eup %5114  ;;  %v3126_v15 = vmul.f32 1.442695, %v3078_v61  ;;  %v3128_v1 = vmul.f32 1.442695, %v3079_v40  ;;  %3171 = vadd.xlane.f32.xlu1 %v3170_v37 }
 0x47e   : > { %v7200_v35 = vpop.eup %5116  ;;  %1959 = vmatprep.mubr.f32.mxu1 %v1110_v41  ;;  %v3043_v51 = vpop.xlane.xlu1 %3042  ;;  %v8061_v41 = vld [vmem:[#allocation79_spill] sm:$0xff] }
 0x47f   : > { %5126 = vpow2.f32 %v3126_v15  ;;  %1960 = vmatmul.mubr.f32.gmra.mrb[62].mxu1 %v1109_v22  ;;  %v3080_v52 = vsub.f32 %v6875_v59, %v3043_v51  ;;  %v3081_v27 = vsub.f32 %v8060_v39, %v3043_v51  ;;  %v3173_v19 = vadd.f32 %v7200_v35, %v7198_v46 }
 0x480   : > { %5128 = vpow2.f32 %v3128_v1 }
 0x481   : > { %v7206_v8 = vpop.eup %5118  ;;  %v3130_v21 = vmul.f32 1.442695, %v3080_v52  ;;  %v3132_v61 = vmul.f32 1.442695, %v3081_v27  ;;  %3174 = vadd.xlane.f32.xlu0 %v3173_v19  ;;  %v8062_v27 = vld [vmem:[#allocation80_spill] sm:$0xff] }
 0x482   : > { %v7208_v40 = vpop.eup %5120  ;;  %v3046_v37 = vpop.xlane.xlu1 %3045 }
 0x483   : > { %5130 = vpow2.f32 %v3130_v21  ;;  %v3082_v58 = vsub.f32 %v6885_v23, %v3046_v37  ;;  %v3083_v25 = vsub.f32 %v8061_v41, %v3046_v37  ;;  %v3176_v59 = vadd.f32 %v7208_v40, %v7206_v8 }
 0x484   : > { %5132 = vpow2.f32 %v3132_v61 }
 0x485   : > { %v7214_v22 = vpop.eup %5122  ;;  %v3134_v15 = vmul.f32 1.442695, %v3082_v58  ;;  %v3136_v1 = vmul.f32 1.442695, %v3083_v25  ;;  %3177 = vadd.xlane.f32.xlu1 %v3176_v59  ;;  %v8063_v59 = vld [vmem:[#allocation81_spill] sm:$0xff] }
 0x486   : > { %v7216_v51 = vpop.eup %5124  ;;  %v3049_v52 = vpop.xlane.xlu1 %3048 }
 0x487   : > { %5134 = vpow2.f32 %v3134_v15  ;;  %v3084_v39 = vsub.f32 %v6895_v9, %v3049_v52  ;;  %v3085_v19 = vsub.f32 %v8062_v27, %v3049_v52  ;;  %v3179_v23 = vadd.f32 %v7216_v51, %v7214_v22 }
 0x488   : > { %5136 = vpow2.f32 %v3136_v1 }
 0x489   : > { %v7222_v21 = vpop.eup %5126  ;;  %v3138_v61 = vmul.f32 1.442695, %v3084_v39  ;;  %v3140_v37 = vmul.f32 1.442695, %v3085_v19  ;;  %3180 = vadd.xlane.f32.xlu0 %v3179_v23 }
 0x48a   : > { %v7224_v58 = vpop.eup %5128  ;;  %v3052_v41 = vpop.xlane.xlu1 %3051 }
 0x48b   : > { %5138 = vpow2.f32 %v3138_v61  ;;  %v3086_v25 = vsub.f32 %v6905_v31, %v3052_v41  ;;  %v3087_v15 = vsub.f32 %v8063_v59, %v3052_v41  ;;  %v3182_v9 = vadd.f32 %v7224_v58, %v7222_v21 }
 0x48c   : > { %5140 = vpow2.f32 %v3140_v37 }
 0x48d   : > { %v7230_v52 = vpop.eup %5130  ;;  %v3142_v1 = vmul.f32 1.442695, %v3086_v25  ;;  %v3144_v27 = vmul.f32 1.442695, %v3087_v15  ;;  %3183 = vadd.xlane.f32.xlu1 %v3182_v9 }
 0x48e   : > { %v7232_v39 = vpop.eup %5132  ;;  %v3055_v19 = vpop.xlane.xlu1 %3054 }
 0x48f   : > { %5142 = vpow2.f32 %v3142_v1  ;;  %v3088_v23 = vsub.f32 %v6915_v55, %v3055_v19  ;;  %v3089_v61 = vsub.f32 %v6918_v6, %v3055_v19  ;;  %v3185_v31 = vadd.f32 %v7232_v39, %v7230_v52 }
 0x490   : > { %5144 = vpow2.f32 %v3144_v27 }
 0x491   : > { %v7238_v41 = vpop.eup %5134  ;;  %v3146_v37 = vmul.f32 1.442695, %v3088_v23  ;;  %v3148_v59 = vmul.f32 1.442695, %v3089_v61  ;;  %3186 = vadd.xlane.f32.xlu0 %v3185_v31 }
 0x492   : > { %v7240_v25 = vpop.eup %5136  ;;  %v3058_v15 = vpop.xlane.xlu1 %3057 }
 0x493   : > { %5146 = vpow2.f32 %v3146_v37  ;;  %v3090_v9 = vsub.f32 %v6925_v43, %v3058_v15  ;;  %v3091_v1 = vsub.f32 %v6928_v57, %v3058_v15  ;;  %v3188_v55 = vadd.f32 %v7240_v25, %v7238_v41 }
 0x494   : > { %5148 = vpow2.f32 %v3148_v59 }
 0x495   : > { %v7246_v6 = vpop.eup %5138  ;;  %v3150_v27 = vmul.f32 1.442695, %v3090_v9  ;;  %v3152_v19 = vmul.f32 1.442695, %v3091_v1  ;;  %3189 = vadd.xlane.f32.xlu1 %v3188_v55 }
 0x496   : > { %v7248_v23 = vpop.eup %5140  ;;  %v3061_v61 = vpop.xlane.xlu1 %3060 }
 0x497   : > { %5150 = vpow2.f32 %v3150_v27  ;;  %v3092_v31 = vsub.f32 %v6935_v54, %v3061_v61  ;;  %v3093_v37 = vsub.f32 %v6938_v16, %v3061_v61  ;;  %v3191_v43 = vadd.f32 %v7248_v23, %v7246_v6 }
 0x498   : > { %5152 = vpow2.f32 %v3152_v19 }
 0x499   : > { %v7254_v57 = vpop.eup %5142  ;;  %v3154_v59 = vmul.f32 1.442695, %v3092_v31  ;;  %v3156_v15 = vmul.f32 1.442695, %v3093_v37  ;;  %3192 = vadd.xlane.f32.xlu0 %v3191_v43 }
 0x49a   : > { %v7256_v9 = vpop.eup %5144 }
 0x49b   : > { %5154 = vpow2.f32 %v3154_v59  ;;  %v3194_v1 = vadd.f32 %v7256_v9, %v7254_v57 }
 0x49c   : > { %5156 = vpow2.f32 %v3156_v15 }
 0x49d   : > { %v7260_v55 = vpop.eup %5146  ;;  %3195 = vadd.xlane.f32.xlu1 %v3194_v1 }
 0x49e   : > { %8064 = vst [vmem:[#allocation22_spill] sm:$0xff] %v7260_v55  ;;  %v7262_v54 = vpop.eup %5148 }
 0x49f   : > { %8065 = vst [vmem:[#allocation77_spill] sm:$0xff] %v7262_v54  ;;  %v3197_v16 = vadd.f32 %v7262_v54, %v7260_v55 }
 0x4a1   : > { %v7266_v27 = vpop.eup %5150  ;;  %3198 = vadd.xlane.f32.xlu0 %v3197_v16 }
 0x4a2   : > { %8066 = vst [vmem:[#allocation17_spill] sm:$0xff] %v7266_v27  ;;  %v7268_v19 = vpop.eup %5152 }
 0x4a3   : > { %v3200_v61 = vadd.f32 %v7268_v19, %v7266_v27 }
 0x4a5   : > { %v7272_v31 = vpop.eup %5154  ;;  %3201 = vadd.xlane.f32.xlu1 %v3200_v61 }
 0x4a6   : > { %v7274_v37 = vpop.eup %5156 }
 0x4a7   : > { %v3203_v43 = vadd.f32 %v7274_v37, %v7272_v31 }
 0x4a9   : > { %3204 = vadd.xlane.f32.xlu0 %v3203_v43 }
 0x4ba   : > { %v2435_v59 = vpop.xlane.xlu0 %2434 }
 0x4bb   : > { %5158 = vrcp.f32 %v2435_v59 }
 0x4be   : > { %v2438_v15 = vpop.xlane.xlu0 %2437 }
 0x4bf   : > { %5160 = vrcp.f32 %v2438_v15 }
 0x4c2   : > { %v2441_v1 = vpop.xlane.xlu0 %2440 }
 0x4c3   : > { %5162 = vrcp.f32 %v2441_v1  ;;  %v8069_v1 = vld [vmem:[#allocation10_spill] sm:$0xff] }
 0x4c5   : > { %v5159_v16 = vpop.eup %5158 }
 0x4c6   : > { %v2497_v55 = vmul.f32 %v5159_v16, %v6950_v44  ;;  %v2444_v54 = vpop.xlane.xlu0 %2443  ;;  %v2498_v27 = vmul.f32 %v5159_v16, %v6952_v12 }
 0x4c7   : > { %5164 = vrcp.f32 %v2444_v54 }
 0x4c8   : > { %2593 = vmatprep.mubr.f32.mxu1 %v2498_v27 }
 0x4c9   : > { %v5161_v61 = vpop.eup %5160  ;;  %2594 = vmatmul.mubr.f32.vlgmr.msra.gmra.mrb[64].mxu1 %v2497_v55 }
 0x4ca   : > { %4768 = vmatpush3.bf16.msk.msra.mxu1 %vm6383_vm11, %v7999_v24  ;;  %v2447_v43 = vpop.xlane.xlu0 %2446  ;;  %v2500_v59 = vmul.f32 %v5161_v61, %v6960_v28  ;;  %v2499_v15 = vmul.f32 %v5161_v61, %v6958_v62  ;;  %v8071_v61 = vld [vmem:[#allocation64_spill] sm:$0xff] }
 0x4cb   : > { %5166 = vrcp.f32 %v2447_v43  ;;  %4771 = vmatprep.subr.msk.bf16.mxu1 %vm6383_vm11, %v8002_v60  ;;  %v8067_v60 = vld [vmem:[#allocation9_spill] sm:$0xff]  ;;  %v8072_v43 = vld [vmem:[#allocation16_spill] sm:$0xff] }
 0x4cc   : > { %2598 = vmatprep.mubr.f32.mxu1 %v2500_v59 }
 0x4cd   : > { %v5163_v44 = vpop.eup %5162  ;;  %2599 = vmatmul.mubr.f32.gmra.mrb[66].mxu1 %v2499_v15  ;;  %v8073_v15 = vld [vmem:[#allocation15_spill] sm:$0xff] }
 0x4ce   : > { %v2450_v12 = vpop.xlane.xlu0 %2449  ;;  %v2502_v55 = vmul.f32 %v5163_v44, %v6968_v2  ;;  %v2501_v54 = vmul.f32 %v5163_v44, %v6966_v32  ;;  %4774 = vmatpush3.bf16.msk.msra.mxu1 %vm6383_vm11, %v8006_v47  ;;  %v8068_v47 = vld [vmem:[#allocation82_spill] sm:$0xff] }
 0x4cf   : > { %5168 = vrcp.f32 %v2450_v12  ;;  %4777 = vmatprep.subr.msk.bf16.mxu1 %vm6383_vm11, %v8008_v53 }
 0x4d0   : > { %2603 = vmatprep.mubr.f32.mxu1 %v2502_v55 }
 0x4d1   : > { %v5165_v62 = vpop.eup %5164  ;;  %2604 = vmatmul.mubr.f32.gmra.mrb[68].mxu1 %v2501_v54  ;;  %v8074_v54 = vld [vmem:[#allocation18_spill] sm:$0xff] }
 0x4d2   : > { %v2453_v28 = vpop.xlane.xlu0 %2452  ;;  %v2504_v24 = vmul.f32 %v5165_v62, %v6976_v17  ;;  %v2503_v27 = vmul.f32 %v5165_v62, %v8067_v60  ;;  %4780 = vmatpush3.bf16.msk.msra.mxu1 %vm6383_vm11, %v8013_v11  ;;  %v8070_v17 = vld [vmem:[#allocation63_spill] sm:$0xff]  ;;  %v8076_v60 = vld [vmem:[#allocation8_spill] sm:$0xff] }
 0x4d3   : > { %5170 = vrcp.f32 %v2453_v28  ;;  %4783 = vmatprep.subr.msk.bf16.mxu1 %vm6383_vm11, %v8015_v34  ;;  %v8075_v28 = vld [vmem:[#allocation2_spill] sm:$0xff] }
 0x4d4   : > { %2608 = vmatprep.mubr.f32.mxu1 %v2504_v24 }
 0x4d5   : > { %v5167_v32 = vpop.eup %5166  ;;  %2609 = vmatmul.mubr.f32.gmra.mrb[70].mxu1 %v2503_v27 }
 0x4d6   : > { %v2456_v2 = vpop.xlane.xlu0 %2455  ;;  %v2506_v53 = vmul.f32 %v5167_v32, %v8068_v47  ;;  %v2505_v16 = vmul.f32 %v5167_v32, %v8069_v1  ;;  %4786 = vmatpush3.bf16.msk.msra.mxu1 %vm6383_vm11, %v8070_v17  ;;  %v8077_v32 = vld [vmem:[#allocation7_spill] sm:$0xff]  ;;  %v8078_v47 = vld [vmem:[#allocation20_spill] sm:$0xff]  ;;  %v8079_v1 = vld [vmem:[#allocation74_spill] sm:$0xff] }
 0x4d7   : > { %5172 = vrcp.f32 %v2456_v2  ;;  %4789 = vmatprep.subr.msk.bf16.mxu1 %vm6383_vm11, %v8071_v61  ;;  %v8080_v61 = vld [vmem:[#allocation11_spill] sm:$0xff] }
 0x4d8   : > { %2613 = vmatprep.mubr.f32.mxu1 %v2506_v53 }
 0x4d9   : > { %v5169_v11 = vpop.eup %5168  ;;  %2614 = vmatmul.mubr.f32.gmra.mrb[72].mxu1 %v2505_v16 }
 0x4da   : > { %v2459_v34 = vpop.xlane.xlu0 %2458  ;;  %v2508_v59 = vmul.f32 %v5169_v11, %v8072_v43  ;;  %v2507_v44 = vmul.f32 %v5169_v11, %v8073_v15  ;;  %4792 = vmatpush3.bf16.msk.msra.mxu1 %vm6383_vm11, %v8027_v36  ;;  %v8082_v15 = vld [vmem:[#allocation72_spill] sm:$0xff] }
 0x4db   : > { %5174 = vrcp.f32 %v2459_v34  ;;  %4795 = vmatprep.subr.msk.bf16.mxu1 %vm6383_vm11, %v8029_v48 }
 0x4dc   : > { %2618 = vmatprep.mubr.f32.mxu1 %v2508_v59 }
 0x4dd   : > { %v5171_v12 = vpop.eup %5170  ;;  %2619 = vmatmul.mubr.f32.gmra.mrb[74].mxu1 %v2507_v44 }
 0x4de   : > { %v2462_v55 = vpop.xlane.xlu0 %2461  ;;  %v2510_v62 = vmul.f32 %v5171_v12, %v8074_v54  ;;  %v2509_v24 = vmul.f32 %v5171_v12, %v8075_v28  ;;  %4798 = vmatpush3.bf16.msk.msra.mxu1 %vm6383_vm11, %v8033_v29  ;;  %v8083_v12 = vld [vmem:[#allocation57_spill] sm:$0xff]  ;;  %v8084_v54 = vld [vmem:[#allocation14_spill] sm:$0xff] }
 0x4df   : > { %5176 = vrcp.f32 %v2462_v55  ;;  %4801 = vmatprep.subr.msk.bf16.mxu1 %vm6383_vm11, %v8035_v50  ;;  %v8085_v28 = vld [vmem:[#allocation58_spill] sm:$0xff] }
 0x4e0   : > { %2623 = vmatprep.mubr.f32.mxu1 %v2510_v62 }
 0x4e1   : > { %v5173_v36 = vpop.eup %5172  ;;  %2624 = vmatmul.mubr.f32.gmra.mrb[76].mxu1 %v2509_v24 }
 0x4e2   : > { %v2465_v48 = vpop.xlane.xlu1 %2464  ;;  %v2512_v27 = vmul.f32 %v5173_v36, %v8076_v60  ;;  %v2511_v2 = vmul.f32 %v5173_v36, %v8077_v32  ;;  %4804 = vmatpush3.bf16.msk.msra.mxu1 %vm6383_vm11, %v8039_v4  ;;  %v8086_v60 = vld [vmem:[#allocation59_spill] sm:$0xff]  ;;  %v8087_v32 = vld [vmem:[#allocation13_spill] sm:$0xff] }
 0x4e3   : > { %5178 = vrcp.f32 %v2465_v48  ;;  %4807 = vmatprep.subr.msk.bf16.mxu1 %vm6383_vm11, %v8041_v33  ;;  %v8081_v33 = vld [vmem:[#allocation12_spill] sm:$0xff] }
 0x4e4   : > { %2628 = vmatprep.mubr.f32.mxu1 %v2512_v27 }
 0x4e5   : > { %v5175_v29 = vpop.eup %5174  ;;  %2629 = vmatmul.mubr.f32.gmra.mrb[78].mxu1 %v2511_v2 }
 0x4e6   : > { %v2468_v50 = vpop.xlane.xlu0 %2467  ;;  %v2514_v53 = vmul.f32 %v5175_v29, %v8078_v47  ;;  %v2513_v16 = vmul.f32 %v5175_v29, %v8079_v1  ;;  %4810 = vmatpush3.bf16.msk.msra.mxu1 %vm6383_vm11, %v8044_v63 }
 0x4e7   : > { %5180 = vrcp.f32 %v2468_v50 }
 0x4e8   : > { %2633 = vmatprep.mubr.f32.mxu1 %v2514_v53  ;;  %v8088_v53 = vld [vmem:[#allocation60_spill] sm:$0xff] }
 0x4e9   : > { %v5177_v4 = vpop.eup %5176  ;;  %2634 = vmatmul.mubr.f32.gmra.mrb[80].mxu1 %v2513_v16 }
 0x4ea   : > { %v2471_v17 = vpop.xlane.xlu1 %2470  ;;  %v2516_v11 = vmul.f32 %v5177_v4, %v8080_v61  ;;  %v2515_v34 = vmul.f32 %v5177_v4, %v8081_v33 }
 0x4eb   : > { %5182 = vrcp.f32 %v2471_v17 }
 0x4ec   : > { %2638 = vmatprep.mubr.f32.mxu1 %v2516_v11 }
 0x4ed   : > { %v5179_v43 = vpop.eup %5178  ;;  %2639 = vmatmul.mubr.f32.gmra.mrb[82].mxu1 %v2515_v34 }
 0x4ee   : > { %v2474_v59 = vpop.xlane.xlu0 %2473  ;;  %v2518_v44 = vmul.f32 %v5179_v43, %v8082_v15  ;;  %v2517_v55 = vmul.f32 %v5179_v43, %v8083_v12 }
 0x4ef   : > { %5184 = vrcp.f32 %v2474_v59 }
 0x4f0   : > { %2643 = vmatprep.mubr.f32.mxu1 %v2518_v44 }
 0x4f1   : > { %v5181_v63 = vpop.eup %5180  ;;  %2644 = vmatmul.mubr.f32.gmra.mrb[84].mxu1 %v2517_v55 }
 0x4f2   : > { %v2477_v10 = vpop.xlane.xlu1 %2476  ;;  %v2520_v62 = vmul.f32 %v5181_v63, %v8084_v54  ;;  %v2519_v24 = vmul.f32 %v5181_v63, %v8085_v28 }
 0x4f3   : > { %5186 = vrcp.f32 %v2477_v10 }
 0x4f4   : > { %2648 = vmatprep.mubr.f32.mxu1 %v2520_v62 }
 0x4f5   : > { %v5183_v36 = vpop.eup %5182  ;;  %2649 = vmatmul.mubr.f32.gmra.mrb[86].mxu1 %v2519_v24 }
 0x4f6   : > { %v2480_v48 = vpop.xlane.xlu0 %2479  ;;  %v2522_v27 = vmul.f32 %v5183_v36, %v8086_v60  ;;  %v2521_v2 = vmul.f32 %v5183_v36, %v8087_v32  ;;  %v8089_v60 = vld [vmem:[#allocation40_spill] sm:$0xff] }
 0x4f7   : > { %5188 = vrcp.f32 %v2480_v48 }
 0x4f8   : > { %2653 = vmatprep.mubr.f32.mxu1 %v2522_v27 }
 0x4f9   : > { %v5185_v29 = vpop.eup %5184  ;;  %2654 = vmatmul.mubr.f32.gmra.mrb[88].mxu1 %v2521_v2 }
 0x4fa   : > { %v3160_v50 = vpop.xlane.xlu1 %3159  ;;  %v2524_v47 = vmul.f32 %v5185_v29, %v7114_v42  ;;  %v2523_v1 = vmul.f32 %v5185_v29, %v8088_v53 }
 0x4fb   : > { %5190 = vrcp.f32 %v3160_v50  ;;  %v8090_v50 = vld [vmem:[#allocation47_spill] sm:$0xff] }
 0x4fc   : > { %2658 = vmatprep.mubr.f32.mxu1 %v2524_v47 }
 0x4fd   : > { %v5187_v16 = vpop.eup %5186  ;;  %2659 = vmatmul.mubr.f32.gmra.mrb[90].mxu1 %v2523_v1 }
 0x4fe   : > { %v3163_v4 = vpop.xlane.xlu0 %3162  ;;  %v2526_v17 = vmul.f32 %v5187_v16, %v7130_v20  ;;  %v2525_v61 = vmul.f32 %v5187_v16, %v7125_v26 }
 0x4ff   : > { %5192 = vrcp.f32 %v3163_v4 }
 0x500   : > { %2663 = vmatprep.mubr.f32.mxu1 %v2526_v17 }
 0x501   : > { %v5189_v11 = vpop.eup %5188  ;;  %2664 = vmatmul.mubr.f32.gmra.mrb[92].mxu1 %v2525_v61  ;;  %v8091_v61 = vld [vmem:[#allocation48_spill] sm:$0xff] }
 0x502   : > { %v3166_v33 = vpop.xlane.xlu1 %3165  ;;  %v2528_v34 = vmul.f32 %v5189_v11, %v7140_v0  ;;  %v2527_v42 = vmul.f32 %v5189_v11, %v7138_v7 }
 0x503   : > { %5194 = vrcp.f32 %v3166_v33 }
 0x504   : > { %2668 = vmatprep.mubr.f32.mxu1 %v2528_v34 }
 0x505   : > { %v5191_v43 = vpop.eup %5190  ;;  %2669 = vmatmul.mubr.f32.gmra.mrb[94].mxu1 %v2527_v42 }
 0x506   : > { %v3222_v59 = vmul.f32 %v5191_v43, %v7148_v5  ;;  %v3169_v15 = vpop.xlane.xlu0 %3168  ;;  %v3223_v20 = vmul.f32 %v5191_v43, %v7150_v45 }
 0x507   : > { %5196 = vrcp.f32 %v3169_v15  ;;  %v8092_v15 = vld [vmem:[#allocation50_spill] sm:$0xff] }
 0x508   : > { %3318 = vmatprep.mubr.f32.mxu1 %v3223_v20 }
 0x509   : > { %v5193_v26 = vpop.eup %5192  ;;  %3319 = vmatmul.mubr.f32.vlgmr.msra.gmra.mrb[96].mxu1 %v3222_v59 }
 0x50a   : > { %v3172_v44 = vpop.xlane.xlu1 %3171  ;;  %v3225_v12 = vmul.f32 %v5193_v26, %v7160_v14  ;;  %v3224_v0 = vmul.f32 %v5193_v26, %v7158_v56 }
 0x50b   : > { %5198 = vrcp.f32 %v3172_v44 }
 0x50c   : > { %3323 = vmatprep.mubr.f32.mxu1 %v3225_v12 }
 0x50d   : > { %v5195_v7 = vpop.eup %5194  ;;  %3324 = vmatmul.mubr.f32.gmra.mrb[98].mxu1 %v3224_v0 }
 0x50e   : > { %v3175_v55 = vpop.xlane.xlu0 %3174  ;;  %v3227_v63 = vmul.f32 %v5195_v7, %v7170_v13  ;;  %v3226_v5 = vmul.f32 %v5195_v7, %v7168_v30 }
 0x50f   : > { %5200 = vrcp.f32 %v3175_v55  ;;  %v8093_v55 = vld [vmem:[#allocation51_spill] sm:$0xff] }
 0x510   : > { %3328 = vmatprep.mubr.f32.mxu1 %v3227_v63 }
 0x511   : > { %v5197_v45 = vpop.eup %5196  ;;  %3329 = vmatmul.mubr.f32.gmra.mrb[100].mxu1 %v3226_v5 }
 0x512   : > { %v3178_v10 = vpop.xlane.xlu1 %3177  ;;  %v3229_v54 = vmul.f32 %v5197_v45, %v7180_v3  ;;  %v3228_v14 = vmul.f32 %v5197_v45, %v7178_v38 }
 0x513   : > { %5202 = vrcp.f32 %v3178_v10 }
 0x514   : > { %3333 = vmatprep.mubr.f32.mxu1 %v3229_v54 }
 0x515   : > { %v5199_v56 = vpop.eup %5198  ;;  %3334 = vmatmul.mubr.f32.gmra.mrb[102].mxu1 %v3228_v14 }
 0x516   : > { %v4091_v62 = vpop.f32.mrb[32].mxu1  ;;  %v3181_v28 = vpop.xlane.xlu0 %3180  ;;  %v3231_v24 = vmul.f32 %v5199_v56, %v7190_v49  ;;  %v3230_v13 = vmul.f32 %v5199_v56, %v7188_v18  ;;  %v8094_v56 = vld [vmem:[#allocation43_spill] sm:$0xff] }
 0x517   : > { %v4092_v30 = vpop.f32.mrb[33].mxu1  ;;  %5204 = vrcp.f32 %v3181_v28 }
 0x518   : > { %v4093_v36 = vadd.f32 %v4092_v30, %v4091_v62  ;;  %3338 = vmatprep.mubr.f32.mxu1 %v3231_v24 }
 0x519   : > { %v5201_v48 = vpop.eup %5200  ;;  %3339 = vmatmul.mubr.f32.gmra.mrb[104].mxu1 %v3230_v13 }
 0x51a   : > { %v7366_v3 = vadd.f32 %v4093_v36, %v8089_v60  ;;  %v4094_v38 = vpop.f32.mrb[34].mxu1  ;;  %v3184_v27 = vpop.xlane.xlu1 %3183  ;;  %v3233_v32 = vmul.f32 %v5201_v48, %v7200_v35  ;;  %v3232_v2 = vmul.f32 %v5201_v48, %v7198_v46  ;;  %v8095_v48 = vld [vmem:[#allocation46_spill] sm:$0xff] }
 0x51b   : > { %5206 = vrcp.f32 %v3184_v27  ;;  %v4095_v29 = vpop.f32.mrb[35].mxu1 }
 0x51c   : > { %v4096_v49 = vadd.f32 %v4095_v29, %v4094_v38  ;;  %3343 = vmatprep.mubr.f32.mxu1 %v3233_v32 }
 0x51d   : > { %v5203_v18 = vpop.eup %5202  ;;  %3344 = vmatmul.mubr.f32.gmra.mrb[106].mxu1 %v3232_v2 }
 0x51e   : > { %v7371_v47 = vadd.f32 %v4096_v49, %v8090_v50  ;;  %v4097_v53 = vpop.f32.mrb[36].mxu1  ;;  %v3187_v1 = vpop.xlane.xlu0 %3186  ;;  %v3235_v16 = vmul.f32 %v5203_v18, %v7208_v40  ;;  %v3234_v4 = vmul.f32 %v5203_v18, %v7206_v8  ;;  %v8096_v49 = vld [vmem:[#allocation53_spill] sm:$0xff] }
 0x51f   : > { %v4098_v17 = vpop.f32.mrb[37].mxu1  ;;  %5208 = vrcp.f32 %v3187_v1 }
 0x520   : > { %v4099_v35 = vadd.f32 %v4098_v17, %v4097_v53  ;;  %3348 = vmatprep.mubr.f32.mxu1 %v3235_v16  ;;  %v8097_v17 = vld [vmem:[#allocation54_spill] sm:$0xff] }
 0x521   : > { %v5205_v46 = vpop.eup %5204  ;;  %3349 = vmatmul.mubr.f32.gmra.mrb[108].mxu1 %v3234_v4 }
 0x522   : > { %v7376_v11 = vadd.f32 %v4099_v35, %v8091_v61  ;;  %v4100_v33 = vpop.f32.mrb[38].mxu1  ;;  %v3190_v34 = vpop.xlane.xlu1 %3189  ;;  %v3237_v42 = vmul.f32 %v5205_v46, %v7216_v51  ;;  %v3236_v43 = vmul.f32 %v5205_v46, %v7214_v22  ;;  %v8098_v61 = vld [vmem:[#allocation77_spill] sm:$0xff] }
 0x523   : > { %5210 = vrcp.f32 %v3190_v34  ;;  %v4101_v59 = vpop.f32.mrb[39].mxu1  ;;  %v8099_v34 = vld [vmem:[#allocation22_spill] sm:$0xff] }
 0x524   : > { %v4102_v40 = vadd.f32 %v4101_v59, %v4100_v33  ;;  %3353 = vmatprep.mubr.f32.mxu1 %v3237_v42 }
 0x525   : > { %v5207_v8 = vpop.eup %5206  ;;  %3354 = vmatmul.mubr.f32.gmra.mrb[110].mxu1 %v3236_v43 }
 0x526   : > { %v7381_v20 = vadd.f32 %v4102_v40, %v8092_v15  ;;  %v4103_v26 = vpop.f32.mrb[40].mxu1  ;;  %v3193_v44 = vpop.xlane.xlu0 %3192  ;;  %v3239_v12 = vmul.f32 %v5207_v8, %v7224_v58  ;;  %v3238_v0 = vmul.f32 %v5207_v8, %v7222_v21 }
 0x527   : > { %v4104_v7 = vpop.f32.mrb[41].mxu1  ;;  %5212 = vrcp.f32 %v3193_v44 }
 0x528   : > { %v4105_v51 = vadd.f32 %v4104_v7, %v4103_v26  ;;  %3358 = vmatprep.mubr.f32.mxu1 %v3239_v12  ;;  %v8101_v26 = vld [vmem:[#allocation17_spill] sm:$0xff] }
 0x529   : > { %v5209_v22 = vpop.eup %5208  ;;  %3359 = vmatmul.mubr.f32.gmra.mrb[112].mxu1 %v3238_v0 }
 0x52a   : > { %v7386_v63 = vadd.f32 %v4105_v51, %v8093_v55  ;;  %v4106_v5 = vpop.f32.mrb[42].mxu1  ;;  %v3196_v45 = vpop.xlane.xlu1 %3195  ;;  %v3241_v10 = vmul.f32 %v5209_v22, %v7232_v39  ;;  %v3240_v54 = vmul.f32 %v5209_v22, %v7230_v52  ;;  %v8102_v51 = vld [vmem:[#allocation52_spill] sm:$0xff] }
 0x52b   : > { %5214 = vrcp.f32 %v3196_v45  ;;  %v4107_v14 = vpop.f32.mrb[43].mxu1 }
 0x52c   : > { %v4108_v58 = vadd.f32 %v4107_v14, %v4106_v5  ;;  %3363 = vmatprep.mubr.f32.mxu1 %v3241_v10 }
 0x52d   : > { %v5211_v21 = vpop.eup %5210  ;;  %3364 = vmatmul.mubr.f32.gmra.mrb[114].mxu1 %v3240_v54 }
 0x52e   : > { %v7391_v62 = vadd.f32 %v4108_v58, %v8094_v56  ;;  %v4109_v28 = vpop.f32.mrb[44].mxu1  ;;  %v3199_v24 = vpop.xlane.xlu0 %3198  ;;  %v3243_v13 = vmul.f32 %v5211_v21, %v7240_v25  ;;  %v3242_v30 = vmul.f32 %v5211_v21, %v7238_v41 }
 0x52f   : > { %v4110_v36 = vpop.f32.mrb[45].mxu1  ;;  %5216 = vrcp.f32 %v3199_v24 }
 0x530   : > { %v4111_v39 = vadd.f32 %v4110_v36, %v4109_v28  ;;  %3368 = vmatprep.mubr.f32.mxu1 %v3243_v13  ;;  %v8104_v28 = vld [vmem:[#allocation3_spill] sm:$0xff] }
 0x531   : > { %v5213_v52 = vpop.eup %5212  ;;  %3369 = vmatmul.mubr.f32.gmra.mrb[116].mxu1 %v3242_v30 }
 0x532   : > { %v7396_v60 = vadd.f32 %v4111_v39, %v8095_v48  ;;  %v4112_v38 = vpop.f32.mrb[46].mxu1  ;;  %v3202_v27 = vpop.xlane.xlu1 %3201  ;;  %v3245_v32 = vmul.f32 %v5213_v52, %v7248_v23  ;;  %v3244_v2 = vmul.f32 %v5213_v52, %v7246_v6  ;;  %v8105_v39 = vld [vmem:[#allocation4_spill] sm:$0xff] }
 0x533   : > { %5218 = vrcp.f32 %v3202_v27  ;;  %v4113_v29 = vpop.f32.mrb[47].mxu1 }
 0x534   : > { %v4114_v25 = vadd.f32 %v4113_v29, %v4112_v38  ;;  %3373 = vmatprep.mubr.f32.mxu1 %v3245_v32  ;;  %v8106_v38 = vld [vmem:[#allocation5_spill] sm:$0xff] }
 0x535   : > { %v5215_v41 = vpop.eup %5214  ;;  %3374 = vmatmul.mubr.f32.gmra.mrb[118].mxu1 %v3244_v2 }
 0x536   : > { %v7401_v18 = vadd.f32 %v4114_v25, %v8096_v49  ;;  %v4115_v50 = vpop.f32.mrb[48].mxu1  ;;  %v3205_v53 = vpop.xlane.xlu0 %3204  ;;  %v3247_v1 = vmul.f32 %v5215_v41, %v7256_v9  ;;  %v3246_v16 = vmul.f32 %v5215_v41, %v7254_v57  ;;  %v8100_v57 = vld [vmem:[#allocation49_spill] sm:$0xff]  ;;  %v8107_v25 = vld [vmem:[#allocation6_spill] sm:$0xff] }
 0x537   : > { %v4116_v4 = vpop.f32.mrb[49].mxu1  ;;  %5220 = vrcp.f32 %v3205_v53 }
 0x538   : > { %v4117_v23 = vadd.f32 %v4116_v4, %v4115_v50  ;;  %3378 = vmatprep.mubr.f32.mxu1 %v3247_v1 }
 0x539   : > { %v5217_v6 = vpop.eup %5216  ;;  %3379 = vmatmul.mubr.f32.gmra.mrb[120].mxu1 %v3246_v16 }
 0x53a   : > { %v7406_v35 = vadd.f32 %v4117_v23, %v8097_v17  ;;  %v4118_v46 = vpop.f32.mrb[50].mxu1  ;;  %v3249_v33 = vmul.f32 %v5217_v6, %v8098_v61  ;;  %v3248_v42 = vmul.f32 %v5217_v6, %v8099_v34 }
 0x53b   : > { %v4119_v43 = vpop.f32.mrb[51].mxu1 }
 0x53c   : > { %v4120_v59 = vadd.f32 %v4119_v43, %v4118_v46  ;;  %3383 = vmatprep.mubr.f32.mxu1 %v3249_v33 }
 0x53d   : > { %v5219_v9 = vpop.eup %5218  ;;  %3384 = vmatmul.mubr.f32.gmra.mrb[122].mxu1 %v3248_v42 }
 0x53e   : > { %v7411_v40 = vadd.f32 %v4120_v59, %v8100_v57  ;;  %v4121_v8 = vpop.f32.mrb[52].mxu1  ;;  %v3251_v15 = vmul.f32 %v5219_v9, %v7268_v19  ;;  %v3250_v44 = vmul.f32 %v5219_v9, %v8101_v26  ;;  %v8103_v19 = vld [vmem:[#allocation55_spill] sm:$0xff] }
 0x53f   : > { %v4122_v12 = vpop.f32.mrb[53].mxu1 }
 0x540   : > { %v4123_v0 = vadd.f32 %v4122_v12, %v4121_v8  ;;  %3388 = vmatprep.mubr.f32.mxu1 %v3251_v15 }
 0x541   : > { %v5221_v7 = vpop.eup %5220  ;;  %3389 = vmatmul.mubr.f32.gmra.mrb[124].mxu1 %v3250_v44 }
 0x542   : > { %v7416_v22 = vadd.f32 %v4123_v0, %v8102_v51  ;;  %v4124_v55 = vpop.f32.mrb[54].mxu1  ;;  %v3253_v5 = vmul.f32 %v5221_v7, %v7274_v37  ;;  %v3252_v45 = vmul.f32 %v5221_v7, %v7272_v31 }
 0x543   : > { %v4125_v10 = vpop.f32.mrb[55].mxu1 }
 0x544   : > { %v4126_v54 = vadd.f32 %v4125_v10, %v4124_v55  ;;  %3393 = vmatprep.mubr.f32.mxu1 %v3253_v5 }
 0x545   : > { %3394 = vmatmul.mubr.f32.gmra.mrb[126].mxu1 %v3252_v45 }
 0x546   : > { %v7421_v14 = vadd.f32 %v4126_v54, %v8103_v19  ;;  %v4127_v58 = vpop.f32.mrb[56].mxu1 }
 0x547   : > { %v4128_v21 = vpop.f32.mrb[57].mxu1 }
 0x548   : > { %v4129_v56 = vadd.f32 %v4128_v21, %v4127_v58 }
 0x54a   : > { %v7424_v24 = vadd.f32 %v4129_v56, %v8104_v28  ;;  %v4130_v13 = vpop.f32.mrb[58].mxu1 }
 0x54b   : > { %v4131_v30 = vpop.f32.mrb[59].mxu1 }
 0x54c   : > { %v4132_v36 = vadd.f32 %v4131_v30, %v4130_v13 }
 0x54e   : > { %v7427_v37 = vadd.f32 %v4132_v36, %v8105_v39  ;;  %v4133_v31 = vpop.f32.mrb[60].mxu1 }
 0x54f   : > { %v4134_v52 = vpop.f32.mrb[61].mxu1 }
 0x550   : > { %v4135_v48 = vadd.f32 %v4134_v52, %v4133_v31 }
 0x552   : > { %v7430_v27 = vadd.f32 %v4135_v48, %v8106_v38  ;;  %v4136_v32 = vpop.f32.mrb[62].mxu1 }
 0x553   : > { %v4137_v2 = vpop.f32.mrb[63].mxu1 }
 0x554   : > { %v4138_v29 = vadd.f32 %v4137_v2, %v4136_v32 }
 0x556   : > { %v7433_v41 = vadd.f32 %v4138_v29, %v8107_v25 }
 0x59c   : > { %v4235_v49 = vpop.f32.mrb[64].mxu1 }
 0x59d   : > { %v4236_v50 = vpop.f32.mrb[65].mxu1 }
 0x59e   : > { %v4237_v53 = vadd.f32 %v4236_v50, %v4235_v49 }
 0x5a0   : > { %v7436_v1 = vadd.f32 %v4237_v53, %v7366_v3  ;;  %v4238_v16 = vpop.f32.mrb[66].mxu1 }
 0x5a1   : > { %v4239_v4 = vpop.f32.mrb[67].mxu1 }
 0x5a2   : > { %v4240_v23 = vadd.f32 %v4239_v4, %v4238_v16 }
 0x5a4   : > { %v7439_v6 = vadd.f32 %v4240_v23, %v7371_v47  ;;  %v4241_v17 = vpop.f32.mrb[68].mxu1 }
 0x5a5   : > { %v4242_v46 = vpop.f32.mrb[69].mxu1 }
 0x5a6   : > { %v4243_v61 = vadd.f32 %v4242_v46, %v4241_v17 }
 0x5a8   : > { %v7442_v33 = vadd.f32 %v4243_v61, %v7376_v11  ;;  %v4244_v34 = vpop.f32.mrb[70].mxu1 }
 0x5a9   : > { %v4245_v42 = vpop.f32.mrb[71].mxu1 }
 0x5aa   : > { %v4246_v43 = vadd.f32 %v4245_v42, %v4244_v34 }
 0x5ac   : > { %v7445_v59 = vadd.f32 %v4246_v43, %v7381_v20  ;;  %v4247_v3 = vpop.f32.mrb[72].mxu1 }
 0x5ad   : > { %v4248_v9 = vpop.f32.mrb[73].mxu1 }
 0x5ae   : > { %v4249_v57 = vadd.f32 %v4248_v9, %v4247_v3 }
 0x5b0   : > { %v7448_v8 = vadd.f32 %v4249_v57, %v7386_v63  ;;  %v4250_v47 = vpop.f32.mrb[74].mxu1 }
 0x5b1   : > { %v4251_v15 = vpop.f32.mrb[75].mxu1 }
 0x5b2   : > { %v4252_v26 = vadd.f32 %v4251_v15, %v4250_v47 }
 0x5b4   : > { %v7451_v44 = vadd.f32 %v4252_v26, %v7391_v62  ;;  %v4253_v11 = vpop.f32.mrb[76].mxu1 }
 0x5b5   : > { %v4254_v12 = vpop.f32.mrb[77].mxu1 }
 0x5b6   : > { %v4255_v0 = vadd.f32 %v4254_v12, %v4253_v11 }
 0x5b8   : > { %v7454_v7 = vadd.f32 %v4255_v0, %v7396_v60  ;;  %v4256_v20 = vpop.f32.mrb[78].mxu1 }
 0x5b9   : > { %v4257_v51 = vpop.f32.mrb[79].mxu1 }
 0x5ba   : > { %v4258_v55 = vadd.f32 %v4257_v51, %v4256_v20 }
 0x5bc   : > { %v7457_v5 = vadd.f32 %v4258_v55, %v7401_v18  ;;  %v4259_v63 = vpop.f32.mrb[80].mxu1 }
 0x5bd   : > { %v4260_v45 = vpop.f32.mrb[81].mxu1 }
 0x5be   : > { %v4261_v10 = vadd.f32 %v4260_v45, %v4259_v63 }
 0x5c0   : > { %v7460_v54 = vadd.f32 %v4261_v10, %v7406_v35  ;;  %v4262_v62 = vpop.f32.mrb[82].mxu1 }
 0x5c1   : > { %v4263_v19 = vpop.f32.mrb[83].mxu1 }
 0x5c2   : > { %v4264_v58 = vadd.f32 %v4263_v19, %v4262_v62 }
 0x5c4   : > { %v7463_v21 = vadd.f32 %v4264_v58, %v7411_v40  ;;  %v4265_v60 = vpop.f32.mrb[84].mxu1 }
 0x5c5   : > { %v4266_v56 = vpop.f32.mrb[85].mxu1 }
 0x5c6   : > { %v4267_v28 = vadd.f32 %v4266_v56, %v4265_v60 }
 0x5c8   : > { %v7466_v13 = vadd.f32 %v4267_v28, %v7416_v22  ;;  %v4268_v18 = vpop.f32.mrb[86].mxu1 }
 0x5c9   : > { %v4269_v30 = vpop.f32.mrb[87].mxu1 }
 0x5ca   : > { %v4270_v36 = vadd.f32 %v4269_v30, %v4268_v18 }
 0x5cc   : > { %v7469_v39 = vadd.f32 %v4270_v36, %v7421_v14  ;;  %v4271_v35 = vpop.f32.mrb[88].mxu1 }
 0x5cd   : > { %v4272_v31 = vpop.f32.mrb[89].mxu1 }
 0x5ce   : > { %v4273_v52 = vadd.f32 %v4272_v31, %v4271_v35 }
 0x5d0   : > { %v7472_v48 = vadd.f32 %v4273_v52, %v7424_v24  ;;  %v4274_v40 = vpop.f32.mrb[90].mxu1 }
 0x5d1   : > { %v4275_v38 = vpop.f32.mrb[91].mxu1 }
 0x5d2   : > { %v4276_v32 = vadd.f32 %v4275_v38, %v4274_v40 }
 0x5d4   : > { %v7475_v2 = vadd.f32 %v4276_v32, %v7427_v37  ;;  %v4277_v22 = vpop.f32.mrb[92].mxu1 }
 0x5d5   : > { %v4278_v29 = vpop.f32.mrb[93].mxu1 }
 0x5d6   : > { %v4279_v25 = vadd.f32 %v4278_v29, %v4277_v22 }
 0x5d8   : > { %v7478_v49 = vadd.f32 %v4279_v25, %v7430_v27  ;;  %v4280_v14 = vpop.f32.mrb[94].mxu1 }
 0x5d9   : > { %v4281_v50 = vpop.f32.mrb[95].mxu1 }
 0x5da   : > { %v4282_v53 = vadd.f32 %v4281_v50, %v4280_v14 }
 0x5dc   : > { %v7481_v16 = vadd.f32 %v4282_v53, %v7433_v41  ;;  %v4379_v24 = vpop.f32.mrb[96].mxu1 }
 0x5dd   : > { %v4380_v4 = vpop.f32.mrb[97].mxu1 }
 0x5de   : > { %v4381_v23 = vadd.f32 %v4380_v4, %v4379_v24 }
 0x5e0   : > { %v3399_v37 = vadd.f32 %v4381_v23, %v7436_v1  ;;  %v4382_v27 = vpop.f32.mrb[98].mxu1 }
 0x5e1   : > { %v4383_v17 = vpop.f32.mrb[99].mxu1 }
 0x5e2   : > { %3415 = vst [vmem:[%s7487_s17] sm:$0xff] %v3399_v37  ;;  %v4384_v46 = vadd.f32 %v4383_v17, %v4382_v27 }
 0x5e4   : > { %v3400_v41 = vadd.f32 %v4384_v46, %v7439_v6  ;;  %v4385_v61 = vpop.f32.mrb[100].mxu1 }
 0x5e5   : > { %v4386_v34 = vpop.f32.mrb[101].mxu1 }
 0x5e6   : > { %3416 = vst [vmem:[%s7487_s17 + $0x8] sm:$0xff] %v3400_v41  ;;  %v4387_v42 = vadd.f32 %v4386_v34, %v4385_v61 }
 0x5e8   : > { %v3401_v43 = vadd.f32 %v4387_v42, %v7442_v33  ;;  %v4388_v3 = vpop.f32.mrb[102].mxu1 }
 0x5e9   : > { %v4389_v9 = vpop.f32.mrb[103].mxu1 }
 0x5ea   : > { %3417 = vst [vmem:[%s7487_s17 + $0x10] sm:$0xff] %v3401_v43  ;;  %v4390_v57 = vadd.f32 %v4389_v9, %v4388_v3 }
 0x5ec   : > { %v3402_v1 = vadd.f32 %v4390_v57, %v7445_v59  ;;  %v4391_v47 = vpop.f32.mrb[104].mxu1 }
 0x5ed   : > { %v4392_v15 = vpop.f32.mrb[105].mxu1 }
 0x5ee   : > { %3418 = vst [vmem:[%s7487_s17 + $0x18] sm:$0xff] %v3402_v1  ;;  %v4393_v26 = vadd.f32 %v4392_v15, %v4391_v47 }
 0x5f0   : > { %v3403_v6 = vadd.f32 %v4393_v26, %v7448_v8  ;;  %v4394_v11 = vpop.f32.mrb[106].mxu1 }
 0x5f1   : > { %v4395_v12 = vpop.f32.mrb[107].mxu1 }
 0x5f2   : > { %3419 = vst [vmem:[%s7487_s17 + $0x20] sm:$0xff] %v3403_v6  ;;  %v4396_v0 = vadd.f32 %v4395_v12, %v4394_v11 }
 0x5f4   : > { %v3404_v33 = vadd.f32 %v4396_v0, %v7451_v44  ;;  %v4397_v20 = vpop.f32.mrb[108].mxu1 }
 0x5f5   : > { %v4398_v51 = vpop.f32.mrb[109].mxu1 }
 0x5f6   : > { %3420 = vst [vmem:[%s7487_s17 + $0x28] sm:$0xff] %v3404_v33  ;;  %v4399_v55 = vadd.f32 %v4398_v51, %v4397_v20 }
 0x5f8   : > { %v3405_v59 = vadd.f32 %v4399_v55, %v7454_v7  ;;  %v4400_v63 = vpop.f32.mrb[110].mxu1 }
 0x5f9   : > { %v4401_v45 = vpop.f32.mrb[111].mxu1 }
 0x5fa   : > { %3421 = vst [vmem:[%s7487_s17 + $0x30] sm:$0xff] %v3405_v59  ;;  %v4402_v10 = vadd.f32 %v4401_v45, %v4400_v63 }
 0x5fc   : > { %v3406_v8 = vadd.f32 %v4402_v10, %v7457_v5  ;;  %v4403_v62 = vpop.f32.mrb[112].mxu1 }
 0x5fd   : > { %v4404_v19 = vpop.f32.mrb[113].mxu1 }
 0x5fe   : > { %3422 = vst [vmem:[%s7487_s17 + $0x38] sm:$0xff] %v3406_v8  ;;  %v4405_v58 = vadd.f32 %v4404_v19, %v4403_v62 }
 0x600   : > { %v3407_v44 = vadd.f32 %v4405_v58, %v7460_v54  ;;  %v4406_v60 = vpop.f32.mrb[114].mxu1 }
 0x601   : > { %v4407_v56 = vpop.f32.mrb[115].mxu1 }
 0x602   : > { %3423 = vst [vmem:[%s7487_s17 + $0x40] sm:$0xff] %v3407_v44  ;;  %v4408_v28 = vadd.f32 %v4407_v56, %v4406_v60 }
 0x604   : > { %v3408_v7 = vadd.f32 %v4408_v28, %v7463_v21  ;;  %v4409_v18 = vpop.f32.mrb[116].mxu1 }
 0x605   : > { %v4410_v30 = vpop.f32.mrb[117].mxu1 }
 0x606   : > { %3424 = vst [vmem:[%s7487_s17 + $0x48] sm:$0xff] %v3408_v7  ;;  %v4411_v36 = vadd.f32 %v4410_v30, %v4409_v18 }
 0x608   : > { %v3409_v5 = vadd.f32 %v4411_v36, %v7466_v13  ;;  %v4412_v35 = vpop.f32.mrb[118].mxu1 }
 0x609   : > { %v4413_v31 = vpop.f32.mrb[119].mxu1 }
 0x60a   : > { %3425 = vst [vmem:[%s7487_s17 + $0x50] sm:$0xff] %v3409_v5  ;;  %v4414_v52 = vadd.f32 %v4413_v31, %v4412_v35 }
 0x60c   : > { %v3410_v54 = vadd.f32 %v4414_v52, %v7469_v39  ;;  %v4415_v40 = vpop.f32.mrb[120].mxu1 }
 0x60d   : > { %v4416_v38 = vpop.f32.mrb[121].mxu1 }
 0x60e   : > { %3426 = vst [vmem:[%s7487_s17 + $0x58] sm:$0xff] %v3410_v54  ;;  %v4417_v32 = vadd.f32 %v4416_v38, %v4415_v40 }
 0x610   : > { %v3411_v21 = vadd.f32 %v4417_v32, %v7472_v48  ;;  %v4418_v22 = vpop.f32.mrb[122].mxu1 }
 0x611   : > { %v4419_v29 = vpop.f32.mrb[123].mxu1 }
 0x612   : > { %3427 = vst [vmem:[%s7487_s17 + $0x60] sm:$0xff] %v3411_v21  ;;  %v4420_v25 = vadd.f32 %v4419_v29, %v4418_v22 }
 0x614   : > { %v3412_v13 = vadd.f32 %v4420_v25, %v7475_v2  ;;  %v4421_v14 = vpop.f32.mrb[124].mxu1 }
 0x615   : > { %v4422_v50 = vpop.f32.mrb[125].mxu1 }
 0x616   : > { %3428 = vst [vmem:[%s7487_s17 + $0x68] sm:$0xff] %v3412_v13  ;;  %v4423_v53 = vadd.f32 %v4422_v50, %v4421_v14 }
 0x618   : > { %v3413_v39 = vadd.f32 %v4423_v53, %v7478_v49  ;;  %v4424_v24 = vpop.f32.mrb[126].mxu1 }
 0x619   : > { %v4425_v4 = vpop.f32.mrb[127].mxu1 }
 0x61a   : > { %3429 = vst [vmem:[%s7487_s17 + $0x70] sm:$0xff] %v3413_v39  ;;  %v4426_v23 = vadd.f32 %v4425_v4, %v4424_v24 }
 0x61c   : > { %v3414_v37 = vadd.f32 %v4426_v23, %v7481_v16 }
 0x61e   : > { %3430 = vst [vmem:[%s7487_s17 + $0x78] sm:$0xff] %v3414_v37 }
 0x61f PF: > { %s15_s20 = sadd.s32 1, %s5260_s20   ;;  %s8108_s18 = smov %s5256_s19 }
 0x620   : > { %p12_p5 = scmp.ge.s32.totalorder %s15_s20, 4   ;;  %s8109_s19 = smov %s8111_s21 }
 0x622   :  { %14 = sbr.rel (!%p12_p5) target bundleno = 2 (0x2), region = 82 }

</bundles_post_ra>
